<compile_context>
chip_gen: v7x
topology: tpu7x:2x2x1
jax: 0.10.0
libtpu: 0.0.40
codegen_flags: <defaults>
</compile_context>

<pallas_src>
import math
import functools

import jax
import jax.numpy as jnp
from jax.experimental import pallas as pl
from jax.experimental.pallas import tpu as pltpu

MAX_LEN = 64
EPS = 1e-5                                      # F.layer_norm default eps
_MASK_VALUE = -float(jnp.finfo(jnp.float32).max)
_BF16 = jnp.bfloat16


# ----------------------------------------------------------------------------
# In-kernel helpers
# ----------------------------------------------------------------------------
def _layer_norm(x, gamma):
    # T5LayerNorm == F.layer_norm with beta buffer = 0.  Keep in f32.
    mu = jnp.mean(x, axis=-1, keepdims=True)
    var = jnp.mean(jnp.square(x - mu), axis=-1, keepdims=True)
    return (x - mu) * jax.lax.rsqrt(var + EPS) * gamma


def _mm(a, w):
    # MXU matmul: activation cast to bf16, weight already stored bf16, f32 acc.
    return jnp.dot(a.astype(_BF16), w, preferred_element_type=jnp.float32)


def _attention(q, k, v, bias, wo_h, *, bt, nq, nk, heads, dim_head):
    """Multi-head attention core, batched over (head, batch-tile).

    q        : (bt*nq, heads*dim_head) f32, already scaled by dim_head**-0.5.
    k, v     : (bt*nk, heads*dim_head) f32.
    bias     : (heads, nq, nk) f32 with scale & causal mask pre-folded, or None.
    wo_h     : (heads, dim_head, D) bf16 out-projection weight (head-major rows).
    Returns  : (bt*nq, D) f32 -- out-projection applied, bias NOT added.
    """
    g = heads * bt

    def heads_major(t, n):
        # (bt*n, H*dh) -> (H, bt*n, dh) -> (H*bt, n, dh).  The trailing regroup
        # only repartitions leading/sublane dims at multiples of 8 (layout-free).
        th = jnp.swapaxes(t.reshape(bt * n, heads, dim_head), 0, 1)
        return th.reshape(g, n, dim_head)

    qh = heads_major(q, nq)
    kh = heads_major(k, nk)
    vh = heads_major(v, nk)

    sim = jnp.einsum('gqd,gkd->gqk', qh.astype(_BF16), kh.astype(_BF16),
                     preferred_element_type=jnp.float32)          # (H*bt, nq, nk)
    if bias is not None:                                          # scale+mask folded
        sim = (sim.reshape(heads, bt, nq, nk) + bias[:, None]).reshape(g, nq, nk)

    # Softmax in f32; normalize via approx reciprocal (EUP slot, ~free).
    sim = sim - jnp.max(sim, axis=-1, keepdims=True)
    p = jnp.exp(sim)
    p = p * pl.reciprocal(jnp.sum(p, axis=-1, keepdims=True), approx=True)

    ctx = jnp.einsum('gqk,gkd->gqd', p.astype(_BF16), vh.astype(_BF16),
                     preferred_element_type=jnp.float32)          # (H*bt, nq, dh)

    # Fused out-projection WITHOUT transposing heads back to the lane dim:
    # per-head batched (rows, dh) @ (dh, D), then a cheap reduction over heads.
    ctx = ctx.reshape(heads, bt * nq, dim_head)
    out_h = jnp.einsum('hrd,hdk->hrk', ctx.astype(_BF16), wo_h,
                       preferred_element_type=jnp.float32)        # (H, bt*nq, D)
    return jnp.sum(out_h, axis=0)                                 # (bt*nq, D)


# ----------------------------------------------------------------------------
# Fused decoder-stack kernel: grid = (batch_blocks, depth)
# ----------------------------------------------------------------------------
def decoder_stack_kernel(
        x_ref, ctx_ref, fgamma_ref, bias_ref,
        sa_gamma_ref, sa_wqkv_ref, sa_wo_ref, sa_bo_ref,
        ca_gamma_ref, ca_wq_ref, ca_wkv_ref, ca_wo_ref, ca_bo_ref,
        ff_gamma_ref, w1_ref, b1_ref, w2_ref, b2_ref,
        o_ref, acc_ref, *, heads, dim_head):
    """One decoder layer per grid step; residual stream lives in acc_ref."""
    l = pl.program_id(1)
    bt, n, d = acc_ref.shape
    m = ctx_ref.shape[1]
    inner = heads * dim_head
    scale = dim_head ** -0.5

    # Initialize the resident residual stream from the token embeddings.
    @pl.when(l == 0)
    def _():
        acc_ref[...] = x_ref[...]

    x = acc_ref[...]                                   # (bt, n, d) f32

    # --- PreNorm(Residual(T5SelfAttention(causal=True))) ---
    xn = _layer_norm(x, sa_gamma_ref[...])
    qkv = _mm(xn.reshape(bt * n, d), sa_wqkv_ref[...])     # fused q|k|v, 3*inner lanes
    q = qkv[:, :inner] * scale
    k = qkv[:, inner:2 * inner]
    v = qkv[:, 2 * inner:]
    sa = _attention(q, k, v, bias_ref[...], sa_wo_ref[...],
                    bt=bt, nq=n, nk=n, heads=heads, dim_head=dim_head)
    x = (sa + sa_bo_ref[...]).reshape(bt, n, d) + xn   # Residual adds normalized input

    # --- PreNorm(Residual(T5CrossAttention)) : k/v from the raw context ---
    xn = _layer_norm(x, ca_gamma_ref[...])
    q = _mm(xn.reshape(bt * n, d), ca_wq_ref[...]) * scale
    kv = _mm(ctx_ref[...].reshape(bt * m, d), ca_wkv_ref[...])   # fused k|v
    k = kv[:, :inner]
    v = kv[:, inner:]
    ca = _attention(q, k, v, None, ca_wo_ref[...],
                    bt=bt, nq=n, nk=m, heads=heads, dim_head=dim_head)
    x = (ca + ca_bo_ref[...]).reshape(bt, n, d) + xn

    # --- PreNorm(Residual(FeedForward)) ---
    xn = _layer_norm(x, ff_gamma_ref[...])
    h = jnp.maximum(_mm(xn.reshape(bt * n, d), w1_ref[...]) + b1_ref[...], 0.0)
    y = _mm(h, w2_ref[...]) + b2_ref[...]
    x = y.reshape(bt, n, d) + xn

    acc_ref[...] = x

    # Fused final T5LayerNorm; output written once per batch block.
    @pl.when(l == pl.num_programs(1) - 1)
    def _():
        o_ref[...] = _layer_norm(x, fgamma_ref[...]).astype(o_ref.dtype)


# ----------------------------------------------------------------------------
# Glue: causal relative-position bias (scale + causal mask folded in)
# ----------------------------------------------------------------------------
def causal_rel_pos_bucket(n, *, num_buckets=32, max_distance=MAX_LEN):
    q_pos = jnp.arange(n, dtype=jnp.int32)
    k_pos = jnp.arange(n, dtype=jnp.int32)
    rel_pos = k_pos[None, :] - q_pos[:, None]
    neg = jnp.maximum(-rel_pos, 0)                    # causal branch of bucket fn
    max_exact = num_buckets // 2
    is_small = neg < max_exact
    val_if_large = max_exact + (
        jnp.log(jnp.maximum(neg, 1).astype(jnp.float32) / max_exact)
        / math.log(max_distance / max_exact) * (num_buckets - max_exact)
    ).astype(jnp.int32)
    val_if_large = jnp.minimum(val_if_large, num_buckets - 1)
    return jnp.where(is_small, neg, val_if_large)     # (n, n) int32


def build_masked_pos_bias(rel_bias, n, dim_head):
    """(depth, H, n, n) f32: bias * dim_head**-0.5 with causal mask pre-folded."""
    bucket = causal_rel_pos_bucket(n)                 # (n, n)
    vals = rel_bias[:, bucket]                        # (depth, n, n, H)
    bias = jnp.transpose(vals, (0, 3, 1, 2)) * (dim_head ** -0.5)
    causal = jnp.arange(n)[None, :] > jnp.arange(n)[:, None]     # col > row
    return jnp.where(causal[None, None], _MASK_VALUE, bias).astype(jnp.float32)


# ----------------------------------------------------------------------------
# Full decoder forward: ONE pallas_call over (batch_blocks, depth)
# ----------------------------------------------------------------------------
def t5_decoder_forward(tokens, context, params, *, heads, dim_head, batch_block=None):
    x = params["token_emb"][tokens]                   # embedding gather (glue), f32
    B, N, D = x.shape
    M = context.shape[1]
    depth = params["sa_wqkv"].shape[0]
    bt = B if batch_block is None else batch_block
    assert B % bt == 0 and N % 8 == 0 and M % 8 == 0 and D % 128 == 0

    pos_bias = build_masked_pos_bias(params["rel_bias"], N, dim_head)

    layer_arrays = [
        pos_bias,
        params["sa_gamma"], params["sa_wqkv"], params["sa_wo"], params["sa_bo"],
        params["ca_gamma"], params["ca_wq"], params["ca_wkv"], params["ca_wo"],
        params["ca_bo"],
        params["ff_gamma"], params["w1"], params["b1"], params["w2"], params["b2"],
    ]

    def layer_spec(a):
        # Leading depth axis squeezed out; block index = depth grid index.
        s = a.shape[1:]
        zeros = (0,) * len(s)
        return pl.BlockSpec((None,) + s, lambda b, l, _z=zeros: (l,) + _z)

    kernel = functools.partial(decoder_stack_kernel, heads=heads, dim_head=dim_head)
    return pl.pallas_call(
        kernel,
        out_shape=jax.ShapeDtypeStruct((B, N, D), jnp.float32),
        grid=(B // bt, depth),
        in_specs=[
            pl.BlockSpec((bt, N, D), lambda b, l: (b, 0, 0)),   # token embeddings
            pl.BlockSpec((bt, M, D), lambda b, l: (b, 0, 0)),   # encoder context
            pl.BlockSpec((1, D), lambda b, l: (0, 0)),          # final_norm gamma
        ] + [layer_spec(a) for a in layer_arrays],
        out_specs=pl.BlockSpec((bt, N, D), lambda b, l: (b, 0, 0)),
        scratch_shapes=[pltpu.VMEM((bt, N, D), jnp.float32)],   # resident residual
        compiler_params=pltpu.CompilerParams(
            dimension_semantics=("parallel", "arbitrary"),
            vmem_limit_bytes=32 * 1024 * 1024),
    )(x, context, params["final_gamma"], *layer_arrays)


# ----------------------------------------------------------------------------
# Deterministic synthetic parameters (stacked along depth; weights in bf16)
# ----------------------------------------------------------------------------
def init_params(key, *, vocab_size, dim, depth, heads, dim_head, mlp_mult):
    inner = heads * dim_head
    hidden = dim * mlp_mult
    ks = jax.random.split(key, 9)

    def nrm(k, shape, s=0.02, dtype=jnp.float32):
        return (jax.random.normal(k, shape, dtype=jnp.float32) * s).astype(dtype)

    return {
        "token_emb": nrm(ks[0], (vocab_size, dim), 1.0),
        "final_gamma": jnp.ones((1, dim), jnp.float32),
        # Per-layer params stacked on a leading depth axis (weights bf16).
        "rel_bias": nrm(ks[1], (depth, 32, heads)),            # Embedding(32, heads)
        "sa_gamma": jnp.ones((depth, 1, dim), jnp.float32),
        "sa_wqkv": nrm(ks[2], (depth, dim, 3 * inner), dtype=_BF16),   # [wq|wk|wv]
        "sa_wo": nrm(ks[3], (depth, heads, dim_head, dim), dtype=_BF16),
        "sa_bo": jnp.zeros((depth, 1, dim), jnp.float32),
        "ca_gamma": jnp.ones((depth, 1, dim), jnp.float32),
        "ca_wq": nrm(ks[4], (depth, dim, inner), dtype=_BF16),
        "ca_wkv": nrm(ks[5], (depth, dim, 2 * inner), dtype=_BF16),    # [wk|wv]
        "ca_wo": nrm(ks[6], (depth, heads, dim_head, dim), dtype=_BF16),
        "ca_bo": jnp.zeros((depth, 1, dim), jnp.float32),
        "ff_gamma": jnp.ones((depth, 1, dim), jnp.float32),
        "w1": nrm(ks[7], (depth, dim, hidden), dtype=_BF16),
        "b1": jnp.zeros((depth, 1, hidden), jnp.float32),
        "w2": nrm(ks[8], (depth, hidden, dim), dtype=_BF16),
        "b2": jnp.zeros((depth, 1, dim), jnp.float32),
    }


if __name__ == "__main__":
    # Small but lane-dense demo config (D, inner, hidden multiples of 128).
    # B=4 with batch_block=2 -> 16-row matmuls AND a size-2 "parallel" batch
    # axis (v7x megacore sharding).
    B, N, M = 4, 8, 8
    dim, heads, dim_head, depth, mlp_mult, vocab = 128, 4, 32, 2, 4, 100

    key = jax.random.PRNGKey(0)
    pkey, tkey, ckey = jax.random.split(key, 3)
    params = init_params(pkey, vocab_size=vocab, dim=dim, depth=depth,
                         heads=heads, dim_head=dim_head, mlp_mult=mlp_mult)
    tokens = jax.random.randint(tkey, (B, N), 0, vocab, dtype=jnp.int32)
    context = jax.random.normal(ckey, (B, M, dim), dtype=jnp.float32)

    fwd = jax.jit(functools.partial(t5_decoder_forward, heads=heads,
                                    dim_head=dim_head, batch_block=2))
    out = jax.block_until_ready(fwd(tokens, context, params))
    assert out.shape == (B, N, dim) and out.dtype == jnp.float32
    print("KERNEL_OK")
</pallas_src>

<mosaic_0001>
module attributes {stable_mosaic.version = 11 : i64} {
  func.func @decoder_stack_kernel(%arg0: i32, %arg1: i32, %arg2: memref<2x8x128xf32, #tpu.memory_space<vmem>>, %arg3: memref<2x8x128xf32, #tpu.memory_space<vmem>>, %arg4: memref<1x128xf32, #tpu.memory_space<vmem>>, %arg5: memref<1x4x8x8xf32, #tpu.memory_space<vmem>>, %arg6: memref<1x1x128xf32, #tpu.memory_space<vmem>>, %arg7: memref<1x128x384xbf16, #tpu.memory_space<vmem>>, %arg8: memref<1x4x32x128xbf16, #tpu.memory_space<vmem>>, %arg9: memref<1x1x128xf32, #tpu.memory_space<vmem>>, %arg10: memref<1x1x128xf32, #tpu.memory_space<vmem>>, %arg11: memref<1x128x128xbf16, #tpu.memory_space<vmem>>, %arg12: memref<1x128x256xbf16, #tpu.memory_space<vmem>>, %arg13: memref<1x4x32x128xbf16, #tpu.memory_space<vmem>>, %arg14: memref<1x1x128xf32, #tpu.memory_space<vmem>>, %arg15: memref<1x1x128xf32, #tpu.memory_space<vmem>>, %arg16: memref<1x128x512xbf16, #tpu.memory_space<vmem>>, %arg17: memref<1x1x512xf32, #tpu.memory_space<vmem>>, %arg18: memref<1x512x128xbf16, #tpu.memory_space<vmem>>, %arg19: memref<1x1x128xf32, #tpu.memory_space<vmem>>, %arg20: memref<2x8x128xf32, #tpu.memory_space<vmem>>, %arg21: memref<2x8x128xf32, #tpu.memory_space<vmem>>) attributes {dimension_semantics = [#tpu.dimension_semantics<parallel>, #tpu.dimension_semantics<arbitrary>], iteration_bounds = array<i64: 2, 2>, scalar_prefetch = 0 : i64, scratch_operands = 1 : i64, tpu.core_type = #tpu.core_type<tc>, window_params = [{transform_indices = @transform_0, window_bounds = array<i64: 2, 8, 128>}, {transform_indices = @transform_1, window_bounds = array<i64: 2, 8, 128>}, {pipeline_mode = #tpu.pipeline_mode<synchronous>, transform_indices = @transform_2, window_bounds = array<i64: 1, 128>}, {transform_indices = @transform_3, window_bounds = array<i64: 1, 4, 8, 8>}, {transform_indices = @transform_4, window_bounds = array<i64: 1, 1, 128>}, {transform_indices = @transform_5, window_bounds = array<i64: 1, 128, 384>}, {transform_indices = @transform_6, window_bounds = array<i64: 1, 4, 32, 128>}, {transform_indices = @transform_7, window_bounds = array<i64: 1, 1, 128>}, {transform_indices = @transform_8, window_bounds = array<i64: 1, 1, 128>}, {transform_indices = @transform_9, window_bounds = array<i64: 1, 128, 128>}, {transform_indices = @transform_10, window_bounds = array<i64: 1, 128, 256>}, {transform_indices = @transform_11, window_bounds = array<i64: 1, 4, 32, 128>}, {transform_indices = @transform_12, window_bounds = array<i64: 1, 1, 128>}, {transform_indices = @transform_13, window_bounds = array<i64: 1, 1, 128>}, {transform_indices = @transform_14, window_bounds = array<i64: 1, 128, 512>}, {transform_indices = @transform_15, window_bounds = array<i64: 1, 1, 512>}, {transform_indices = @transform_16, window_bounds = array<i64: 1, 512, 128>}, {transform_indices = @transform_17, window_bounds = array<i64: 1, 1, 128>}, {transform_indices = @transform_18, window_bounds = array<i64: 2, 8, 128>}]} {
    %c0_i32 = arith.constant 0 : i32
    %0 = arith.cmpi eq, %arg1, %c0_i32 : i32
    %1 = arith.extui %0 : i1 to i32
    %c0_i32_0 = arith.constant 0 : i32
    %2 = arith.cmpi ne, %1, %c0_i32_0 : i32
    scf.if %2 {
      %c0_92 = arith.constant 0 : index
      %c0_93 = arith.constant 0 : index
      %c0_94 = arith.constant 0 : index
      %204 = vector.load %arg2[%c0_92, %c0_93, %c0_94] : memref<2x8x128xf32, #tpu.memory_space<vmem>>, vector<2x8x128xf32>
      %c0_95 = arith.constant 0 : index
      %c0_96 = arith.constant 0 : index
      %c0_97 = arith.constant 0 : index
      %205 = vector.load %arg21[%c0_95, %c0_96, %c0_97] : memref<2x8x128xf32, #tpu.memory_space<vmem>>, vector<2x8x128xf32>
      tpu.vector_store %arg21[%c0_95, %c0_96, %c0_97], %204 {strides = array<i32>} : memref<2x8x128xf32, #tpu.memory_space<vmem>>, vector<2x8x128xf32>,
    } else {
    }
    %c0 = arith.constant 0 : index
    %c0_1 = arith.constant 0 : index
    %c0_2 = arith.constant 0 : index
    %3 = vector.load %arg21[%c0, %c0_1, %c0_2] : memref<2x8x128xf32, #tpu.memory_space<vmem>>, vector<2x8x128xf32>
    %c0_3 = arith.constant 0 : index
    %c0_4 = arith.constant 0 : index
    %c0_5 = arith.constant 0 : index
    %4 = vector.load %arg6[%c0_3, %c0_4, %c0_5] : memref<1x1x128xf32, #tpu.memory_space<vmem>>, vector<1x1x128xf32>
    %5 = vector.shape_cast %4 : vector<1x1x128xf32> to vector<1x128xf32>
    %cst = arith.constant dense<0.000000e+00> : vector<2x8xf32>
    %6 = vector.multi_reduction <add>, %3, %cst [2] : vector<2x8x128xf32> to vector<2x8xf32>
    %7 = vector.shape_cast %6 : vector<2x8xf32> to vector<2x8x1xf32>
    %cst_6 = arith.constant 1.280000e+02 : f32
    %8 = vector.broadcast %cst_6 : f32 to vector<2x8x1xf32>
    %9 = arith.divf %7, %8 : vector<2x8x1xf32>
    %10 = vector.broadcast %9 : vector<2x8x1xf32> to vector<2x8x128xf32>
    %11 = arith.subf %3, %10 : vector<2x8x128xf32>
    %12 = arith.mulf %11, %11 : vector<2x8x128xf32>
    %cst_7 = arith.constant dense<0.000000e+00> : vector<2x8xf32>
    %13 = vector.multi_reduction <add>, %12, %cst_7 [2] : vector<2x8x128xf32> to vector<2x8xf32>
    %14 = vector.shape_cast %13 : vector<2x8xf32> to vector<2x8x1xf32>
    %cst_8 = arith.constant 1.280000e+02 : f32
    %15 = vector.broadcast %cst_8 : f32 to vector<2x8x1xf32>
    %16 = arith.divf %14, %15 : vector<2x8x1xf32>
    %17 = vector.broadcast %9 : vector<2x8x1xf32> to vector<2x8x128xf32>
    %18 = arith.subf %3, %17 : vector<2x8x128xf32>
    %cst_9 = arith.constant 9.99999974E-6 : f32
    %19 = vector.broadcast %cst_9 : f32 to vector<2x8x1xf32>
    %20 = arith.addf %16, %19 : vector<2x8x1xf32>
    %21 = math.rsqrt %20 : vector<2x8x1xf32>
    %22 = vector.broadcast %21 : vector<2x8x1xf32> to vector<2x8x128xf32>
    %23 = arith.mulf %18, %22 : vector<2x8x128xf32>
    %24 = vector.shape_cast %5 : vector<1x128xf32> to vector<1x1x128xf32>
    %25 = vector.broadcast %24 : vector<1x1x128xf32> to vector<2x8x128xf32>
    %26 = arith.mulf %23, %25 : vector<2x8x128xf32>
    %27 = vector.shape_cast %26 : vector<2x8x128xf32> to vector<16x128xf32>
    %c0_10 = arith.constant 0 : index
    %c0_11 = arith.constant 0 : index
    %c0_12 = arith.constant 0 : index
    %28 = vector.load %arg7[%c0_10, %c0_11, %c0_12] : memref<1x128x384xbf16, #tpu.memory_space<vmem>>, vector<1x128x384xbf16>
    %29 = vector.shape_cast %28 : vector<1x128x384xbf16> to vector<128x384xbf16>
    %30 = arith.truncf %27 : vector<16x128xf32> to vector<16x128xbf16>
    %cst_13 = arith.constant dense<0.000000e+00> : vector<16x384xf32>
    %31 = tpu.matmul %30, %29, %cst_13 {dimension_numbers = #tpu.dot_dimension_numbers<[1], [0], [0], [1], [0, 0, 1, 1], [], []>} : vector<16x128xbf16>, vector<128x384xbf16>, vector<16x384xf32> -> vector<16x384xf32>
    %32 = vector.extract_strided_slice %31 {offsets = [0, 0], sizes = [16, 128], strides = [1, 1]} : vector<16x384xf32> to vector<16x128xf32>
    %cst_14 = arith.constant 0.176776692 : f32
    %33 = vector.broadcast %cst_14 : f32 to vector<16x128xf32>
    %34 = arith.mulf %32, %33 : vector<16x128xf32>
    %35 = vector.extract_strided_slice %31 {offsets = [0, 128], sizes = [16, 128], strides = [1, 1]} : vector<16x384xf32> to vector<16x128xf32>
    %36 = vector.extract_strided_slice %31 {offsets = [0, 256], sizes = [16, 128], strides = [1, 1]} : vector<16x384xf32> to vector<16x128xf32>
    %c0_15 = arith.constant 0 : index
    %c0_16 = arith.constant 0 : index
    %c0_17 = arith.constant 0 : index
    %c0_18 = arith.constant 0 : index
    %37 = vector.load %arg5[%c0_15, %c0_16, %c0_17, %c0_18] : memref<1x4x8x8xf32, #tpu.memory_space<vmem>>, vector<1x4x8x8xf32>
    %38 = vector.shape_cast %37 : vector<1x4x8x8xf32> to vector<4x8x8xf32>
    %c0_19 = arith.constant 0 : index
    %c0_20 = arith.constant 0 : index
    %c0_21 = arith.constant 0 : index
    %c0_22 = arith.constant 0 : index
    %39 = vector.load %arg8[%c0_19, %c0_20, %c0_21, %c0_22] : memref<1x4x32x128xbf16, #tpu.memory_space<vmem>>, vector<1x4x32x128xbf16>
    %40 = vector.shape_cast %39 : vector<1x4x32x128xbf16> to vector<4x32x128xbf16>
    %41 = vector.shape_cast %34 : vector<16x128xf32> to vector<16x4x32xf32>
    %42 = tpu.transpose %41, [1, 0, 2] : vector<16x4x32xf32> -> vector<4x16x32xf32>
    %43 = vector.shape_cast %42 : vector<4x16x32xf32> to vector<8x8x32xf32>
    %44 = vector.shape_cast %35 : vector<16x128xf32> to vector<16x4x32xf32>
    %45 = tpu.transpose %44, [1, 0, 2] : vector<16x4x32xf32> -> vector<4x16x32xf32>
    %46 = vector.shape_cast %45 : vector<4x16x32xf32> to vector<8x8x32xf32>
    %47 = vector.shape_cast %36 : vector<16x128xf32> to vector<16x4x32xf32>
    %48 = tpu.transpose %47, [1, 0, 2] : vector<16x4x32xf32> -> vector<4x16x32xf32>
    %49 = vector.shape_cast %48 : vector<4x16x32xf32> to vector<8x8x32xf32>
    %50 = arith.truncf %43 : vector<8x8x32xf32> to vector<8x8x32xbf16>
    %51 = arith.truncf %46 : vector<8x8x32xf32> to vector<8x8x32xbf16>
    "tpu.trace_start"() <{level = 10 : i32, message = "gqd,gkd->gqk"}> : () -> ()
    %cst_23 = arith.constant dense<0.000000e+00> : vector<8x8x8xf32>
    %52 = tpu.matmul %50, %51, %cst_23 {dimension_numbers = #tpu.dot_dimension_numbers<[2], [2], [1], [1], [0, 0, 0, 1, 1, 1], [0], [0]>} : vector<8x8x32xbf16>, vector<8x8x32xbf16>, vector<8x8x8xf32> -> vector<8x8x8xf32>
    "tpu.trace_stop"() : () -> ()
    %53 = vector.shape_cast %52 : vector<8x8x8xf32> to vector<4x2x8x8xf32>
    %54 = vector.shape_cast %38 : vector<4x8x8xf32> to vector<4x1x8x8xf32>
    %55 = vector.broadcast %54 : vector<4x1x8x8xf32> to vector<4x2x8x8xf32>
    %56 = arith.addf %53, %55 : vector<4x2x8x8xf32>
    %57 = vector.shape_cast %56 : vector<4x2x8x8xf32> to vector<8x8x8xf32>
    %cst_24 = arith.constant dense<0xFF800000> : vector<8x8xf32>
    %58 = vector.multi_reduction <maximumf>, %57, %cst_24 [2] : vector<8x8x8xf32> to vector<8x8xf32>
    %59 = vector.shape_cast %58 : vector<8x8xf32> to vector<8x8x1xf32>
    %60 = vector.broadcast %59 : vector<8x8x1xf32> to vector<8x8x8xf32>
    %61 = arith.subf %57, %60 : vector<8x8x8xf32>
    %62 = math.exp %61 : vector<8x8x8xf32>
    %cst_25 = arith.constant dense<0.000000e+00> : vector<8x8xf32>
    %63 = vector.multi_reduction <add>, %62, %cst_25 [2] : vector<8x8x8xf32> to vector<8x8xf32>
    %64 = vector.shape_cast %63 : vector<8x8xf32> to vector<8x8x1xf32>
    %65 = tpu.reciprocal %64 {approx = true} : vector<8x8x1xf32> -> vector<8x8x1xf32>
    %66 = vector.broadcast %65 : vector<8x8x1xf32> to vector<8x8x8xf32>
    %67 = arith.mulf %62, %66 : vector<8x8x8xf32>
    %68 = arith.truncf %67 : vector<8x8x8xf32> to vector<8x8x8xbf16>
    %69 = arith.truncf %49 : vector<8x8x32xf32> to vector<8x8x32xbf16>
    "tpu.trace_start"() <{level = 10 : i32, message = "gqk,gkd->gqd"}> : () -> ()
    %cst_26 = arith.constant dense<0.000000e+00> : vector<8x8x32xf32>
    %70 = tpu.matmul %68, %69, %cst_26 {dimension_numbers = #tpu.dot_dimension_numbers<[2], [1], [1], [2], [0, 0, 0, 1, 1, 2], [0], [0]>} : vector<8x8x8xbf16>, vector<8x8x32xbf16>, vector<8x8x32xf32> -> vector<8x8x32xf32>
    "tpu.trace_stop"() : () -> ()
    %71 = vector.shape_cast %70 : vector<8x8x32xf32> to vector<4x16x32xf32>
    %72 = arith.truncf %71 : vector<4x16x32xf32> to vector<4x16x32xbf16>
    "tpu.trace_start"() <{level = 10 : i32, message = "hrd,hdk->hrk"}> : () -> ()
    %cst_27 = arith.constant dense<0.000000e+00> : vector<4x16x128xf32>
    %73 = tpu.matmul %72, %40, %cst_27 {dimension_numbers = #tpu.dot_dimension_numbers<[2], [1], [1], [2], [0, 0, 0, 1, 1, 2], [0], [0]>} : vector<4x16x32xbf16>, vector<4x32x128xbf16>, vector<4x16x128xf32> -> vector<4x16x128xf32>
    "tpu.trace_stop"() : () -> ()
    %cst_28 = arith.constant dense<0.000000e+00> : vector<16x128xf32>
    %74 = vector.multi_reduction <add>, %73, %cst_28 [0] : vector<4x16x128xf32> to vector<16x128xf32>
    %c0_29 = arith.constant 0 : index
    %c0_30 = arith.constant 0 : index
    %c0_31 = arith.constant 0 : index
    %75 = vector.load %arg9[%c0_29, %c0_30, %c0_31] : memref<1x1x128xf32, #tpu.memory_space<vmem>>, vector<1x1x128xf32>
    %76 = vector.shape_cast %75 : vector<1x1x128xf32> to vector<1x128xf32>
    %77 = vector.broadcast %76 : vector<1x128xf32> to vector<16x128xf32>
    %78 = arith.addf %74, %77 : vector<16x128xf32>
    %79 = vector.shape_cast %78 : vector<16x128xf32> to vector<2x8x128xf32>
    %80 = arith.addf %79, %26 : vector<2x8x128xf32>
    %c0_32 = arith.constant 0 : index
    %c0_33 = arith.constant 0 : index
    %c0_34 = arith.constant 0 : index
    %81 = vector.load %arg10[%c0_32, %c0_33, %c0_34] : memref<1x1x128xf32, #tpu.memory_space<vmem>>, vector<1x1x128xf32>
    %82 = vector.shape_cast %81 : vector<1x1x128xf32> to vector<1x128xf32>
    %cst_35 = arith.constant dense<0.000000e+00> : vector<2x8xf32>
    %83 = vector.multi_reduction <add>, %80, %cst_35 [2] : vector<2x8x128xf32> to vector<2x8xf32>
    %84 = vector.shape_cast %83 : vector<2x8xf32> to vector<2x8x1xf32>
    %cst_36 = arith.constant 1.280000e+02 : f32
    %85 = vector.broadcast %cst_36 : f32 to vector<2x8x1xf32>
    %86 = arith.divf %84, %85 : vector<2x8x1xf32>
    %87 = vector.broadcast %86 : vector<2x8x1xf32> to vector<2x8x128xf32>
    %88 = arith.subf %80, %87 : vector<2x8x128xf32>
    %89 = arith.mulf %88, %88 : vector<2x8x128xf32>
    %cst_37 = arith.constant dense<0.000000e+00> : vector<2x8xf32>
    %90 = vector.multi_reduction <add>, %89, %cst_37 [2] : vector<2x8x128xf32> to vector<2x8xf32>
    %91 = vector.shape_cast %90 : vector<2x8xf32> to vector<2x8x1xf32>
    %cst_38 = arith.constant 1.280000e+02 : f32
    %92 = vector.broadcast %cst_38 : f32 to vector<2x8x1xf32>
    %93 = arith.divf %91, %92 : vector<2x8x1xf32>
    %94 = vector.broadcast %86 : vector<2x8x1xf32> to vector<2x8x128xf32>
    %95 = arith.subf %80, %94 : vector<2x8x128xf32>
    %cst_39 = arith.constant 9.99999974E-6 : f32
    %96 = vector.broadcast %cst_39 : f32 to vector<2x8x1xf32>
    %97 = arith.addf %93, %96 : vector<2x8x1xf32>
    %98 = math.rsqrt %97 : vector<2x8x1xf32>
    %99 = vector.broadcast %98 : vector<2x8x1xf32> to vector<2x8x128xf32>
    %100 = arith.mulf %95, %99 : vector<2x8x128xf32>
    %101 = vector.shape_cast %82 : vector<1x128xf32> to vector<1x1x128xf32>
    %102 = vector.broadcast %101 : vector<1x1x128xf32> to vector<2x8x128xf32>
    %103 = arith.mulf %100, %102 : vector<2x8x128xf32>
    %104 = vector.shape_cast %103 : vector<2x8x128xf32> to vector<16x128xf32>
    %c0_40 = arith.constant 0 : index
    %c0_41 = arith.constant 0 : index
    %c0_42 = arith.constant 0 : index
    %105 = vector.load %arg11[%c0_40, %c0_41, %c0_42] : memref<1x128x128xbf16, #tpu.memory_space<vmem>>, vector<1x128x128xbf16>
    %106 = vector.shape_cast %105 : vector<1x128x128xbf16> to vector<128x128xbf16>
    %107 = arith.truncf %104 : vector<16x128xf32> to vector<16x128xbf16>
    %cst_43 = arith.constant dense<0.000000e+00> : vector<16x128xf32>
    %108 = tpu.matmul %107, %106, %cst_43 {dimension_numbers = #tpu.dot_dimension_numbers<[1], [0], [0], [1], [0, 0, 1, 1], [], []>} : vector<16x128xbf16>, vector<128x128xbf16>, vector<16x128xf32> -> vector<16x128xf32>
    %cst_44 = arith.constant 0.176776692 : f32
    %109 = vector.broadcast %cst_44 : f32 to vector<16x128xf32>
    %110 = arith.mulf %108, %109 : vector<16x128xf32>
    %c0_45 = arith.constant 0 : index
    %c0_46 = arith.constant 0 : index
    %c0_47 = arith.constant 0 : index
    %111 = vector.load %arg3[%c0_45, %c0_46, %c0_47] : memref<2x8x128xf32, #tpu.memory_space<vmem>>, vector<2x8x128xf32>
    %112 = vector.shape_cast %111 : vector<2x8x128xf32> to vector<16x128xf32>
    %c0_48 = arith.constant 0 : index
    %c0_49 = arith.constant 0 : index
    %c0_50 = arith.constant 0 : index
    %113 = vector.load %arg12[%c0_48, %c0_49, %c0_50] : memref<1x128x256xbf16, #tpu.memory_space<vmem>>, vector<1x128x256xbf16>
    %114 = vector.shape_cast %113 : vector<1x128x256xbf16> to vector<128x256xbf16>
    %115 = arith.truncf %112 : vector<16x128xf32> to vector<16x128xbf16>
    %cst_51 = arith.constant dense<0.000000e+00> : vector<16x256xf32>
    %116 = tpu.matmul %115, %114, %cst_51 {dimension_numbers = #tpu.dot_dimension_numbers<[1], [0], [0], [1], [0, 0, 1, 1], [], []>} : vector<16x128xbf16>, vector<128x256xbf16>, vector<16x256xf32> -> vector<16x256xf32>
    %117 = vector.extract_strided_slice %116 {offsets = [0, 0], sizes = [16, 128], strides = [1, 1]} : vector<16x256xf32> to vector<16x128xf32>
    %118 = vector.extract_strided_slice %116 {offsets = [0, 128], sizes = [16, 128], strides = [1, 1]} : vector<16x256xf32> to vector<16x128xf32>
    %c0_52 = arith.constant 0 : index
    %c0_53 = arith.constant 0 : index
    %c0_54 = arith.constant 0 : index
    %c0_55 = arith.constant 0 : index
    %119 = vector.load %arg13[%c0_52, %c0_53, %c0_54, %c0_55] : memref<1x4x32x128xbf16, #tpu.memory_space<vmem>>, vector<1x4x32x128xbf16>
    %120 = vector.shape_cast %119 : vector<1x4x32x128xbf16> to vector<4x32x128xbf16>
    %121 = vector.shape_cast %110 : vector<16x128xf32> to vector<16x4x32xf32>
    %122 = tpu.transpose %121, [1, 0, 2] : vector<16x4x32xf32> -> vector<4x16x32xf32>
    %123 = vector.shape_cast %122 : vector<4x16x32xf32> to vector<8x8x32xf32>
    %124 = vector.shape_cast %117 : vector<16x128xf32> to vector<16x4x32xf32>
    %125 = tpu.transpose %124, [1, 0, 2] : vector<16x4x32xf32> -> vector<4x16x32xf32>
    %126 = vector.shape_cast %125 : vector<4x16x32xf32> to vector<8x8x32xf32>
    %127 = vector.shape_cast %118 : vector<16x128xf32> to vector<16x4x32xf32>
    %128 = tpu.transpose %127, [1, 0, 2] : vector<16x4x32xf32> -> vector<4x16x32xf32>
    %129 = vector.shape_cast %128 : vector<4x16x32xf32> to vector<8x8x32xf32>
    %130 = arith.truncf %123 : vector<8x8x32xf32> to vector<8x8x32xbf16>
    %131 = arith.truncf %126 : vector<8x8x32xf32> to vector<8x8x32xbf16>
    "tpu.trace_start"() <{level = 10 : i32, message = "gqd,gkd->gqk"}> : () -> ()
    %cst_56 = arith.constant dense<0.000000e+00> : vector<8x8x8xf32>
    %132 = tpu.matmul %130, %131, %cst_56 {dimension_numbers = #tpu.dot_dimension_numbers<[2], [2], [1], [1], [0, 0, 0, 1, 1, 1], [0], [0]>} : vector<8x8x32xbf16>, vector<8x8x32xbf16>, vector<8x8x8xf32> -> vector<8x8x8xf32>
    "tpu.trace_stop"() : () -> ()
    %cst_57 = arith.constant dense<0xFF800000> : vector<8x8xf32>
    %133 = vector.multi_reduction <maximumf>, %132, %cst_57 [2] : vector<8x8x8xf32> to vector<8x8xf32>
    %134 = vector.shape_cast %133 : vector<8x8xf32> to vector<8x8x1xf32>
    %135 = vector.broadcast %134 : vector<8x8x1xf32> to vector<8x8x8xf32>
    %136 = arith.subf %132, %135 : vector<8x8x8xf32>
    %137 = math.exp %136 : vector<8x8x8xf32>
    %cst_58 = arith.constant dense<0.000000e+00> : vector<8x8xf32>
    %138 = vector.multi_reduction <add>, %137, %cst_58 [2] : vector<8x8x8xf32> to vector<8x8xf32>
    %139 = vector.shape_cast %138 : vector<8x8xf32> to vector<8x8x1xf32>
    %140 = tpu.reciprocal %139 {approx = true} : vector<8x8x1xf32> -> vector<8x8x1xf32>
    %141 = vector.broadcast %140 : vector<8x8x1xf32> to vector<8x8x8xf32>
    %142 = arith.mulf %137, %141 : vector<8x8x8xf32>
    %143 = arith.truncf %142 : vector<8x8x8xf32> to vector<8x8x8xbf16>
    %144 = arith.truncf %129 : vector<8x8x32xf32> to vector<8x8x32xbf16>
    "tpu.trace_start"() <{level = 10 : i32, message = "gqk,gkd->gqd"}> : () -> ()
    %cst_59 = arith.constant dense<0.000000e+00> : vector<8x8x32xf32>
    %145 = tpu.matmul %143, %144, %cst_59 {dimension_numbers = #tpu.dot_dimension_numbers<[2], [1], [1], [2], [0, 0, 0, 1, 1, 2], [0], [0]>} : vector<8x8x8xbf16>, vector<8x8x32xbf16>, vector<8x8x32xf32> -> vector<8x8x32xf32>
    "tpu.trace_stop"() : () -> ()
    %146 = vector.shape_cast %145 : vector<8x8x32xf32> to vector<4x16x32xf32>
    %147 = arith.truncf %146 : vector<4x16x32xf32> to vector<4x16x32xbf16>
    "tpu.trace_start"() <{level = 10 : i32, message = "hrd,hdk->hrk"}> : () -> ()
    %cst_60 = arith.constant dense<0.000000e+00> : vector<4x16x128xf32>
    %148 = tpu.matmul %147, %120, %cst_60 {dimension_numbers = #tpu.dot_dimension_numbers<[2], [1], [1], [2], [0, 0, 0, 1, 1, 2], [0], [0]>} : vector<4x16x32xbf16>, vector<4x32x128xbf16>, vector<4x16x128xf32> -> vector<4x16x128xf32>
    "tpu.trace_stop"() : () -> ()
    %cst_61 = arith.constant dense<0.000000e+00> : vector<16x128xf32>
    %149 = vector.multi_reduction <add>, %148, %cst_61 [0] : vector<4x16x128xf32> to vector<16x128xf32>
    %c0_62 = arith.constant 0 : index
    %c0_63 = arith.constant 0 : index
    %c0_64 = arith.constant 0 : index
    %150 = vector.load %arg14[%c0_62, %c0_63, %c0_64] : memref<1x1x128xf32, #tpu.memory_space<vmem>>, vector<1x1x128xf32>
    %151 = vector.shape_cast %150 : vector<1x1x128xf32> to vector<1x128xf32>
    %152 = vector.broadcast %151 : vector<1x128xf32> to vector<16x128xf32>
    %153 = arith.addf %149, %152 : vector<16x128xf32>
    %154 = vector.shape_cast %153 : vector<16x128xf32> to vector<2x8x128xf32>
    %155 = arith.addf %154, %103 : vector<2x8x128xf32>
    %c0_65 = arith.constant 0 : index
    %c0_66 = arith.constant 0 : index
    %c0_67 = arith.constant 0 : index
    %156 = vector.load %arg15[%c0_65, %c0_66, %c0_67] : memref<1x1x128xf32, #tpu.memory_space<vmem>>, vector<1x1x128xf32>
    %157 = vector.shape_cast %156 : vector<1x1x128xf32> to vector<1x128xf32>
    %cst_68 = arith.constant dense<0.000000e+00> : vector<2x8xf32>
    %158 = vector.multi_reduction <add>, %155, %cst_68 [2] : vector<2x8x128xf32> to vector<2x8xf32>
    %159 = vector.shape_cast %158 : vector<2x8xf32> to vector<2x8x1xf32>
    %cst_69 = arith.constant 1.280000e+02 : f32
    %160 = vector.broadcast %cst_69 : f32 to vector<2x8x1xf32>
    %161 = arith.divf %159, %160 : vector<2x8x1xf32>
    %162 = vector.broadcast %161 : vector<2x8x1xf32> to vector<2x8x128xf32>
    %163 = arith.subf %155, %162 : vector<2x8x128xf32>
    %164 = arith.mulf %163, %163 : vector<2x8x128xf32>
    %cst_70 = arith.constant dense<0.000000e+00> : vector<2x8xf32>
    %165 = vector.multi_reduction <add>, %164, %cst_70 [2] : vector<2x8x128xf32> to vector<2x8xf32>
    %166 = vector.shape_cast %165 : vector<2x8xf32> to vector<2x8x1xf32>
    %cst_71 = arith.constant 1.280000e+02 : f32
    %167 = vector.broadcast %cst_71 : f32 to vector<2x8x1xf32>
    %168 = arith.divf %166, %167 : vector<2x8x1xf32>
    %169 = vector.broadcast %161 : vector<2x8x1xf32> to vector<2x8x128xf32>
    %170 = arith.subf %155, %169 : vector<2x8x128xf32>
    %cst_72 = arith.constant 9.99999974E-6 : f32
    %171 = vector.broadcast %cst_72 : f32 to vector<2x8x1xf32>
    %172 = arith.addf %168, %171 : vector<2x8x1xf32>
    %173 = math.rsqrt %172 : vector<2x8x1xf32>
    %174 = vector.broadcast %173 : vector<2x8x1xf32> to vector<2x8x128xf32>
    %175 = arith.mulf %170, %174 : vector<2x8x128xf32>
    %176 = vector.shape_cast %157 : vector<1x128xf32> to vector<1x1x128xf32>
    %177 = vector.broadcast %176 : vector<1x1x128xf32> to vector<2x8x128xf32>
    %178 = arith.mulf %175, %177 : vector<2x8x128xf32>
    %179 = vector.shape_cast %178 : vector<2x8x128xf32> to vector<16x128xf32>
    %c0_73 = arith.constant 0 : index
    %c0_74 = arith.constant 0 : index
    %c0_75 = arith.constant 0 : index
    %180 = vector.load %arg16[%c0_73, %c0_74, %c0_75] : memref<1x128x512xbf16, #tpu.memory_space<vmem>>, vector<1x128x512xbf16>
    %181 = vector.shape_cast %180 : vector<1x128x512xbf16> to vector<128x512xbf16>
    %182 = arith.truncf %179 : vector<16x128xf32> to vector<16x128xbf16>
    %cst_76 = arith.constant dense<0.000000e+00> : vector<16x512xf32>
    %183 = tpu.matmul %182, %181, %cst_76 {dimension_numbers = #tpu.dot_dimension_numbers<[1], [0], [0], [1], [0, 0, 1, 1], [], []>} : vector<16x128xbf16>, vector<128x512xbf16>, vector<16x512xf32> -> vector<16x512xf32>
    %c0_77 = arith.constant 0 : index
    %c0_78 = arith.constant 0 : index
    %c0_79 = arith.constant 0 : index
    %184 = vector.load %arg17[%c0_77, %c0_78, %c0_79] : memref<1x1x512xf32, #tpu.memory_space<vmem>>, vector<1x1x512xf32>
    %185 = vector.shape_cast %184 : vector<1x1x512xf32> to vector<1x512xf32>
    %186 = vector.broadcast %185 : vector<1x512xf32> to vector<16x512xf32>
    %187 = arith.addf %183, %186 : vector<16x512xf32>
    %cst_80 = arith.constant 0.000000e+00 : f32
    %188 = vector.broadcast %cst_80 : f32 to vector<16x512xf32>
    %189 = arith.maximumf %187, %188 : vector<16x512xf32>
    %c0_81 = arith.constant 0 : index
    %c0_82 = arith.constant 0 : index
    %c0_83 = arith.constant 0 : index
    %190 = vector.load %arg18[%c0_81, %c0_82, %c0_83] : memref<1x512x128xbf16, #tpu.memory_space<vmem>>, vector<1x512x128xbf16>
    %191 = vector.shape_cast %190 : vector<1x512x128xbf16> to vector<512x128xbf16>
    %192 = arith.truncf %189 : vector<16x512xf32> to vector<16x512xbf16>
    %cst_84 = arith.constant dense<0.000000e+00> : vector<16x128xf32>
    %193 = tpu.matmul %192, %191, %cst_84 {dimension_numbers = #tpu.dot_dimension_numbers<[1], [0], [0], [1], [0, 0, 1, 1], [], []>} : vector<16x512xbf16>, vector<512x128xbf16>, vector<16x128xf32> -> vector<16x128xf32>
    %c0_85 = arith.constant 0 : index
    %c0_86 = arith.constant 0 : index
    %c0_87 = arith.constant 0 : index
    %194 = vector.load %arg19[%c0_85, %c0_86, %c0_87] : memref<1x1x128xf32, #tpu.memory_space<vmem>>, vector<1x1x128xf32>
    %195 = vector.shape_cast %194 : vector<1x1x128xf32> to vector<1x128xf32>
    %196 = vector.broadcast %195 : vector<1x128xf32> to vector<16x128xf32>
    %197 = arith.addf %193, %196 : vector<16x128xf32>
    %198 = vector.shape_cast %197 : vector<16x128xf32> to vector<2x8x128xf32>
    %199 = arith.addf %198, %178 : vector<2x8x128xf32>
    %c0_88 = arith.constant 0 : index
    %c0_89 = arith.constant 0 : index
    %c0_90 = arith.constant 0 : index
    %200 = vector.load %arg21[%c0_88, %c0_89, %c0_90] : memref<2x8x128xf32, #tpu.memory_space<vmem>>, vector<2x8x128xf32>
    tpu.vector_store %arg21[%c0_88, %c0_89, %c0_90], %199 {strides = array<i32>} : memref<2x8x128xf32, #tpu.memory_space<vmem>>, vector<2x8x128xf32>,
    %c1_i32 = arith.constant 1 : i32
    %201 = arith.cmpi eq, %arg1, %c1_i32 : i32
    %202 = arith.extui %201 : i1 to i32
    %c0_i32_91 = arith.constant 0 : i32
    %203 = arith.cmpi ne, %202, %c0_i32_91 : i32
    scf.if %203 {
      %c0_92 = arith.constant 0 : index
      %c0_93 = arith.constant 0 : index
      %204 = vector.load %arg4[%c0_92, %c0_93] : memref<1x128xf32, #tpu.memory_space<vmem>>, vector<1x128xf32>
      %cst_94 = arith.constant dense<0.000000e+00> : vector<2x8xf32>
      %205 = vector.multi_reduction <add>, %199, %cst_94 [2] : vector<2x8x128xf32> to vector<2x8xf32>
      %206 = vector.shape_cast %205 : vector<2x8xf32> to vector<2x8x1xf32>
      %cst_95 = arith.constant 1.280000e+02 : f32
      %207 = vector.broadcast %cst_95 : f32 to vector<2x8x1xf32>
      %208 = arith.divf %206, %207 : vector<2x8x1xf32>
      %209 = vector.broadcast %208 : vector<2x8x1xf32> to vector<2x8x128xf32>
      %210 = arith.subf %199, %209 : vector<2x8x128xf32>
      %211 = arith.mulf %210, %210 : vector<2x8x128xf32>
      %cst_96 = arith.constant dense<0.000000e+00> : vector<2x8xf32>
      %212 = vector.multi_reduction <add>, %211, %cst_96 [2] : vector<2x8x128xf32> to vector<2x8xf32>
      %213 = vector.shape_cast %212 : vector<2x8xf32> to vector<2x8x1xf32>
      %cst_97 = arith.constant 1.280000e+02 : f32
      %214 = vector.broadcast %cst_97 : f32 to vector<2x8x1xf32>
      %215 = arith.divf %213, %214 : vector<2x8x1xf32>
      %216 = vector.broadcast %208 : vector<2x8x1xf32> to vector<2x8x128xf32>
      %217 = arith.subf %199, %216 : vector<2x8x128xf32>
      %cst_98 = arith.constant 9.99999974E-6 : f32
      %218 = vector.broadcast %cst_98 : f32 to vector<2x8x1xf32>
      %219 = arith.addf %215, %218 : vector<2x8x1xf32>
      %220 = math.rsqrt %219 : vector<2x8x1xf32>
      %221 = vector.broadcast %220 : vector<2x8x1xf32> to vector<2x8x128xf32>
      %222 = arith.mulf %217, %221 : vector<2x8x128xf32>
      %223 = vector.shape_cast %204 : vector<1x128xf32> to vector<1x1x128xf32>
      %224 = vector.broadcast %223 : vector<1x1x128xf32> to vector<2x8x128xf32>
      %225 = arith.mulf %222, %224 : vector<2x8x128xf32>
      %c0_99 = arith.constant 0 : index
      %c0_100 = arith.constant 0 : index
      %c0_101 = arith.constant 0 : index
      %226 = vector.load %arg20[%c0_99, %c0_100, %c0_101] : memref<2x8x128xf32, #tpu.memory_space<vmem>>, vector<2x8x128xf32>
      tpu.vector_store %arg20[%c0_99, %c0_100, %c0_101], %225 {strides = array<i32>} : memref<2x8x128xf32, #tpu.memory_space<vmem>>, vector<2x8x128xf32>,
    } else {
    }
    return
  }
  func.func @transform_0(%arg0: i32, %arg1: i32) -> (i32, i32, i32) {
    %c0_i32 = arith.constant 0 : i32
    %c0_i32_0 = arith.constant 0 : i32
    %c0_i32_1 = arith.constant 0 : i32
    return %arg0, %c0_i32, %c0_i32_0 : i32, i32, i32
  }
  func.func @transform_1(%arg0: i32, %arg1: i32) -> (i32, i32, i32) {
    %c0_i32 = arith.constant 0 : i32
    %c0_i32_0 = arith.constant 0 : i32
    %c0_i32_1 = arith.constant 0 : i32
    return %arg0, %c0_i32, %c0_i32_0 : i32, i32, i32
  }
  func.func @transform_2(%arg0: i32, %arg1: i32) -> (i32, i32) {
    %c0_i32 = arith.constant 0 : i32
    %c0_i32_0 = arith.constant 0 : i32
    %c0_i32_1 = arith.constant 0 : i32
    return %c0_i32, %c0_i32_0 : i32, i32
  }
  func.func @transform_3(%arg0: i32, %arg1: i32) -> (i32, i32, i32, i32) {
    %c0_i32 = arith.constant 0 : i32
    %c0_i32_0 = arith.constant 0 : i32
    %c0_i32_1 = arith.constant 0 : i32
    %c0_i32_2 = arith.constant 0 : i32
    return %arg1, %c0_i32, %c0_i32_0, %c0_i32_1 : i32, i32, i32, i32
  }
  func.func @transform_4(%arg0: i32, %arg1: i32) -> (i32, i32, i32) {
    %c0_i32 = arith.constant 0 : i32
    %c0_i32_0 = arith.constant 0 : i32
    %c0_i32_1 = arith.constant 0 : i32
    return %arg1, %c0_i32, %c0_i32_0 : i32, i32, i32
  }
  func.func @transform_5(%arg0: i32, %arg1: i32) -> (i32, i32, i32) {
    %c0_i32 = arith.constant 0 : i32
    %c0_i32_0 = arith.constant 0 : i32
    %c0_i32_1 = arith.constant 0 : i32
    return %arg1, %c0_i32, %c0_i32_0 : i32, i32, i32
  }
  func.func @transform_6(%arg0: i32, %arg1: i32) -> (i32, i32, i32, i32) {
    %c0_i32 = arith.constant 0 : i32
    %c0_i32_0 = arith.constant 0 : i32
    %c0_i32_1 = arith.constant 0 : i32
    %c0_i32_2 = arith.constant 0 : i32
    return %arg1, %c0_i32, %c0_i32_0, %c0_i32_1 : i32, i32, i32, i32
  }
  func.func @transform_7(%arg0: i32, %arg1: i32) -> (i32, i32, i32) {
    %c0_i32 = arith.constant 0 : i32
    %c0_i32_0 = arith.constant 0 : i32
    %c0_i32_1 = arith.constant 0 : i32
    return %arg1, %c0_i32, %c0_i32_0 : i32, i32, i32
  }
  func.func @transform_8(%arg0: i32, %arg1: i32) -> (i32, i32, i32) {
    %c0_i32 = arith.constant 0 : i32
    %c0_i32_0 = arith.constant 0 : i32
    %c0_i32_1 = arith.constant 0 : i32
    return %arg1, %c0_i32, %c0_i32_0 : i32, i32, i32
  }
  func.func @transform_9(%arg0: i32, %arg1: i32) -> (i32, i32, i32) {
    %c0_i32 = arith.constant 0 : i32
    %c0_i32_0 = arith.constant 0 : i32
    %c0_i32_1 = arith.constant 0 : i32
    return %arg1, %c0_i32, %c0_i32_0 : i32, i32, i32
  }
  func.func @transform_10(%arg0: i32, %arg1: i32) -> (i32, i32, i32) {
    %c0_i32 = arith.constant 0 : i32
    %c0_i32_0 = arith.constant 0 : i32
    %c0_i32_1 = arith.constant 0 : i32
    return %arg1, %c0_i32, %c0_i32_0 : i32, i32, i32
  }
  func.func @transform_11(%arg0: i32, %arg1: i32) -> (i32, i32, i32, i32) {
    %c0_i32 = arith.constant 0 : i32
    %c0_i32_0 = arith.constant 0 : i32
    %c0_i32_1 = arith.constant 0 : i32
    %c0_i32_2 = arith.constant 0 : i32
    return %arg1, %c0_i32, %c0_i32_0, %c0_i32_1 : i32, i32, i32, i32
  }
  func.func @transform_12(%arg0: i32, %arg1: i32) -> (i32, i32, i32) {
    %c0_i32 = arith.constant 0 : i32
    %c0_i32_0 = arith.constant 0 : i32
    %c0_i32_1 = arith.constant 0 : i32
    return %arg1, %c0_i32, %c0_i32_0 : i32, i32, i32
  }
  func.func @transform_13(%arg0: i32, %arg1: i32) -> (i32, i32, i32) {
    %c0_i32 = arith.constant 0 : i32
    %c0_i32_0 = arith.constant 0 : i32
    %c0_i32_1 = arith.constant 0 : i32
    return %arg1, %c0_i32, %c0_i32_0 : i32, i32, i32
  }
  func.func @transform_14(%arg0: i32, %arg1: i32) -> (i32, i32, i32) {
    %c0_i32 = arith.constant 0 : i32
    %c0_i32_0 = arith.constant 0 : i32
    %c0_i32_1 = arith.constant 0 : i32
    return %arg1, %c0_i32, %c0_i32_0 : i32, i32, i32
  }
  func.func @transform_15(%arg0: i32, %arg1: i32) -> (i32, i32, i32) {
    %c0_i32 = arith.constant 0 : i32
    %c0_i32_0 = arith.constant 0 : i32
    %c0_i32_1 = arith.constant 0 : i32
    return %arg1, %c0_i32, %c0_i32_0 : i32, i32, i32
  }
  func.func @transform_16(%arg0: i32, %arg1: i32) -> (i32, i32, i32) {
    %c0_i32 = arith.constant 0 : i32
    %c0_i32_0 = arith.constant 0 : i32
    %c0_i32_1 = arith.constant 0 : i32
    return %arg1, %c0_i32, %c0_i32_0 : i32, i32, i32
  }
  func.func @transform_17(%arg0: i32, %arg1: i32) -> (i32, i32, i32) {
    %c0_i32 = arith.constant 0 : i32
    %c0_i32_0 = arith.constant 0 : i32
    %c0_i32_1 = arith.constant 0 : i32
    return %arg1, %c0_i32, %c0_i32_0 : i32, i32, i32
  }
  func.func @transform_18(%arg0: i32, %arg1: i32) -> (i32, i32, i32) {
    %c0_i32 = arith.constant 0 : i32
    %c0_i32_0 = arith.constant 0 : i32
    %c0_i32_1 = arith.constant 0 : i32
    return %arg0, %c0_i32, %c0_i32_0 : i32, i32, i32
  }
}

</mosaic_0001>

<bundles_post_ra>
// kernel: t5_decoder_forward.1
= control target key start
LH: loop header
LB: loop body
LE: loop exit
PB: predicated region body
PF: predicated region fallthrough
CT: control target
= control target key end

     0   :  { %s9829_s0 = inlined_call_operand.vmem [shape: f32[4,8,128], index: 0, kind: input, shape index: {}]   ;;  %s9830_s1 = inlined_call_operand.vmem [shape: f32[4,8,128], index: 1, kind: input, shape index: {}]   ;;  %s9831_s2 = inlined_call_operand.hbm [shape: f32[1,128], index: 2, kind: input, shape index: {}]   ;;  %s9832_s3 = inlined_call_operand.vmem [shape: f32[2,4,8,8], index: 3, kind: input, shape index: {}]   ;;  %s9833_s4 = inlined_call_operand.vmem [shape: f32[2,1,128], index: 4, kind: input, shape index: {}]   ;;  %s9834_s5 = inlined_call_operand.hbm [shape: bf16[2,128,384], index: 5, kind: input, shape index: {}]   ;;  %s9835_s6 = inlined_call_operand.hbm [shape: bf16[2,4,32,128], index: 6, kind: input, shape index: {}]   ;;  %s9836_s7 = inlined_call_operand.hbm [shape: f32[2,1,128], index: 7, kind: input, shape index: {}]   ;;  %s9837_s8 = inlined_call_operand.hbm [shape: f32[2,1,128], index: 8, kind: input, shape index: {}]   ;;  %s9838_s9 = inlined_call_operand.hbm [shape: bf16[2,128,128], index: 9, kind: input, shape index: {}]   ;;  %s9839_s10 = inlined_call_operand.hbm [shape: bf16[2,128,256], index: 10, kind: input, shape index: {}]   ;;  %s9840_s11 = inlined_call_operand.hbm [shape: bf16[2,4,32,128], index: 11, kind: input, shape index: {}]   ;;  %s9841_s12 = inlined_call_operand.vmem [shape: f32[2,1,128], index: 12, kind: input, shape index: {}]   ;;  %s9842_s13 = inlined_call_operand.hbm [shape: f32[2,1,128], index: 13, kind: input, shape index: {}]   ;;  %s9843_s14 = inlined_call_operand.vmem [shape: bf16[2,128,512], index: 14, kind: input, shape index: {}]   ;;  %s9844_s15 = inlined_call_operand.vmem [shape: f32[2,1,512], index: 15, kind: input, shape index: {}]   ;;  %s9845_s16 = inlined_call_operand.vmem [shape: bf16[2,512,128], index: 16, kind: input, shape index: {}]   ;;  %s9846_s17 = inlined_call_operand.vmem [shape: f32[2,1,128], index: 17, kind: input, shape index: {}]   ;;  %s9847_s18 = inlined_call_operand.hbm [shape: f32[4,8,128], index: 18, kind: output, shape index: {}]  }
   0x1   :  { %9886 = sst [smem:[#allocation42_spill]] %s9829_s0 }
   0x2   :  { %9887 = sst [smem:[#allocation43_spill]] %s9830_s1 }
   0x3   :  { %9888 = sst [smem:[#allocation44_spill]] %s9831_s2 }
   0x4   :  { %9889 = sst [smem:[#allocation45_spill]] %s9832_s3 }
   0x5   :  { %9890 = sst [smem:[#allocation46_spill]] %s9833_s4 }
   0x6   :  { %9891 = sst [smem:[#allocation47_spill]] %s9834_s5 }
   0x7   :  { %9892 = sst [smem:[#allocation48_spill]] %s9835_s6 }
   0x8   :  { %9893 = sst [smem:[#allocation49_spill]] %s9836_s7 }
   0x9   :  { %9894 = sst [smem:[#allocation50_spill]] %s9837_s8 }
   0xa   :  { %9895 = sst [smem:[#allocation51_spill]] %s9838_s9 }
   0xb   :  { %9896 = sst [smem:[#allocation52_spill]] %s9839_s10 }
   0xc   :  { %9897 = sst [smem:[#allocation53_spill]] %s9840_s11 }
   0xd   :  { %9898 = sst [smem:[#allocation54_spill]] %s9841_s12 }
   0xe   :  { %9899 = sst [smem:[#allocation55_spill]] %s9842_s13 }
   0xf   :  { %9900 = sst [smem:[#allocation56_spill]] %s9843_s14 }
  0x10   :  { %9901 = sst [smem:[#allocation57_spill]] %s9844_s15 }
  0x11   :  { %9902 = sst [smem:[#allocation58_spill]] %s9845_s16 }
  0x12   :  { %9903 = sst [smem:[#allocation59_spill]] %s9846_s17 }
  0x13   :  { %9904 = sst [smem:[#allocation60_spill]] %s9847_s18 }
  0x14   :  { %23 = vsyncpa [#allocation4], 0 }
  0x15   :  { %24 = vsyncpa [#allocation7], 0 }
  0x16   :  { %26 = vsyncpa [#allocation7 + $0x1], 0 }
  0x17   :  { %27 = vsyncpa [#allocation10], 0 }
  0x18   :  { %29 = vsyncpa [#allocation10 + $0x1], 0 }
  0x19   :  { %30 = vsyncpa [#allocation13], 0 }
  0x1a   :  { %32 = vsyncpa [#allocation13 + $0x1], 0 }
  0x1b   :  { %33 = vsyncpa [#allocation16], 0 }
  0x1c   :  { %35 = vsyncpa [#allocation16 + $0x1], 0 }
  0x1d   :  { %36 = vsyncpa [#allocation5], 0 }
  0x1e   :  { %38 = vsyncpa [#allocation5 + $0x1], 0  ;;  %s8319_s27 = smov 0   ;;  %s8321_s28 = smov 0  }
  0x1f   :  { %s8323_s29 = smov 0   ;;  %s8325_s30 = smov 0  }
  0x20   :  { %s8327_s0 = smov 0   ;;  %s8329_s19 = smov 0  }
  0x21   :  { %s8331_s1 = smov 0   ;;  %s8333_s20 = smov 0  }
  0x22   :  { %s8335_s21 = smov 0   ;;  %s8337_s22 = smov 0  }
  0x23   :  { %s8339_s2 = smov 0  }
  0x24 LB: > { %9905 = sst [smem:[#allocation25_spill]] %s8156_s27  ;;  %s53_s23 = sadd.s32 1, %s8188_s21  ;;  %s8196_s2 = sphi %s8339_s2, %s44_s2   ;;  %s8192_s22 = sphi %s8337_s22, %s9994_s22   ;;  %s8188_s21 = sphi %s8335_s21, %s9993_s21   ;;  %s8184_s20 = sphi %s8333_s20, %s9992_s20   ;;  %s8180_s1 = sphi %s8331_s1, %s9991_s1   ;;  %s8176_s19 = sphi %s8329_s19, %s9990_s19   ;;  %s8172_s0 = sphi %s8327_s0, %s9989_s0   ;;  %s8168_s30 = sphi %s8325_s30, %s9988_s30   ;;  %s8164_s29 = sphi %s8323_s29, %s9987_s29   ;;  %s8160_s28 = sphi %s8321_s28, %s9986_s28   ;;  %s8156_s27 = sphi %s8319_s27, %s9985_s27  }
  0x25   : > { %9906 = sst [smem:[#allocation26_spill]] %s8160_s28  ;;  %s188_s24 = sadd.s32 1, %s8176_s19 }
  0x26   : > { %9907 = sst [smem:[#allocation27_spill]] %s8164_s29  ;;  %p8376_p0 = scmp.ge.s32.totalorder %s53_s23, 2 }
  0x27   : > { %9908 = sst [smem:[#allocation28_spill]] %s8172_s0  ;;  %p195_p1 = scmp.ne.s32.totalorder %s8176_s19, %s8172_s0 }
  0x28   : > { %9909 = sst [smem:[#allocation29_spill]] %s8176_s19  ;;  %p196_p2 = scmp.eq.s32.totalorder %s8196_s2, 0 }
  0x29   : > { %9910 = sst [smem:[#allocation30_spill]] %s8180_s1  ;;  %s9996_s23 = smov (%p8376_p0, %s53_s23), 0 }
  0x2a   : > { %9911 = sst [smem:[#allocation31_spill]] %s8184_s20  ;;  %p197_p3 = por %p196_p2, %p195_p1 }
  0x2b   : > { %9912 = sst [smem:[#allocation32_spill]] %s8188_s21  ;;  %p7442_p4 = scmp.lt.s32.totalorder %s8196_s2, 4 }
  0x2c   : > { %9913 = sst [smem:[#allocation33_spill]] %s8192_s22  ;;  %s185_s26 = ssub.s32 %s8188_s21, %s9996_s23 }
  0x2d   : > { %9914 = sst [smem:[#allocation34_spill]] %s8196_s2  ;;  %s8391_s18 = sand.u32 1, %s8196_s2  }
  0x2e   : > { %s9915_s25 = scalar_select %p8376_p0, 1, 0 }
  0x2f   : > { %9916 = sst [smem:[#allocation35_spill]] %s9996_s23  ;;  %p186_p5 = scmp.eq.s32.totalorder %s185_s26, 0 }
  0x30   : > { %s8394_s17 = sand.u32 1, %s8176_s19   ;;  %s7384_s16 = smul.u32 3072, %s8188_s21 }
  0x31   : > { %s8398_s15 = scalar_select %p186_p5, %s8176_s19, %s188_s24  }
  0x32   : > { %s7383_s14 = smul.u32 192, %s8394_s17  ;;  %s9918_s5 = sld [smem:[#allocation47_spill]] }
  0x33   : > { %9917 = sst [smem:[#allocation36_spill]] %s8398_s15  ;;  %p8406_p6 = pnand %p7442_p4, %p197_p3 }
  0x34   : > { %s610_s26 = scalar_lea.vmem [#allocation6], %s7383_s14 }
  0x35   : > { %s9919_s23 = scalar_select %p8406_p6, 1, 0 }
  0x36   : > { %s617_s1 = sshll.u32 %s610_s26, 4  ;;  %p8417_p8 = pneg %p8406_p6  ;;  %s8410_s1 = int_to_ptr.vmem [resolvable:$true] %s617_s1 }
  0x38   : > { %s8404_s4 = scalar_lea.hbm %s9918_s5, %s7384_s16  ;;  %s7795_s19 = scalar_lea.hbm %s9918_s5, 6144 }
  0x39   : > { %s7790_s15 = scalar_lea.hbm %s8404_s4, 3072  ;;  %p7796_p11 = scmp.lt.u32.totalorder %s8404_s4, %s9918_s5 }
  0x3a   : > { %p7791_p7 = scmp.ne.s32.totalorder %s8404_s4, %s7790_s15  ;;  %p7797_p12 = scmp.lt.u32.totalorder %s7795_s19, %s7790_s15 }
  0x3b   : > { %p7799_p1 = scmp.lt.u32.totalorder %s7790_s15, %s8404_s4 }
  0x3c   : > { %p7793_p9 = pnand %p8417_p8, %p7791_p7  ;;  %p7798_p13 = por %p7797_p12, %p7796_p11 }
  0x3e   : > { %p7794_p10 = pneg %p7793_p9  ;;  %p7800_p2 = por %p7799_p1, %p7798_p13 }
  0x40   : > { %p7801_p3 = pnand %p7800_p2, %p7794_p10 }
  0x42   : > { %7804 = shalt.err (!%p7801_p3)
}
  0x43   : > { %s7805_s24 = scalar_lea.vmem %s8410_s1, 3072  ;;  %s8198_s12 = smov [#allocation6]  }
  0x44   : > { %p7806_p4 = scmp.ne.s32.totalorder %s8410_s1, %s7805_s24  ;;  %s7810_s16 = sshll.u32 %s8198_s12, 4  ;;  %s7811_s16 = int_to_ptr.vmem [resolvable:$false] %s7810_s16 }
  0x45   : > { %s7812_s14 = scalar_lea.vmem %s7811_s16, 6144  ;;  %p7813_p9 = scmp.lt.s32.totalorder %s8410_s1, %s7811_s16 }
  0x46   : > { %p7808_p5 = pnand %p7806_p4, %p8417_p8  ;;  %p7814_p0 = scmp.lt.s32.totalorder %s7812_s14, %s7805_s24 }
  0x48   : > { %p7809_p7 = pneg %p7808_p5  ;;  %p7815_p11 = por %p7814_p0, %p7813_p9 }
  0x4a   : > { %p7816_p12 = pnand %p7815_p11, %p7809_p7 }
  0x4c   : > { %7819 = shalt.err (!%p7816_p12)
}
  0x4d   : > { %s8199_s15 = smov 192   ;;  %s8200_s19 = smov 12  }
  0x4e   : > { %s9921_s26 = scalar_lea.sflag [#allocation7], %s8391_s18  ;;  %s8443_s12 = sshll.u32 %s8188_s21, 4 }
  0x4f   : > { %7415 = dma.hbm_to_vmem [thread:$0]  (!%p8406_p6), %s8404_s4, 3072, %s8410_s1, %s9921_s26, %s8199_s15, %s8199_s15, %s8200_s19  }
  0x50   : > { %s9922_s7 = sld [smem:[#allocation49_spill]]  ;;  %s651_s5 = scalar_lea.vmem [#allocation9], %s8394_s17 }
  0x51   : > { %s658_s20 = sshll.u32 %s651_s5, 4  ;;  %s8455_s13 = sshll.u32 %s8394_s17, 6  ;;  %s8452_s20 = int_to_ptr.vmem [resolvable:$true] %s658_s20 }
  0x52   : > { %s9856_s10 = scalar_lea.sflag [#allocation10], %s8391_s18 }
  0x56   : > { %s8449_s14 = scalar_lea.hbm %s9922_s7, %s8443_s12  ;;  %s7825_s19 = scalar_lea.hbm %s9922_s7, 32 }
  0x57   : > { %s7820_s4 = scalar_lea.hbm %s8449_s14, 16  ;;  %p7826_p1 = scmp.lt.u32.totalorder %s8449_s14, %s9922_s7 }
  0x58   : > { %p7821_p0 = scmp.ne.s32.totalorder %s8449_s14, %s7820_s4  ;;  %p7827_p2 = scmp.lt.u32.totalorder %s7825_s19, %s7820_s4 }
  0x59   : > { %p7829_p4 = scmp.lt.u32.totalorder %s7820_s4, %s8449_s14 }
  0x5a   : > { %p7823_p10 = pnand %p7821_p0, %p8417_p8  ;;  %p7828_p3 = por %p7827_p2, %p7826_p1 }
  0x5c   : > { %p7824_p13 = pneg %p7823_p10  ;;  %p7830_p5 = por %p7829_p4, %p7828_p3 }
  0x5e   : > { %p7831_p7 = pnand %p7830_p5, %p7824_p13 }
  0x60   : > { %7834 = shalt.err (!%p7831_p7)
}
  0x61   : > { %s7835_s5 = scalar_lea.vmem %s8452_s20, 16  ;;  %s8201_s16 = smov [#allocation9]  }
  0x62   : > { %p7836_p9 = scmp.ne.s32.totalorder %s8452_s20, %s7835_s5  ;;  %s7840_s1 = sshll.u32 %s8201_s16, 4  ;;  %s7841_s1 = int_to_ptr.vmem [resolvable:$false] %s7840_s1 }
  0x63   : > { %s7842_s15 = scalar_lea.vmem %s7841_s1, 32  ;;  %p7843_p0 = scmp.lt.s32.totalorder %s8452_s20, %s7841_s1 }
  0x64   : > { %p7838_p11 = pnand %p7836_p9, %p8417_p8  ;;  %p7844_p10 = scmp.lt.s32.totalorder %s7842_s15, %s7835_s5 }
  0x66   : > { %p7839_p12 = pneg %p7838_p11  ;;  %p7845_p1 = por %p7844_p10, %p7843_p0 }
  0x68   : > { %p7846_p2 = pnand %p7845_p1, %p7839_p12 }
  0x6a   : > { %7849 = shalt.err (!%p7846_p2)
}
  0x6b   : > { %7421 = dma.hbm_to_vmem [thread:$0]  (!%p8406_p6), %s8449_s14, 16, %s8452_s20, %s9856_s10  }
  0x6c   : > { %s8482_s4 = sshll.u32 %s8188_s21, 10  ;;  %s9923_s9 = sld [smem:[#allocation51_spill]] }
  0x6d   : > { %s686_s5 = scalar_lea.vmem [#allocation12], %s8455_s13  ;;  %s9857_s1 = scalar_lea.sflag [#allocation13], %s8391_s18 }
  0x6e   : > { %s693_s16 = sshll.u32 %s686_s5, 4  ;;  %s8491_s16 = int_to_ptr.vmem [resolvable:$true] %s693_s16 }
  0x72   : > { %s8488_s24 = scalar_lea.hbm %s9923_s9, %s8482_s4  ;;  %s7855_s19 = scalar_lea.hbm %s9923_s9, 2048 }
  0x73   : > { %s7850_s15 = scalar_lea.hbm %s8488_s24, 1024  ;;  %p7856_p5 = scmp.lt.u32.totalorder %s8488_s24, %s9923_s9 }
  0x74   : > { %p7851_p13 = scmp.ne.s32.totalorder %s8488_s24, %s7850_s15  ;;  %p7857_p7 = scmp.lt.u32.totalorder %s7855_s19, %s7850_s15 }
  0x75   : > { %p7859_p11 = scmp.lt.u32.totalorder %s7850_s15, %s8488_s24 }
  0x76   : > { %p7853_p3 = pnand %p7851_p13, %p8417_p8  ;;  %p7858_p9 = por %p7857_p7, %p7856_p5 }
  0x78   : > { %p7854_p4 = pneg %p7853_p3  ;;  %p7860_p12 = por %p7859_p11, %p7858_p9 }
  0x7a   : > { %p7861_p0 = pnand %p7860_p12, %p7854_p4 }
  0x7c   : > { %7864 = shalt.err (!%p7861_p0)
}
  0x7d   : > { %s7865_s5 = scalar_lea.vmem %s8491_s16, 1024  ;;  %s8202_s20 = smov [#allocation12]  }
  0x7e   : > { %p7866_p10 = scmp.ne.s32.totalorder %s8491_s16, %s7865_s5  ;;  %s7870_s14 = sshll.u32 %s8202_s20, 4  ;;  %s7871_s14 = int_to_ptr.vmem [resolvable:$false] %s7870_s14 }
  0x7f   : > { %s7872_s10 = scalar_lea.vmem %s7871_s14, 2048  ;;  %p7873_p13 = scmp.lt.s32.totalorder %s8491_s16, %s7871_s14 }
  0x80   : > { %p7868_p1 = pnand %p7866_p10, %p8417_p8  ;;  %p7874_p3 = scmp.lt.s32.totalorder %s7872_s10, %s7865_s5 }
  0x82   : > { %p7869_p2 = pneg %p7868_p1  ;;  %p7875_p5 = por %p7874_p3, %p7873_p13 }
  0x84   : > { %p7876_p7 = pnand %p7875_p5, %p7869_p2 }
  0x86   : > { %7879 = shalt.err (!%p7876_p7)
}
  0x87   : > { %s9859_s15 = smov 64   ;;  %s9860_s19 = smov 4  }
  0x88   : > { %7427 = dma.hbm_to_vmem [thread:$0]  (!%p8406_p6), %s8488_s24, 1024, %s8491_s16, %s9857_s1, %s9859_s15, %s9859_s15, %s9860_s19  }
  0x89   : > { %s9924_s11 = sld [smem:[#allocation53_spill]]  ;;  %s728_s14 = scalar_lea.vmem [#allocation15], %s8455_s13 }
  0x8a   : > { %s735_s10 = sshll.u32 %s728_s14, 4  ;;  %s9858_s7 = scalar_lea.sflag [#allocation16], %s8391_s18  ;;  %s8527_s10 = int_to_ptr.vmem [resolvable:$true] %s735_s10 }
  0x8f   : > { %s8524_s20 = scalar_lea.hbm %s9924_s11, %s8482_s4  ;;  %s7885_s26 = scalar_lea.hbm %s9924_s11, 2048 }
  0x90   : > { %s7880_s9 = scalar_lea.hbm %s8524_s20, 1024  ;;  %p7886_p12 = scmp.lt.u32.totalorder %s8524_s20, %s9924_s11 }
  0x91   : > { %p7881_p4 = scmp.ne.s32.totalorder %s8524_s20, %s7880_s9  ;;  %p7887_p0 = scmp.lt.u32.totalorder %s7885_s26, %s7880_s9 }
  0x92   : > { %p7889_p1 = scmp.lt.u32.totalorder %s7880_s9, %s8524_s20 }
  0x93   : > { %p7883_p9 = pnand %p7881_p4, %p8417_p8  ;;  %p7888_p10 = por %p7887_p0, %p7886_p12 }
  0x95   : > { %p7884_p11 = pneg %p7883_p9  ;;  %p7890_p2 = por %p7889_p1, %p7888_p10 }
  0x97   : > { %p7891_p13 = pnand %p7890_p2, %p7884_p11 }
  0x99   : > { %7894 = shalt.err (!%p7891_p13)
}
  0x9a   : > { %s7895_s14 = scalar_lea.vmem %s8527_s10, 1024  ;;  %s8205_s24 = smov [#allocation15]  }
  0x9b   : > { %p7896_p3 = scmp.ne.s32.totalorder %s8527_s10, %s7895_s14  ;;  %s7900_s16 = sshll.u32 %s8205_s24, 4  ;;  %s7901_s16 = int_to_ptr.vmem [resolvable:$false] %s7900_s16 }
  0x9c   : > { %s7902_s1 = scalar_lea.vmem %s7901_s16, 2048  ;;  %p7903_p4 = scmp.lt.s32.totalorder %s8527_s10, %s7901_s16 }
  0x9d   : > { %p7898_p5 = pnand %p7896_p3, %p8417_p8  ;;  %p7904_p9 = scmp.lt.s32.totalorder %s7902_s1, %s7895_s14 }
  0x9f   : > { %p7899_p7 = pneg %p7898_p5  ;;  %p7905_p12 = por %p7904_p9, %p7903_p4 }
  0xa1   : > { %p7906_p0 = pnand %p7905_p12, %p7899_p7 }
  0xa3   : > { %7909 = shalt.err (!%p7906_p0)
}
  0xa4   : > { %7433 = dma.hbm_to_vmem [thread:$0]  (!%p8406_p6), %s8524_s20, 1024, %s8527_s10, %s9858_s7, %s9859_s15, %s9859_s15, %s9860_s19  }
  0xa5   : > { %s8557_s9 = sadd.s32 4294967295, %s8196_s2   ;;  %s6685_s26 = sadd.s32 4294967294, %s8196_s2  }
  0xa6   : > { %s56_s5 = sadd.s32 1, %s8192_s22  ;;  %p9925_p11 = scmp.ne.s32.totalorder %s9915_s25, 0 }
  0xa7   : > { %p201_p10 = scmp.ne.s32.totalorder %s8172_s0, %s8168_s30  ;;  %p9863_p1 = scmp.eq.s32.totalorder %s8557_s9, 0 }
  0xa8   : > { %s9998_s5 = smov (!%p9925_p11, %s56_s5), %s8192_s22  ;;  %s526_s14 = sadd.s32 1, %s8164_s29 }
  0xa9   : > { %p58_p2 = scmp.ge.s32.totalorder %s9998_s5, 2  ;;  %p8570_p13 = por %p9863_p1, %p201_p10 }
  0xaa   : > { %p536_p3 = scmp.ne.s32.totalorder %s8164_s29, %s8160_s28  ;;  %p537_p5 = scmp.eq.s32.totalorder %s8557_s9, 3 }
  0xab   : > { %s9926_s24 = scalar_select %p8570_p13, 1, 0 }
  0xac   : > { %s10000_s5 = smov (%p58_p2, %s9998_s5), 0  ;;  %p542_p7 = scmp.ne.s32.totalorder %s8160_s28, %s8156_s27 }
  0xad   : > { %9927 = sst [smem:[#allocation37_spill]] %s10000_s5  ;;  %s523_s25 = ssub.s32 %s8192_s22, %s10000_s5 }
  0xae   : > { %p543_p4 = scmp.eq.s32.totalorder %s6685_s26, 3  ;;  %p524_p9 = scmp.eq.s32.totalorder %s523_s25, 0 }
  0xaf   : > { %p8583_p12 = por %p537_p5, %p536_p3  ;;  %p6686_p11 = scmp.ge.s32.totalorder %s8196_s2, 1 }
  0xb0   : > { %p8587_p0 = por %p543_p4, %p542_p7  ;;  %p550_p10 = scmp.lt.s32.totalorder %s8196_s2, 5 }
  0xb1   : > { %s9928_s30 = scalar_select %p8583_p12, 1, 0 }
  0xb2   : > { %s9930_s20 = scalar_select %p8587_p0, 1, 0 }
  0xb3   : > { %9929 = sst [smem:[#allocation38_spill]] %s9928_s30  ;;  %p8596_p2 = pnand %p6686_p11, %p550_p10 }
  0xb4   : > { %9931 = sst [smem:[#allocation39_spill]] %s9930_s20  ;;  %s8206_s1 = smov [#allocation3]  }
  0xb5   : > { %s8593_s10 = scalar_select %p524_p9, %s8164_s29, %s526_s14  }
  0xb6   : > { %s9933_s16 = scalar_select %p8596_p2, 1, 0 }
  0xb7   : > { %9932 = sst [smem:[#allocation40_spill]] %s8593_s10  ;;  %s563_s26 = sshll.u32 %s8206_s1, 4  ;;  %s8600_s26 = int_to_ptr.vmem [resolvable:$true] %s563_s26 }
  0xb8   : > { %s9934_s6 = sld [smem:[#allocation48_spill]]  ;;  %p7408_p3 = pneg %p8596_p2 }
  0xb9   : > { %s631_s14 = scalar_lea.vmem [#allocation8], %s8455_s13  ;;  %s9936_s8 = sld [smem:[#allocation50_spill]] }
  0xba   : > { %s638_s19 = sshll.u32 %s631_s14, 4  ;;  %p8615_p5 = pnand %p7408_p3, %p9863_p1  ;;  %s8611_s19 = int_to_ptr.vmem [resolvable:$true] %s638_s19 }
  0xbc   : > { %s9935_s1 = scalar_select %p8615_p5, 1, 0 }
  0xbe   : > { %s8606_s15 = scalar_lea.hbm %s9934_s6, %s8482_s4  ;;  %s7915_s14 = scalar_lea.hbm %s9934_s6, 2048 }
  0xbf   : > { %s8623_s7 = scalar_lea.hbm %s9936_s8, %s8443_s12  ;;  %s7910_s4 = scalar_lea.hbm %s8606_s15, 1024 }
  0xc0   : > { %p7911_p7 = scmp.ne.s32.totalorder %s8606_s15, %s7910_s4  ;;  %p7916_p11 = scmp.lt.u32.totalorder %s8606_s15, %s9934_s6 }
  0xc1   : > { %p7917_p10 = scmp.lt.u32.totalorder %s7915_s14, %s7910_s4  ;;  %p7919_p1 = scmp.lt.u32.totalorder %s7910_s4, %s8606_s15 }
  0xc2   : > { %p7913_p4 = pnand %p7911_p7, %p8417_p8 }
  0xc3   : > { %p7918_p3 = por %p7917_p10, %p7916_p11 }
  0xc4   : > { %p7914_p9 = pneg %p7913_p4 }
  0xc5   : > { %p7920_p0 = por %p7919_p1, %p7918_p3 }
  0xc7   : > { %p7921_p12 = pnand %p7920_p0, %p7914_p9 }
  0xc9   : > { %7924 = shalt.err (!%p7921_p12)
}
  0xca   : > { %s7925_s11 = scalar_lea.vmem %s8611_s19, 1024  ;;  %s8207_s5 = smov [#allocation8]  }
  0xcb   : > { %p7926_p7 = scmp.ne.s32.totalorder %s8611_s19, %s7925_s11  ;;  %s7930_s25 = sshll.u32 %s8207_s5, 4  ;;  %s7931_s25 = int_to_ptr.vmem [resolvable:$false] %s7930_s25 }
  0xcc   : > { %s7932_s22 = scalar_lea.vmem %s7931_s25, 2048  ;;  %p7933_p2 = scmp.lt.s32.totalorder %s8611_s19, %s7931_s25 }
  0xcd   : > { %p7928_p4 = pnand %p7926_p7, %p8417_p8  ;;  %p7934_p5 = scmp.lt.s32.totalorder %s7932_s22, %s7925_s11 }
  0xcf   : > { %p7929_p13 = pneg %p7928_p4  ;;  %p7935_p11 = por %p7934_p5, %p7933_p2 }
  0xd1   : > { %p7936_p10 = pnand %p7935_p11, %p7929_p13 }
  0xd3   : > { %7939 = shalt.err (!%p7936_p10)
}
  0xd4   : > { %s9937_s10 = smov 4   ;;  %s9938_s4 = smov 64  }
  0xd5   : > { %s9939_s13 = scalar_lea.sflag [#allocation7], %s8391_s18  ;;  %s668_s14 = scalar_lea.vmem [#allocation11], %s8394_s17 }
  0xd6   : > { %7418 = dma.hbm_to_vmem [thread:$0]  (!%p8406_p6), %s8606_s15, 1024, %s8611_s19, %s9939_s13, %s9938_s4, %s9938_s4, %s9937_s10  }
  0xd7   : > { %s675_s5 = sshll.u32 %s668_s14, 4  ;;  %s9940_s11 = sld [smem:[#allocation44_spill]]  ;;  %s676_s5 = int_to_ptr.vmem [resolvable:$true] %s675_s5 }
  0xd8   : > { %p9941_p13 = scmp.ne.s32.totalorder %s9935_s1, 0 }
  0xda   : > { %p7942_p12 = pneg %p9941_p13 }
  0xdd   : > { %s7940_s22 = scalar_lea.hbm %s9940_s11, 16 }
  0xde   : > { %p7941_p1 = scmp.ne.s32.totalorder %s9940_s11, %s7940_s22  ;;  %p7947_p5 = scmp.lt.u32.totalorder %s7940_s22, %s9940_s11 }
  0xe0   : > { %p7943_p0 = pnand %p7942_p12, %p7941_p1 }
  0xe2   : > { %p7944_p2 = pneg %p7943_p0 }
  0xe4   : > { %p7949_p9 = pnand %p7947_p5, %p7944_p2 }
  0xe6   : > { %7952 = shalt.err (!%p7949_p9)
}
  0xe7   : > { %s7953_s6 = scalar_lea.vmem %s8600_s26, 16  ;;  %s7960_s29 = scalar_lea.vmem %s8600_s26, 32 }
  0xe8   : > { %p7954_p3 = scmp.ne.s32.totalorder %s8600_s26, %s7953_s6  ;;  %p7961_p11 = scmp.lt.s32.totalorder %s8600_s26, %s8600_s26 }
  0xe9   : > { %p7962_p10 = scmp.lt.s32.totalorder %s7960_s29, %s7953_s6 }
  0xea   : > { %p7956_p7 = pnand %p7954_p3, %p7942_p12 }
  0xeb   : > { %p7963_p1 = por %p7962_p10, %p7961_p11 }
  0xec   : > { %p7957_p4 = pneg %p7956_p7 }
  0xee   : > { %p7964_p0 = pnand %p7963_p1, %p7957_p4 }
  0xf0   : > { %7967 = shalt.err (!%p7964_p0)
}
  0xf1   : > { %7411 = dma.hbm_to_vmem [thread:$0]  (!%p9941_p13), %s9940_s11, 16, %s8600_s26, [#allocation4]  }
  0xf2   : > { %s6698_s15 = sshll.u32 %s8394_s17, 7  ;;  %s7968_s19 = scalar_lea.hbm %s8623_s7, 16 }
  0xf3   : > { %p7969_p12 = scmp.ne.s32.totalorder %s8623_s7, %s7968_s19  ;;  %s7973_s10 = scalar_lea.hbm %s9936_s8, 32 }
  0xf4   : > { %p7974_p9 = scmp.lt.u32.totalorder %s8623_s7, %s9936_s8  ;;  %p7975_p3 = scmp.lt.u32.totalorder %s7973_s10, %s7968_s19 }
  0xf5   : > { %p7971_p2 = pnand %p7969_p12, %p8417_p8  ;;  %p7977_p4 = scmp.lt.u32.totalorder %s7968_s19, %s8623_s7 }
  0xf6   : > { %p7976_p7 = por %p7975_p3, %p7974_p9 }
  0xf7   : > { %p7972_p5 = pneg %p7971_p2 }
  0xf8   : > { %p7978_p11 = por %p7977_p4, %p7976_p7 }
  0xfa   : > { %p7979_p13 = pnand %p7978_p11, %p7972_p5 }
  0xfc   : > { %7982 = shalt.err (!%p7979_p13)
}
  0xfd   : > { %s7983_s26 = scalar_lea.vmem %s676_s5, 16  ;;  %s8208_s14 = smov [#allocation11]  }
  0xfe   : > { %p7984_p10 = scmp.ne.s32.totalorder %s676_s5, %s7983_s26  ;;  %s7988_s25 = sshll.u32 %s8208_s14, 4  ;;  %s7989_s25 = int_to_ptr.vmem [resolvable:$false] %s7988_s25 }
  0xff   : > { %s7990_s22 = scalar_lea.vmem %s7989_s25, 32  ;;  %p7991_p12 = scmp.lt.s32.totalorder %s676_s5, %s7989_s25 }
 0x100   : > { %p7986_p1 = pnand %p7984_p10, %p8417_p8  ;;  %p7992_p2 = scmp.lt.s32.totalorder %s7990_s22, %s7983_s26 }
 0x102   : > { %p7987_p0 = pneg %p7986_p1  ;;  %p7993_p6 = por %p7992_p2, %p7991_p12 }
 0x104   : > { %p7994_p3 = pnand %p7993_p6, %p7987_p0 }
 0x106   : > { %7997 = shalt.err (!%p7994_p3)
}
 0x107   : > { %p9942_p9 = scmp.ne.s32.totalorder %s9919_s23, 0  ;;  %s9943_s6 = scalar_lea.sflag [#allocation10], %s8391_s18 }
 0x108   : > { %s6931_s29 = sshll.u32 %s8188_s21, 11  ;;  %s9944_s19 = sld [smem:[#allocation52_spill]] }
 0x109   : > { %7424 = dma.hbm_to_vmem [thread:$0]  (!%p9942_p9), %s8623_s7, 16, %s676_s5, %s9943_s6  }
 0x10a   : > { %s707_s1 = scalar_lea.vmem [#allocation14], %s6698_s15 }
 0x10b   : > { %s714_s4 = sshll.u32 %s707_s1, 4  ;;  %s8702_s4 = int_to_ptr.vmem [resolvable:$true] %s714_s4 }
 0x10e   : > { %s9945_s10 = smov %s9944_s19  ;;  %s8698_s20 = scalar_lea.hbm %s9944_s19, %s6931_s29 }
 0x10f   : > { %s7998_s13 = scalar_lea.hbm %s8698_s20, 2048  ;;  %s8003_s26 = scalar_lea.hbm %s9945_s10, 4096 }
 0x110   : > { %p7999_p6 = scmp.ne.s32.totalorder %s8698_s20, %s7998_s13  ;;  %p8004_p4 = scmp.lt.u32.totalorder %s8698_s20, %s9945_s10 }
 0x111   : > { %p8005_p11 = scmp.lt.u32.totalorder %s8003_s26, %s7998_s13  ;;  %p8007_p10 = scmp.lt.u32.totalorder %s7998_s13, %s8698_s20 }
 0x112   : > { %p8001_p5 = pnand %p7999_p6, %p8417_p8 }
 0x113   : > { %p8006_p13 = por %p8005_p11, %p8004_p4 }
 0x114   : > { %p8002_p7 = pneg %p8001_p5 }
 0x115   : > { %p8008_p1 = por %p8007_p10, %p8006_p13 }
 0x117   : > { %p8009_p0 = pnand %p8008_p1, %p8002_p7 }
 0x119   : > { %8012 = shalt.err (!%p8009_p0)
}
 0x11a   : > { %s8013_s15 = scalar_lea.vmem %s8702_s4, 2048  ;;  %s8209_s22 = smov [#allocation14]  }
 0x11b   : > { %p8014_p12 = scmp.ne.s32.totalorder %s8702_s4, %s8013_s15  ;;  %s8018_s6 = sshll.u32 %s8209_s22, 4  ;;  %s8019_s6 = int_to_ptr.vmem [resolvable:$false] %s8018_s6 }
 0x11c   : > { %s8020_s29 = scalar_lea.vmem %s8019_s6, 4096  ;;  %p8021_p6 = scmp.lt.s32.totalorder %s8702_s4, %s8019_s6 }
 0x11d   : > { %p8016_p2 = pnand %p8014_p12, %p8417_p8  ;;  %p8022_p5 = scmp.lt.s32.totalorder %s8020_s29, %s8013_s15 }
 0x11f   : > { %p8017_p3 = pneg %p8016_p2  ;;  %p8023_p4 = por %p8022_p5, %p8021_p6 }
 0x121   : > { %p8024_p11 = pnand %p8023_p4, %p8017_p3 }
 0x123   : > { %8027 = shalt.err (!%p8024_p11)
}
 0x124   : > { %s8210_s27 = smov 128   ;;  %s8211_s2 = smov 8  }
 0x125   : > { %s9946_s19 = scalar_lea.sflag [#allocation13], %s8391_s18  ;;  %s9947_s7 = sld [smem:[#allocation55_spill]] }
 0x126   : > { %7430 = dma.hbm_to_vmem [thread:$0]  (!%p9942_p9), %s8698_s20, 2048, %s8702_s4, %s9946_s19, %s8210_s27, %s8210_s27, %s8211_s2  }
 0x127   : > { %s754_s26 = scalar_lea.vmem [#allocation17], %s8394_s17 }
 0x128   : > { %s761_s14 = sshll.u32 %s754_s26, 4  ;;  %s762_s14 = int_to_ptr.vmem [resolvable:$true] %s761_s14 }
 0x12b   : > { %s8731_s5 = scalar_lea.hbm %s9947_s7, %s8443_s12  ;;  %s8033_s20 = scalar_lea.hbm %s9947_s7, 32 }
 0x12c   : > { %s8028_s25 = scalar_lea.hbm %s8731_s5, 16  ;;  %p8034_p1 = scmp.lt.u32.totalorder %s8731_s5, %s9947_s7 }
 0x12d   : > { %p8029_p7 = scmp.ne.s32.totalorder %s8731_s5, %s8028_s25  ;;  %p8035_p0 = scmp.lt.u32.totalorder %s8033_s20, %s8028_s25 }
 0x12e   : > { %p8037_p2 = scmp.lt.u32.totalorder %s8028_s25, %s8731_s5 }
 0x12f   : > { %p8031_p13 = pnand %p8029_p7, %p8417_p8  ;;  %p8036_p12 = por %p8035_p0, %p8034_p1 }
 0x131   : > { %p8032_p10 = pneg %p8031_p13  ;;  %p8038_p3 = por %p8037_p2, %p8036_p12 }
 0x133   : > { %p8039_p6 = pnand %p8038_p3, %p8032_p10 }
 0x135   : > { %8042 = shalt.err (!%p8039_p6)
}
 0x136   : > { %s8043_s17 = scalar_lea.vmem %s762_s14, 16  ;;  %s8212_s12 = smov [#allocation17]  }
 0x137   : > { %p8044_p5 = scmp.ne.s32.totalorder %s762_s14, %s8043_s17  ;;  %s8048_s29 = sshll.u32 %s8212_s12, 4  ;;  %s8049_s29 = int_to_ptr.vmem [resolvable:$false] %s8048_s29 }
 0x138   : > { %s8050_s27 = scalar_lea.vmem %s8049_s29, 32  ;;  %p8051_p7 = scmp.lt.s32.totalorder %s762_s14, %s8049_s29 }
 0x139   : > { %p8046_p4 = pnand %p8044_p5, %p8417_p8  ;;  %p8052_p13 = scmp.lt.s32.totalorder %s8050_s27, %s8043_s17 }
 0x13b   : > { %p8047_p11 = pneg %p8046_p4  ;;  %p8053_p9 = por %p8052_p13, %p8051_p7 }
 0x13d   : > { %p8054_p0 = pnand %p8053_p9, %p8047_p11 }
 0x13f   : > { %8057 = shalt.err (!%p8054_p0)
}
 0x140   : > { %p9948_p1 = scmp.ne.s32.totalorder %s9919_s23, 0  ;;  %s9949_s2 = scalar_lea.sflag [#allocation16], %s8391_s18 }
 0x141   : > { %p9950_p10 = scmp.ne.s32.totalorder %s9933_s16, 0 }
 0x142   : > { %7436 = dma.hbm_to_vmem [thread:$0]  (!%p9948_p1), %s8731_s5, 16, %s762_s14, %s9949_s2  }
 0x143   : > { %799 = sbr.rel (%p9950_p10) target bundleno = 4900 (0x1324), region = 92 }
 0x14a   : > { %p9951_p8 = scmp.eq.s32.totalorder %s8557_s9, 0 }
 0x14c   : > { %8131 = dma.done.wait (%p9951_p8), [#allocation4], 16   ;;  %p9952_p12 = pmov %p9951_p8 }
 0x14d   : > { %s805_s3 = sand.u32 1, %s8557_s9   ;;  %s8761_s19 = sand.u32 1, %s8172_s0  }
 0x14e   : > { %8133 = vsyncadd (%p9952_p12), [#allocation4], 4294967280  ;;  %s7385_s23 = smul.u32 192, %s8761_s19  ;;  %s806_s18 = scalar_lea.sflag [#allocation7], %s805_s3 }
 0x14f   : > { %p9953_p9 = scmp.ne.s32.totalorder %s9926_s24, 0 }
 0x150   : > { %s8764_s1 = scalar_lea.vmem [#allocation6], %s7385_s23 }
 0x151   : > { %8135 = dma.done.wait (%p9953_p9), %s806_s18, 4096  }
 0x152   : > { %8137 = vsyncadd (%p9953_p9), %s806_s18, 4294963200  ;;  %s6707_s16 = sshll.u32 %s8761_s19, 6  ;;  %s824_s5 = scalar_lea.sflag [#allocation10], %s805_s3 }
 0x153   : > { %s8771_s13 = scalar_lea.vmem [#allocation8], %s6707_s16 }
 0x154   : > { %8139 = dma.done.wait (%p9953_p9), %s824_s5, 32  }
 0x155   : > { %8141 = vsyncadd (%p9953_p9), %s824_s5, 4294967264  ;;  %s840_s14 = scalar_lea.sflag [#allocation13], %s805_s3  ;;  %s8779_s25 = scalar_lea.vmem [#allocation12], %s6707_s16 }
 0x156   : > { %8143 = dma.done.wait (%p9953_p9), %s840_s14, 3072  }
 0x157   : > { %8145 = vsyncadd (%p9953_p9), %s840_s14, 4294964224  ;;  %s6709_s15 = sshll.u32 %s8761_s19, 7  ;;  %s858_s20 = scalar_lea.sflag [#allocation16], %s805_s3 }
 0x158   : > { %s8786_s22 = scalar_lea.vmem [#allocation14], %s6709_s15  ;;  %s8788_s4 = scalar_lea.vmem [#allocation15], %s6707_s16 }
 0x159   : > { %9954 = sst [smem:[#allocation41_spill]] %s8788_s4 }
 0x15a   : > { %8147 = dma.done.wait (%p9953_p9), %s858_s20, 1040  }
 0x15b   : > { %8149 = vsyncadd (%p9953_p9), %s858_s20, 4294966256  ;;  %s9955_s6 = sld [smem:[#allocation31_spill]]  ;;  %s9956_s17 = sld [smem:[#allocation30_spill]] }
 0x15c   : > { %s9876_s12 = sand.u32 1, %s8160_s28   ;;  %s9957_s18 = sld [smem:[#allocation42_spill]] }
 0x15d   : > { %s6711_s29 = sshll.u32 %s9876_s12, 4  ;;  %s9958_s15 = sld [smem:[#allocation43_spill]] }
 0x15e   : > { %s9960_s11 = sld [smem:[#allocation45_spill]]  ;;  %s9963_s26 = sld [smem:[#allocation57_spill]] }
 0x15f   : > { %s9965_s30 = sld [smem:[#allocation59_spill]]  ;;  %s869_s3 = scalar_lea.vmem [#allocation17], %s8761_s19 }
 0x160   : > { %s8846_s7 = scalar_lea.vmem [#allocation18], %s6711_s29 }
 0x161   : > { %s6712_s27 = sshll.u32 %s9955_s6, 1  ;;  %p1004_p3 = scmp.lt.s32.totalorder %s9956_s17, 1 }
 0x162   : > { %p993_p2 = scmp.lt.s32.totalorder %s6712_s27, 3  ;;  %p6723_p6 = scmp.ne.s32.totalorder %s9956_s17, 0 }
 0x163   : > { %s8800_s2 = scalar_select %p1004_p3, %s9956_s17, 1 }
 0x164   : > { %s10002_s27 = smov (!%p993_p2, %s6712_s27), 3 }
 0x165   : > { %s6713_s24 = sshll.u32 %s10002_s27, 3  ;;  %s6933_s6 = sshll.u32 %s8800_s2, 5 }
 0x166   : > { %s996_s16 = scalar_lea.vmem %s9957_s18, %s6713_s24  ;;  %s8808_s20 = scalar_lea.vmem %s9958_s15, %s6713_s24 }
 0x167   : > { %s8818_s21 = scalar_lea.vmem %s9960_s11, %s6933_s6  ;;  %s6934_s23 = sshll.u32 %s8800_s2, 8  ;;  %v1038_v0 = vld [vmem:[%s996_s16] sm:$0xff] (!%p6723_p6)  ;;  %v1039_v1 = vld [vmem:[%s996_s16 + $0x8] sm:$0xff] (!%p6723_p6) }
 0x168   : > { %s6720_s18 = sshll.u32 %s8800_s2, 2  ;;  %s9962_s24 = sld [smem:[#allocation56_spill]]  ;;  %1040 = vst [vmem:[#allocation2] sm:$0xff] (!%p6723_p6), %v1038_v0  ;;  %1041 = vst [vmem:[#allocation2 + $0x8] sm:$0xff] (!%p6723_p6), %v1039_v1 }
 0x169   : > { %s8834_s9 = scalar_lea.vmem %s9963_s26, %s6720_s18  ;;  %s9964_s11 = sld [smem:[#allocation58_spill]] }
 0x16a   : > { %s1031_s27 = scalar_lea.vmem %s9965_s30, %s8800_s2  ;;  %1037 = sbr.rel (%p6723_p6) target bundleno = 369 (0x171), region = 132 }
 0x16e   : > { %s8829_s14 = scalar_lea.vmem %s9962_s24, %s6934_s23 }
 0x16f   : > { %s8839_s10 = scalar_lea.vmem %s9964_s11, %s6934_s23 }
 0x171 PF: > { %v1042_v2 = vld [vmem:[#allocation2] sm:$0xff]  ;;  %v1043_v3 = vld [vmem:[#allocation2 + $0x8] sm:$0xff]  ;;  %v8213_v6 = vmov 0.0   ;;  %v8214_v32 = vmov 0   ;;  %vm8215_vm0 = vmmov 0   ;;  %s9966_s4 = sld [smem:[#allocation46_spill]]  ;;  %v1368_v0 = vlaneseq }
 0x172   : > { %1045 = vadd.xlane.f32.xlu0 %v1042_v2  ;;  %v7550_v4 = vld [vmem:[%s8764_s1 + $0x4] ss:$12 sps:$4 sm:$0xff]   ;;  %v7552_v5 = vld [vmem:[%s8764_s1] ss:$12 sps:$4 sm:$0xff]   ;;  %7087 = vmatprep.subr.bf16.mxu1 %v8213_v6  ;;  %v7553_v7 = vld [vmem:[%s8764_s1 + $0x8] ss:$12 sps:$4 sm:$0xff]  }
 0x173   : > { %v7554_v8 = vld [vmem:[%s8764_s1 + $0x1c] ss:$12 sps:$4 sm:$0xff]   ;;  %v7556_v9 = vld [vmem:[%s8764_s1 + $0x18] ss:$12 sps:$4 sm:$0xff]   ;;  %1237 = vmatprep.subr.bf16.mxu0 %v7550_v4  ;;  %v7557_v10 = vld [vmem:[%s8764_s1 + $0x20] ss:$12 sps:$4 sm:$0xff]   ;;  %7088 = vmatpush3.bf16.msra.mxu1 %v7553_v7 }
 0x174   : > { %1238 = vmatpush1.bf16.msra.mxu0 %v7552_v5  ;;  %7089 = vmatprep.subr.bf16.mxu1 %v8213_v6  ;;  %v7558_v19 = vld [vmem:[%s8764_s1 + $0x34] ss:$12 sps:$4 sm:$0xff]   ;;  %v7560_v20 = vld [vmem:[%s8764_s1 + $0x30] ss:$12 sps:$4 sm:$0xff]   ;;  %v7561_v21 = vld [vmem:[%s8764_s1 + $0x38] ss:$12 sps:$4 sm:$0xff]  }
 0x175   : > { %1239 = vmatprep.subr.bf16.mxu0 %v7554_v8  ;;  %v7562_v22 = vld [vmem:[%s8764_s1 + $0x4c] ss:$12 sps:$4 sm:$0xff]   ;;  %v7564_v23 = vld [vmem:[%s8764_s1 + $0x48] ss:$12 sps:$4 sm:$0xff]   ;;  %v7565_v24 = vld [vmem:[%s8764_s1 + $0x50] ss:$12 sps:$4 sm:$0xff]   ;;  %1269 = vmatprep.mubr.bf16.mxu0 %v8214_v32 }
 0x176   : > { %1047 = vadd.xlane.f32.xlu0 %v1043_v3  ;;  %v7566_v25 = vld [vmem:[%s8764_s1 + $0x64] ss:$12 sps:$4 sm:$0xff]   ;;  %v7568_v26 = vld [vmem:[%s8764_s1 + $0x60] ss:$12 sps:$4 sm:$0xff]   ;;  %v7569_v27 = vld [vmem:[%s8764_s1 + $0x68] ss:$12 sps:$4 sm:$0xff]   ;;  %7103 = vmatprep.mubr.msk.bf16.mxu1 %vm8215_vm0, %v8213_v6 }
 0x177   : > { %7090 = vmatpush3.bf16.msra.mxu1 %v7557_v10  ;;  %v7570_v28 = vld [vmem:[%s8764_s1 + $0x7c] ss:$12 sps:$4 sm:$0xff]   ;;  %v7572_v29 = vld [vmem:[%s8764_s1 + $0x78] ss:$12 sps:$4 sm:$0xff]   ;;  %v7573_v30 = vld [vmem:[%s8764_s1 + $0x80] ss:$12 sps:$4 sm:$0xff]   ;;  %s9967_s17 = scalar_lea.vmem %s9966_s4, %s8800_s2 }
 0x178   : > { %1240 = vmatpush1.bf16.msra.mxu0 %v7556_v9  ;;  %7091 = vmatprep.subr.bf16.mxu1 %v8213_v6  ;;  %v7574_v31 = vld [vmem:[%s8764_s1 + $0x94] ss:$12 sps:$4 sm:$0xff]   ;;  %v7576_v33 = vld [vmem:[%s8764_s1 + $0x90] ss:$12 sps:$4 sm:$0xff]   ;;  %v7577_v34 = vld [vmem:[%s8764_s1 + $0x98] ss:$12 sps:$4 sm:$0xff]  }
 0x179   : > { %1241 = vmatprep.subr.bf16.mxu0 %v7558_v19  ;;  %v7578_v35 = vld [vmem:[%s8764_s1 + $0xac] ss:$12 sps:$4 sm:$0xff]   ;;  %v7580_v36 = vld [vmem:[%s8764_s1 + $0xa8] ss:$12 sps:$4 sm:$0xff]   ;;  %v7581_v37 = vld [vmem:[%s8764_s1 + $0xb0] ss:$12 sps:$4 sm:$0xff]  }
 0x17a   : > { %v6724_v47 = vld [vmem:[%s9967_s17] ss:$0 sm:$0xff]  ;;  %s8216_s29 = smov 64   ;;  %s8217_s16 = smov 96   ;;  %v8219_v62 = vmov 1983009808  }
 0x17b   : > { %7092 = vmatpush3.bf16.msra.mxu1 %v7561_v21  ;;  %s8218_s23 = smov 32   ;;  %v1366_v63 = vunpack.c.l.s4 %v8219_v62  ;;  %v8220_v1 = vmov 1934713408   ;;  %v8932_v4 = vshrl.u32 %v1368_v0, 7  ;;  %vm2235_vm1 = vcmask 261120   ;;  %s9971_s18 = sld [smem:[#allocation54_spill]] }
 0x17c   : > { %1242 = vmatpush1.bf16.msra.mxu0 %v7560_v20  ;;  %7093 = vmatprep.subr.bf16.mxu1 %v8213_v6  ;;  %vm2612_vm2 = vcmask 64512   ;;  %vm2720_vm3 = vcmask 1043456  }
 0x17d   : > { %1243 = vmatprep.subr.bf16.mxu0 %v7562_v22 }
 0x17f   : > { %7094 = vmatpush3.bf16.msra.mxu1 %v7565_v24 }
 0x180   : > { %1244 = vmatpush1.bf16.msra.mxu0 %v7564_v23  ;;  %7095 = vmatprep.subr.bf16.mxu1 %v8213_v6 }
 0x181   : > { %1245 = vmatprep.subr.bf16.mxu0 %v7566_v25  ;;  %s9972_s5 = scalar_lea.vmem %s9971_s18, %s8800_s2  ;;  %s9974_s2 = sld [smem:[#allocation30_spill]] }
 0x183   : > { %7096 = vmatpush3.bf16.msra.mxu1 %v7569_v27 }
 0x184   : > { %1246 = vmatpush1.bf16.msra.mxu0 %v7568_v26  ;;  %7097 = vmatprep.subr.bf16.mxu1 %v8213_v6 }
 0x185   : > { %1247 = vmatprep.subr.bf16.mxu0 %v7570_v28 }
 0x187   : > { %7098 = vmatpush3.bf16.msra.mxu1 %v7573_v30  ;;  %p6922_p5 = scmp.ne.s32.totalorder %s9974_s2, 1 }
 0x188   : > { %1248 = vmatpush1.bf16.msra.mxu0 %v7572_v29  ;;  %7099 = vmatprep.subr.bf16.mxu1 %v8213_v6 }
 0x189   : > { %1249 = vmatprep.subr.bf16.mxu0 %v7574_v31 }
 0x18b   : > { %7100 = vmatpush3.bf16.msra.mxu1 %v7577_v34 }
 0x18c   : > { %1250 = vmatpush1.bf16.msra.mxu0 %v7576_v33  ;;  %7101 = vmatprep.subr.bf16.mxu1 %v8213_v6 }
 0x18d   : > { %1251 = vmatprep.subr.bf16.mxu0 %v7578_v35 }
 0x18f   : > { %7102 = vmatpush3.bf16.msra.mxu1 %v7581_v37 }
 0x190   : > { %1252 = vmatpush1.bf16.msra.mxu0 %v7580_v36  ;;  %7113 = vmatprep.subr.bf16.mxu1 %v8213_v6 }
 0x191   : > { %7107 = vmatprep.subr.bf16.mxu0 %v8213_v6 }
 0x1ff   : > { %v1046_v11 = vpop.xlane.xlu0 %1045 }
 0x200   : > { %v1050_v12 = vmul.f32 0.0078125, %v1046_v11 }
 0x202   : > { %v8858_v13 = vsub.f32 %v1042_v2, %v1050_v12  ;;  %v1398_v2 = vunpack.c.l.s4 %v8220_v1 }
 0x203   : > { %v1048_v14 = vpop.xlane.xlu0 %1047 }
 0x204   : > { %v1051_v15 = vmul.f32 0.0078125, %v1048_v14  ;;  %v1054_v16 = vmul.f32 %v8858_v13, %v8858_v13  ;;  %v1399_v8 = vunpack.c.0.s8 %v1398_v2 }
 0x206   : > { %v8862_v17 = vsub.f32 %v1043_v3, %v1051_v15  ;;  %1056 = vadd.xlane.f32.xlu1 %v1054_v16  ;;  %v1367_v3 = vunpack.c.0.s8 %v1366_v63  ;;  %v8938_v16 = vsub.s32 %v1399_v8, %v8932_v4 }
 0x208   : > { %v1055_v18 = vmul.f32 %v8862_v17, %v8862_v17  ;;  %v8935_v9 = vsub.s32 %v1367_v3, %v8932_v4 }
 0x20a   : > { %1058 = vadd.xlane.f32.xlu1 %v1055_v18 }
 0x293   : > { %v1057_v38 = vpop.xlane.xlu1 %1056 }
 0x294   : > { %v1060_v39 = vmul.f32 0.0078125, %v1057_v38 }
 0x296   : > { %v1062_v40 = vadd.f32 1e-05, %v1060_v39 }
 0x297   : > { %v1059_v41 = vpop.xlane.xlu1 %1058 }
 0x298   : > { %7710 = vrsqrt.f32 %v1062_v40  ;;  %v1061_v42 = vmul.f32 0.0078125, %v1059_v41 }
 0x29a   : > { %v1063_v43 = vadd.f32 1e-05, %v1061_v42 }
 0x29c   : > { %7712 = vrsqrt.f32 %v1063_v43 }
 0x2a2   : > { %v7711_v44 = vpop.eup %7710 }
 0x2a3   : > { %v1066_v45 = vmul.f32 %v7711_v44, %v8858_v13 }
 0x2a5   : > { %v8901_v49 = vmul.f32 %v6724_v47, %v1066_v45 }
 0x2a6   : > { %v7713_v46 = vpop.eup %7712 }
 0x2a7   : > { %v1067_v48 = vmul.f32 %v7713_v46, %v8862_v17 }
 0x2a9   : > { %v8903_v50 = vmul.f32 %v6724_v47, %v1067_v48 }
 0x2ab   : > { %v1108_v51 = vpack.c.bf16 %v8903_v50, %v8901_v49 }
 0x2ad   : > { %1270 = vmatmul.mubr.bf16.vlgmr.msra.gmra.mrb[0].mxu0 %v1108_v51  ;;  %7104 = vmatmul.mubr.bf16.vlgmr.msra.gmra.mrb[0].mxu1 %v1108_v51 }
 0x2ae   : > { %7109 = vmatprep.mubr.msk.bf16.mxu0 %vm8215_vm0, %v8213_v6  ;;  %7115 = vmatprep.mubr.msk.bf16.mxu1 %vm8215_vm0, %v8213_v6 }
 0x380   : > { %v1271_v52 = vpop.f32.mrb[0].mxu0  ;;  %v8911_v53 = vpop.f32.mrb[0].mxu1 }
 0x381   : > { %v1273_v54 = vpop.f32.mrb[1].mxu0  ;;  %v7105_v55 = vpop.f32.mrb[1].mxu1  ;;  %v1321_v60 = vmul.f32 0.17677669, %v1271_v52 }
 0x382   : > { %v8913_v56 = vpop.f32.mrb[2].mxu1  ;;  %1643 = vrot.lane.b32.xlu1 %v1273_v54, %s8216_s29  ;;  %1637 = vrot.lane.b32.xlu0 %v1273_v54, %s8217_s16  ;;  %v1275_v57 = vpop.f32.mrb[2].mxu0 }
 0x383   : > { %v1277_v58 = vpop.f32.mrb[3].mxu0  ;;  %v7106_v59 = vpop.f32.mrb[3].mxu1  ;;  %v8923_v61 = vmul.f32 0.17677669, %v1275_v57 }
 0x386   : > { %1649 = vrot.lane.b32.xlu0 %v1273_v54, %s8218_s23  ;;  %1639 = vrot.lane.b32.xlu1 %v1277_v58, %s8217_s16 }
 0x38a   : > { %1345 = vrot.lane.b32.xlu0 %v1321_v60, %s8217_s16  ;;  %1645 = vrot.lane.b32.xlu1 %v1277_v58, %s8216_s29 }
 0x38e   : > { %1351 = vrot.lane.b32.xlu0 %v1321_v60, %s8216_s29  ;;  %1651 = vrot.lane.b32.xlu1 %v1277_v58, %s8218_s23 }
 0x392   : > { %1357 = vrot.lane.b32.xlu0 %v1321_v60, %s8218_s23  ;;  %1347 = vrot.lane.b32.xlu1 %v8923_v61, %s8217_s16 }
 0x396   : > { %1353 = vrot.lane.b32.xlu1 %v8923_v61, %s8216_s29 }
 0x39a   : > { %1359 = vrot.lane.b32.xlu1 %v8923_v61, %s8218_s23 }
 0x3f4   : > { %v1644_v5 = vpop.permute.xlu1 %1643  ;;  %v1638_v7 = vpop.permute.xlu0 %1637 }
 0x3f5   : > { %v1655_v10 = vcombine.low %v1273_v54, %v1644_v5  ;;  %v1656_v11 = vcombine.high %v1273_v54, %v1644_v5 }
 0x3f7   : > { %v1663_v17 = vrot.slane %v1655_v10, %v8935_v9  ;;  %v1670_v18 = vrot.slane %v1656_v11, %v8935_v9 }
 0x3f8   : > { %v1650_v12 = vpop.permute.xlu0 %1649  ;;  %v1640_v13 = vpop.permute.xlu1 %1639 }
 0x3f9   : > { %v1671_v14 = vcombine.low %v1638_v7, %v1650_v12  ;;  %v1672_v15 = vcombine.high %v1638_v7, %v1650_v12 }
 0x3fb   : > { %v1679_v19 = vrot.slane %v1671_v14, %v8935_v9  ;;  %v1686_v20 = vrot.slane %v1672_v15, %v8935_v9 }
 0x3fc   : > { %v1346_v21 = vpop.permute.xlu0 %1345  ;;  %v1646_v22 = vpop.permute.xlu1 %1645 }
 0x3fd   : > { %v1687_v23 = vcombine.low %v1663_v17, %v1679_v19  ;;  %v1688_v24 = vcombine.high %v1663_v17, %v1679_v19  ;;  %v1703_v25 = vcombine.low %v1670_v18, %v1686_v20  ;;  %v1704_v26 = vcombine.high %v1670_v18, %v1686_v20 }
 0x3fe   : > { %v1723_v27 = vcombine.low %v1277_v58, %v1646_v22  ;;  %v1724_v28 = vcombine.high %v1277_v58, %v1646_v22 }
 0x3ff   : > { %v1695_v29 = vrot.slane %v1687_v23, %v8938_v16  ;;  %v1702_v30 = vrot.slane %v1688_v24, %v8938_v16  ;;  %v1711_v31 = vrot.slane %v1703_v25, %v8938_v16  ;;  %v1718_v33 = vrot.slane %v1704_v26, %v8938_v16 }
 0x400   : > { %v1731_v34 = vrot.slane %v1723_v27, %v8935_v9  ;;  %v1738_v35 = vrot.slane %v1724_v28, %v8935_v9  ;;  %v1352_v36 = vpop.permute.xlu0 %1351  ;;  %v1652_v37 = vpop.permute.xlu1 %1651 }
 0x401   : > { %v1791_v38 = vcombine.low %v1695_v29, %v1702_v30  ;;  %v6753_v39 = vcombine.high %v1695_v29, %v1702_v30  ;;  %v1807_v40 = vcombine.low %v1711_v31, %v1718_v33  ;;  %v6754_v41 = vcombine.high %v1711_v31, %v1718_v33 }
 0x402   : > { %v1363_v42 = vcombine.low %v1321_v60, %v1352_v36  ;;  %v1364_v43 = vcombine.high %v1321_v60, %v1352_v36  ;;  %v1739_v44 = vcombine.low %v1640_v13, %v1652_v37  ;;  %v1740_v45 = vcombine.high %v1640_v13, %v1652_v37 }
 0x403   : > { %v8951_v46 = vrot.slane %v1791_v38, %v8935_v9  ;;  %v8954_v47 = vrot.slane %v6753_v39, %v8935_v9  ;;  %v8957_v48 = vrot.slane %v1807_v40, %v8935_v9  ;;  %v8960_v51 = vrot.slane %v6754_v41, %v8935_v9 }
 0x404   : > { %v1371_v52 = vrot.slane %v1363_v42, %v8935_v9  ;;  %v1378_v54 = vrot.slane %v1364_v43, %v8935_v9  ;;  %v1747_v55 = vrot.slane %v1739_v44, %v8935_v9  ;;  %v1754_v57 = vrot.slane %v1740_v45, %v8935_v9  ;;  %v1358_v58 = vpop.permute.xlu0 %1357  ;;  %v1348_v59 = vpop.permute.xlu1 %1347 }
 0x405   : > { %v1379_v60 = vcombine.low %v1346_v21, %v1358_v58  ;;  %v1380_v62 = vcombine.high %v1346_v21, %v1358_v58  ;;  %v1823_v63 = vcombine.low %v8951_v46, %v8954_v47  ;;  %v1839_v0 = vcombine.low %v8957_v48, %v8960_v51 }
 0x406   : > { %v1755_v1 = vcombine.low %v1731_v34, %v1747_v55  ;;  %v1756_v2 = vcombine.high %v1731_v34, %v1747_v55  ;;  %v1771_v3 = vcombine.low %v1738_v35, %v1754_v57  ;;  %v1772_v5 = vcombine.high %v1738_v35, %v1754_v57 }
 0x407   : > { %v1387_v7 = vrot.slane %v1379_v60, %v8935_v9  ;;  %v1394_v8 = vrot.slane %v1380_v62, %v8935_v9  ;;  %v8973_v10 = vrot.slane %v1823_v63, %v8938_v16  ;;  %v8976_v11 = vrot.slane %v1839_v0, %v8938_v16 }
 0x408   : > { %v1763_v12 = vrot.slane %v1755_v1, %v8938_v16  ;;  %v1770_v13 = vrot.slane %v1756_v2, %v8938_v16  ;;  %v1779_v14 = vrot.slane %v1771_v3, %v8938_v16  ;;  %v1786_v15 = vrot.slane %v1772_v5, %v8938_v16  ;;  %v1354_v17 = vpop.permute.xlu1 %1353 }
 0x409   : > { %v1395_v18 = vcombine.low %v1371_v52, %v1387_v7  ;;  %v1396_v19 = vcombine.high %v1371_v52, %v1387_v7  ;;  %v1411_v20 = vcombine.low %v1378_v54, %v1394_v8  ;;  %v1412_v21 = vcombine.high %v1378_v54, %v1394_v8 }
 0x40a   : > { %v1859_v22 = vcombine.low %v1763_v12, %v1770_v13  ;;  %v6755_v23 = vcombine.high %v1763_v12, %v1770_v13  ;;  %v1875_v24 = vcombine.low %v1779_v14, %v1786_v15  ;;  %v6756_v25 = vcombine.high %v1779_v14, %v1786_v15 }
 0x40b   : > { %v1403_v26 = vrot.slane %v1395_v18, %v8938_v16  ;;  %v1410_v27 = vrot.slane %v1396_v19, %v8938_v16  ;;  %v1419_v28 = vrot.slane %v1411_v20, %v8938_v16  ;;  %v1426_v29 = vrot.slane %v1412_v21, %v8938_v16 }
 0x40c   : > { %v8987_v30 = vrot.slane %v1859_v22, %v8935_v9  ;;  %v8990_v31 = vrot.slane %v6755_v23, %v8935_v9  ;;  %v8993_v33 = vrot.slane %v1875_v24, %v8935_v9  ;;  %v8996_v34 = vrot.slane %v6756_v25, %v8935_v9  ;;  %v1360_v35 = vpop.permute.xlu1 %1359 }
 0x40d   : > { %v1499_v36 = vcombine.low %v1403_v26, %v1410_v27  ;;  %v6749_v37 = vcombine.high %v1403_v26, %v1410_v27  ;;  %v1515_v38 = vcombine.low %v1419_v28, %v1426_v29  ;;  %v6750_v39 = vcombine.high %v1419_v28, %v1426_v29 }
 0x40e   : > { %v1431_v40 = vcombine.low %v8923_v61, %v1354_v17  ;;  %v1432_v41 = vcombine.high %v8923_v61, %v1354_v17  ;;  %v1447_v42 = vcombine.low %v1348_v59, %v1360_v35  ;;  %v1448_v43 = vcombine.high %v1348_v59, %v1360_v35 }
 0x40f   : > { %v9001_v44 = vrot.slane %v1499_v36, %v8935_v9  ;;  %v9004_v45 = vrot.slane %v6749_v37, %v8935_v9  ;;  %v9007_v52 = vrot.slane %v1515_v38, %v8935_v9  ;;  %v9010_v54 = vrot.slane %v6750_v39, %v8935_v9 }
 0x410   : > { %v1439_v55 = vrot.slane %v1431_v40, %v8935_v9  ;;  %v1446_v57 = vrot.slane %v1432_v41, %v8935_v9  ;;  %v1455_v61 = vrot.slane %v1447_v42, %v8935_v9  ;;  %v1462_v58 = vrot.slane %v1448_v43, %v8935_v9 }
 0x411   : > { %v1531_v59 = vcombine.low %v9001_v44, %v9004_v45  ;;  %v1547_v60 = vcombine.low %v9007_v52, %v9010_v54  ;;  %v1855_v2 = vcombine.low %v8973_v10, %v8976_v11  ;;  %v1891_v3 = vcombine.low %v8987_v30, %v8990_v31 }
 0x412   : > { %v1463_v62 = vcombine.low %v1439_v55, %v1455_v61  ;;  %v1464_v63 = vcombine.high %v1439_v55, %v1455_v61  ;;  %v1479_v0 = vcombine.low %v1446_v57, %v1462_v58  ;;  %v1480_v1 = vcombine.high %v1446_v57, %v1462_v58 }
 0x413   : > { %v1907_v5 = vcombine.low %v8993_v33, %v8996_v34  ;;  %v1539_v7 = vrot.slane %v1531_v59, %v8938_v16  ;;  %v2227_v15 = vpack.c.bf16 %v1855_v2, %v1855_v2  ;;  %v1899_v17 = vrot.slane %v1891_v3, %v8938_v16 }
 0x414   : > { %v1471_v8 = vrot.slane %v1463_v62, %v8938_v16  ;;  %v1478_v12 = vrot.slane %v1464_v63, %v8938_v16  ;;  %v1487_v13 = vrot.slane %v1479_v0, %v8938_v16  ;;  %v1494_v14 = vrot.slane %v1480_v1, %v8938_v16 }
 0x415   : > { %v1915_v18 = vrot.slane %v1907_v5, %v8938_v16  ;;  %v1555_v19 = vrot.slane %v1547_v60, %v8938_v16  ;;  %v2240_v24 = vsel %vm2235_vm1, %v2227_v15, 0  ;;  %v1856_v27 = vcombine.high %v8973_v10, %v8976_v11 }
 0x416   : > { %v1567_v20 = vcombine.low %v1471_v8, %v1478_v12  ;;  %v6751_v21 = vcombine.high %v1471_v8, %v1478_v12  ;;  %v1583_v22 = vcombine.low %v1487_v13, %v1494_v14  ;;  %v6752_v23 = vcombine.high %v1487_v13, %v1494_v14  ;;  %7108 = vmatpush3.bf16.xpose.msra.mxu0 %v2240_v24 }
 0x417   : > { %v1923_v25 = vcombine.low %v1899_v17, %v1915_v18  ;;  %v1563_v26 = vcombine.low %v1539_v7, %v1555_v19  ;;  %7119 = vmatprep.subr.bf16.mxu0 %v8213_v6  ;;  %v2229_v42 = vpack.c.bf16 %v1856_v27, %v1856_v27  ;;  %v1924_v43 = vcombine.high %v1899_v17, %v1915_v18 }
 0x418   : > { %v1574_v28 = vrot.slane %v1567_v20, %v8935_v9  ;;  %v1582_v29 = vrot.slane %v6751_v21, %v8935_v9  ;;  %v1590_v35 = vrot.slane %v1583_v22, %v8935_v9  ;;  %v1598_v36 = vrot.slane %v6752_v23, %v8935_v9 }
 0x419   : > { %v2228_v37 = vpack.c.bf16 %v1923_v25, %v1923_v25  ;;  %v2219_v41 = vpack.c.bf16 %v1563_v26, %v1563_v26  ;;  %v1824_v55 = vcombine.high %v8951_v46, %v8954_v47  ;;  %v1840_v57 = vcombine.high %v8957_v48, %v8960_v51 }
 0x41a   : > { %v1599_v38 = vcombine.low %v1574_v28, %v1582_v29  ;;  %v1615_v39 = vcombine.low %v1590_v35, %v1598_v36  ;;  %v1892_v61 = vcombine.high %v8987_v30, %v8990_v31  ;;  %v2332_v62 = vsel %vm2235_vm1, %v2229_v42, 0 }
 0x41b   : > { %v2286_v40 = vsel %vm2235_vm1, %v2228_v37, 0  ;;  %v1838_v59 = vrot.slane %v1824_v55, %v8938_v16  ;;  %v1854_v60 = vrot.slane %v1840_v57, %v8938_v16  ;;  %v2230_v63 = vpack.c.bf16 %v1924_v43, %v1924_v43  ;;  %v1324_v55 = vld [vmem:[%s8818_s21 + $0x8] sm:$0xff] }
 0x41c   : > { %7114 = vmatpush3.bf16.xpose.msra.mxu1 %v2286_v40  ;;  %v1607_v10 = vrot.slane %v1599_v38, %v8938_v16  ;;  %v1623_v11 = vrot.slane %v1615_v39, %v8938_v16  ;;  %v1906_v46 = vrot.slane %v1892_v61, %v8938_v16  ;;  %v1908_v47 = vcombine.high %v8993_v33, %v8996_v34 }
 0x41d   : > { %7125 = vmatprep.subr.bf16.mxu1 %v8213_v6  ;;  %7110 = vmatmul.mubr.msk.bf16.vlgmr.msra.gmra.mrb[4].mxu0 %vm2235_vm1, %v2219_v41  ;;  %v1857_v51 = vcombine.low %v1838_v59, %v1854_v60  ;;  %v1532_v30 = vcombine.high %v9001_v44, %v9004_v45  ;;  %v1548_v31 = vcombine.high %v9007_v52, %v9010_v54  ;;  %v2378_v33 = vsel %vm2235_vm1, %v2230_v63, 0 }
 0x41e   : > { %v1631_v58 = vcombine.low %v1607_v10, %v1623_v11  ;;  %7120 = vmatpush3.bf16.xpose.msra.mxu0 %v2332_v62  ;;  %7121 = vmatprep.mubr.msk.bf16.mxu0 %vm8215_vm0, %v8213_v6  ;;  %v1564_v0 = vcombine.high %v1539_v7, %v1555_v19  ;;  %v1922_v1 = vrot.slane %v1908_v47, %v8938_v16 }
 0x41f   : > { %7131 = vmatprep.subr.bf16.mxu0 %v8213_v6  ;;  %v2231_v34 = vpack.c.bf16 %v1857_v51, %v1857_v51  ;;  %v1600_v3 = vcombine.high %v1574_v28, %v1582_v29  ;;  %v1616_v5 = vcombine.high %v1590_v35, %v1598_v36  ;;  %v1632_v45 = vcombine.high %v1607_v10, %v1623_v11  ;;  %v1323_v36 = vld [vmem:[%s8818_s21] sm:$0xff] }
 0x420   : > { %v2220_v48 = vpack.c.bf16 %v1631_v58, %v1631_v58  ;;  %v1925_v2 = vcombine.low %v1906_v46, %v1922_v1  ;;  %v2221_v44 = vpack.c.bf16 %v1564_v0, %v1564_v0  ;;  %v1546_v52 = vrot.slane %v1532_v30, %v8938_v16 }
 0x421   : > { %v1562_v54 = vrot.slane %v1548_v31, %v8938_v16  ;;  %v2424_v7 = vsel %vm2235_vm1, %v2231_v34, 0  ;;  %v1858_v12 = vcombine.high %v1838_v59, %v1854_v60  ;;  %v2222_v13 = vpack.c.bf16 %v1632_v45, %v1632_v45  ;;  %v1325_v31 = vld [vmem:[%s8818_s21 + $0x10] sm:$0xff] }
 0x422   : > { %v2232_v8 = vpack.c.bf16 %v1925_v2, %v1925_v2  ;;  %v1614_v15 = vrot.slane %v1600_v3, %v8938_v16  ;;  %v1630_v17 = vrot.slane %v1616_v5, %v8938_v16  ;;  %v1926_v20 = vcombine.high %v1906_v46, %v1922_v1 }
 0x423   : > { %7116 = vmatmul.mubr.msk.bf16.vlgmr.msra.gmra.mrb[4].mxu1 %vm2235_vm1, %v2220_v48  ;;  %v1565_v14 = vcombine.low %v1546_v52, %v1562_v54  ;;  %v2233_v19 = vpack.c.bf16 %v1858_v12, %v1858_v12  ;;  %v1566_v26 = vcombine.high %v1546_v52, %v1562_v54 }
 0x424   : > { %7126 = vmatpush3.bf16.xpose.msra.mxu1 %v2378_v33  ;;  %7127 = vmatprep.mubr.msk.bf16.mxu1 %vm8215_vm0, %v8213_v6  ;;  %v2470_v18 = vsel %vm2235_vm1, %v2232_v8, 0  ;;  %v1633_v22 = vcombine.low %v1614_v15, %v1630_v17  ;;  %v2234_v24 = vpack.c.bf16 %v1926_v20, %v1926_v20  ;;  %v1634_v29 = vcombine.high %v1614_v15, %v1630_v17  ;;  %v1326_v8 = vld [vmem:[%s8818_s21 + $0x18] sm:$0xff]  ;;  %s9968_s21 = scalar_lea.vmem [#allocation9], %s8761_s19 }
 0x425   : > { %7137 = vmatprep.subr.bf16.mxu1 %v8213_v6  ;;  %7122 = vmatmul.mubr.msk.bf16.vlgmr.msra.gmra.mrb[8].mxu0 %vm2235_vm1, %v2221_v44  ;;  %v2223_v21 = vpack.c.bf16 %v1565_v14, %v1565_v14  ;;  %v2516_v23 = vsel %vm2235_vm1, %v2233_v19, 0  ;;  %v2225_v28 = vpack.c.bf16 %v1566_v26, %v1566_v26 }
 0x426   : > { %7132 = vmatpush3.bf16.xpose.msra.mxu0 %v2424_v7  ;;  %7133 = vmatprep.mubr.msk.bf16.mxu0 %vm8215_vm0, %v8213_v6  ;;  %v2224_v25 = vpack.c.bf16 %v1633_v22, %v1633_v22  ;;  %v2562_v27 = vsel %vm2235_vm1, %v2234_v24, 0  ;;  %v2226_v35 = vpack.c.bf16 %v1634_v29, %v1634_v29 }
 0x427   : > { %7143 = vmatprep.subr.bf16.mxu0 %v8213_v6 }
 0x42b   : > { %7128 = vmatmul.mubr.msk.bf16.vlgmr.msra.gmra.mrb[8].mxu1 %vm2235_vm1, %v2222_v13 }
 0x42c   : > { %7138 = vmatpush3.bf16.xpose.msra.mxu1 %v2470_v18  ;;  %7139 = vmatprep.mubr.msk.bf16.mxu1 %vm8215_vm0, %v8213_v6 }
 0x42d   : > { %7149 = vmatprep.subr.bf16.mxu1 %v8213_v6  ;;  %7134 = vmatmul.mubr.msk.bf16.vlgmr.msra.gmra.mrb[12].mxu0 %vm2235_vm1, %v2223_v21 }
 0x42e   : > { %7144 = vmatpush3.bf16.xpose.msra.mxu0 %v2516_v23  ;;  %7145 = vmatprep.mubr.msk.bf16.mxu0 %vm8215_vm0, %v8213_v6 }
 0x42f   : > { %7155 = vmatprep.subr.bf16.mxu0 %v8213_v6 }
 0x433   : > { %7140 = vmatmul.mubr.msk.bf16.vlgmr.msra.gmra.mrb[12].mxu1 %vm2235_vm1, %v2224_v25 }
 0x434   : > { %7150 = vmatpush3.bf16.xpose.msra.mxu1 %v2562_v27  ;;  %7151 = vmatprep.mubr.msk.bf16.mxu1 %vm8215_vm0, %v8213_v6 }
 0x435   : > { %7161 = vmatprep.subr.bf16.mxu1 %v8213_v6  ;;  %7146 = vmatmul.mubr.msk.bf16.vlgmr.msra.gmra.mrb[16].mxu0 %vm2235_vm1, %v2225_v28 }
 0x436   : > { %7157 = vmatprep.mubr.msk.bf16.mxu0 %vm8215_vm0, %v8213_v6 }
 0x43b   : > { %7152 = vmatmul.mubr.msk.bf16.vlgmr.msra.gmra.mrb[16].mxu1 %vm2235_vm1, %v2226_v35 }
 0x43c   : > { %7163 = vmatprep.mubr.msk.bf16.mxu1 %vm8215_vm0, %v8213_v6 }
 0x4f0   : > { %v2276_v37 = vpop.f32.mrb[4].mxu0 }
 0x4f1   : > { %v9103_v38 = vadd.f32 %v2276_v37, %v1323_v36  ;;  %v7111_v39 = vpop.f32.mrb[5].mxu0 }
 0x4f2   : > { %v2279_v40 = vpop.f32.mrb[6].mxu0 }
 0x4f3   : > { %v7112_v41 = vpop.f32.mrb[7].mxu0  ;;  %v2613_v42 = vsel %vm2612_vm2, %v9103_v38, -inf }
 0x4f4   : > { %2614 = vmax.xlane.f32.xlu0 %v2613_v42 }
 0x4f6   : > { %v2322_v43 = vpop.f32.mrb[4].mxu1 }
 0x4f7   : > { %v2605_v10 = vadd.f32 %v2322_v43, %v1323_v36  ;;  %v7117_v11 = vpop.f32.mrb[5].mxu1 }
 0x4f8   : > { %v2325_v57 = vpop.f32.mrb[6].mxu1  ;;  %v2368_v59 = vpop.f32.mrb[8].mxu0 }
 0x4f9   : > { %v7118_v61 = vpop.f32.mrb[7].mxu1  ;;  %v2616_v58 = vsel %vm2612_vm2, %v2605_v10, -inf  ;;  %v9109_v60 = vadd.f32 %v2368_v59, %v1324_v55  ;;  %v7123_v62 = vpop.f32.mrb[9].mxu0 }
 0x4fa   : > { %2617 = vmax.xlane.f32.xlu1 %v2616_v58  ;;  %v2371_v63 = vpop.f32.mrb[10].mxu0 }
 0x4fb   : > { %v7124_v46 = vpop.f32.mrb[11].mxu0  ;;  %v2619_v47 = vsel %vm2612_vm2, %v9109_v60, -inf }
 0x4fc   : > { %2620 = vmax.xlane.f32.xlu0 %v2619_v47 }
 0x4fe   : > { %v2414_v48 = vpop.f32.mrb[8].mxu1 }
 0x4ff   : > { %v9113_v51 = vadd.f32 %v2414_v48, %v1324_v55  ;;  %v7129_v30 = vpop.f32.mrb[9].mxu1 }
 0x500   : > { %v2417_v0 = vpop.f32.mrb[10].mxu1  ;;  %v2460_v34 = vpop.f32.mrb[12].mxu0 }
 0x501   : > { %v7130_v1 = vpop.f32.mrb[11].mxu1  ;;  %v2622_v33 = vsel %vm2612_vm2, %v9113_v51, -inf  ;;  %v2608_v2 = vadd.f32 %v2460_v34, %v1325_v31  ;;  %v7135_v3 = vpop.f32.mrb[13].mxu0 }
 0x502   : > { %2623 = vmax.xlane.f32.xlu0 %v2622_v33  ;;  %v2463_v5 = vpop.f32.mrb[14].mxu0 }
 0x503   : > { %v7136_v44 = vpop.f32.mrb[15].mxu0  ;;  %v2625_v45 = vsel %vm2612_vm2, %v2608_v2, -inf }
 0x506   : > { %v2506_v52 = vpop.f32.mrb[12].mxu1  ;;  %2626 = vmax.xlane.f32.xlu0 %v2625_v45 }
 0x507   : > { %v2609_v54 = vadd.f32 %v2506_v52, %v1325_v31  ;;  %v7141_v7 = vpop.f32.mrb[13].mxu1 }
 0x508   : > { %v2509_v12 = vpop.f32.mrb[14].mxu1  ;;  %v2552_v15 = vpop.f32.mrb[16].mxu0 }
 0x509   : > { %v7142_v13 = vpop.f32.mrb[15].mxu1  ;;  %v2628_v14 = vsel %vm2612_vm2, %v2609_v54, -inf  ;;  %v2610_v17 = vadd.f32 %v2552_v15, %v1326_v8  ;;  %v7147_v18 = vpop.f32.mrb[17].mxu0 }
 0x50a   : > { %2629 = vmax.xlane.f32.xlu1 %v2628_v14  ;;  %v2555_v19 = vpop.f32.mrb[18].mxu0 }
 0x50b   : > { %v7148_v20 = vpop.f32.mrb[19].mxu0  ;;  %v2631_v21 = vsel %vm2612_vm2, %v2610_v17, -inf }
 0x50c   : > { %2632 = vmax.xlane.f32.xlu0 %v2631_v21 }
 0x50e   : > { %v2598_v22 = vpop.f32.mrb[16].mxu1 }
 0x50f   : > { %v7153_v23 = vpop.f32.mrb[17].mxu1  ;;  %v2611_v26 = vadd.f32 %v2598_v22, %v1326_v8 }
 0x510   : > { %v2601_v24 = vpop.f32.mrb[18].mxu1 }
 0x511   : > { %v7154_v25 = vpop.f32.mrb[19].mxu1  ;;  %v2634_v27 = vsel %vm2612_vm2, %v2611_v26, -inf }
 0x51b   : > { %1931 = vrot.lane.b32.xlu1 %v8913_v56, %s8217_s16 }
 0x51f   : > { %1935 = vrot.lane.b32.xlu1 %v8911_v53, %s8216_s29 }
 0x522   : > { %1929 = vrot.lane.b32.xlu0 %v8911_v53, %s8217_s16 }
 0x543   : > { %2635 = vmax.xlane.f32.xlu1 %v2634_v27 }
 0x554   : > { %1937 = vrot.lane.b32.xlu1 %v8913_v56, %s8216_s29 }
 0x581   : > { %v2615_v28 = vpop.xlane.xlu0 %2614 }
 0x582   : > { %v2637_v29 = vsub.f32 %v9103_v38, %v2615_v28 }
 0x584   : > { %v2645_v35 = vmul.f32 1.442695, %v2637_v29 }
 0x586   : > { %7714 = vpow2.f32 %v2645_v35 }
 0x587   : > { %v2618_v36 = vpop.xlane.xlu1 %2617 }
 0x588   : > { %v2638_v37 = vsub.f32 %v2605_v10, %v2618_v36 }
 0x589   : > { %v2621_v61 = vpop.xlane.xlu0 %2620 }
 0x58a   : > { %v2647_v39 = vmul.f32 1.442695, %v2638_v37  ;;  %v2639_v59 = vsub.f32 %v9109_v60, %v2621_v61 }
 0x58c   : > { %7716 = vpow2.f32 %v2647_v39  ;;  %v2649_v46 = vmul.f32 1.442695, %v2639_v59 }
 0x58e   : > { %7718 = vpow2.f32 %v2649_v46 }
 0x58f   : > { %v2624_v58 = vpop.xlane.xlu0 %2623 }
 0x590   : > { %v9132_v40 = vpop.eup %7714  ;;  %v2640_v63 = vsub.f32 %v9113_v51, %v2624_v58 }
 0x591   : > { %v2661_v41 = vsel %vm2612_vm2, %v9132_v40, 0.0 }
 0x592   : > { %2662 = vadd.xlane.f32.xlu0 %v2661_v41  ;;  %v2651_v48 = vmul.f32 1.442695, %v2640_v63 }
 0x593   : > { %v2627_v62 = vpop.xlane.xlu0 %2626 }
 0x594   : > { %v2641_v47 = vsub.f32 %v2608_v2, %v2627_v62  ;;  %7720 = vpow2.f32 %v2651_v48 }
 0x596   : > { %v9136_v42 = vpop.eup %7716  ;;  %v2653_v30 = vmul.f32 1.442695, %v2641_v47 }
 0x597   : > { %v2630_v43 = vpop.xlane.xlu1 %2629  ;;  %v2664_v11 = vsel %vm2612_vm2, %v9136_v42, 0.0 }
 0x598   : > { %2665 = vadd.xlane.f32.xlu1 %v2664_v11  ;;  %v2642_v31 = vsub.f32 %v2609_v54, %v2630_v43  ;;  %7722 = vpow2.f32 %v2653_v30 }
 0x599   : > { %v2633_v0 = vpop.xlane.xlu0 %2632 }
 0x59a   : > { %v2655_v1 = vmul.f32 1.442695, %v2642_v31  ;;  %v2643_v33 = vsub.f32 %v2610_v17, %v2633_v0 }
 0x59b   : > { %v9140_v38 = vpop.permute.xlu1 %1931 }
 0x59c   : > { %7724 = vpow2.f32 %v2655_v1  ;;  %v2657_v34 = vmul.f32 1.442695, %v2643_v33 }
 0x59d   : > { %v1930_v15 = vpop.permute.xlu0 %1929 }
 0x59e   : > { %7726 = vpow2.f32 %v2657_v34 }
 0x59f   : > { %v1936_v55 = vpop.permute.xlu1 %1935 }
 0x5a0   : > { %v1947_v10 = vcombine.low %v8911_v53, %v1936_v55  ;;  %v1948_v57 = vcombine.high %v8911_v53, %v1936_v55 }
 0x5a2   : > { %v1955_v23 = vrot.slane %v1947_v10, %v8935_v9  ;;  %v1962_v24 = vrot.slane %v1948_v57, %v8935_v9 }
 0x5a8   : > { %1941 = vrot.lane.b32.xlu0 %v8911_v53, %s8218_s23  ;;  %v9150_v53 = vpop.eup %7718 }
 0x5a9   : > { %1943 = vrot.lane.b32.xlu1 %v8913_v56, %s8218_s23  ;;  %v9152_v60 = vpop.eup %7720  ;;  %v2667_v51 = vsel %vm2612_vm2, %v9150_v53, 0.0 }
 0x5aa   : > { %v9156_v2 = vpop.eup %7722  ;;  %v2670_v5 = vsel %vm2612_vm2, %v9152_v60, 0.0 }
 0x5ab   : > { %v2673_v3 = vsel %vm2612_vm2, %v9156_v2, 0.0  ;;  %v9162_v44 = vpop.eup %7724 }
 0x5ac   : > { %v2676_v45 = vsel %vm2612_vm2, %v9162_v44, 0.0  ;;  %v9166_v54 = vpop.eup %7726 }
 0x5ad   : > { %v2679_v12 = vsel %vm2612_vm2, %v9166_v54, 0.0 }
 0x5c7   : > { %2668 = vadd.xlane.f32.xlu0 %v2667_v51 }
 0x5cb   : > { %2674 = vadd.xlane.f32.xlu0 %v2673_v3 }
 0x5cd   : > { %2671 = vadd.xlane.f32.xlu1 %v2670_v5 }
 0x5cf   : > { %2677 = vadd.xlane.f32.xlu0 %v2676_v45 }
 0x5d0   : > { %v2636_v52 = vpop.xlane.xlu1 %2635 }
 0x5d1   : > { %v2644_v7 = vsub.f32 %v2611_v26, %v2636_v52 }
 0x5d3   : > { %v2659_v8 = vmul.f32 1.442695, %v2644_v7  ;;  %2680 = vadd.xlane.f32.xlu0 %v2679_v12 }
 0x5d4   : > { %v1938_v17 = vpop.permute.xlu1 %1937 }
 0x5d5   : > { %7728 = vpow2.f32 %v2659_v8  ;;  %v2015_v27 = vcombine.low %v8913_v56, %v1938_v17  ;;  %v2016_v28 = vcombine.high %v8913_v56, %v1938_v17 }
 0x5d7   : > { %v2023_v56 = vrot.slane %v2015_v27, %v8935_v9  ;;  %v2030_v61 = vrot.slane %v2016_v28, %v8935_v9 }
 0x5df   : > { %v9170_v13 = vpop.eup %7728 }
 0x5e0   : > { %v2682_v14 = vsel %vm2612_vm2, %v9170_v13, 0.0 }
 0x5e1   : > { %2683 = vadd.xlane.f32.xlu1 %v2682_v14 }
 0x61f   : > { %v2663_v18 = vpop.xlane.xlu0 %2662 }
 0x620   : > { %7730 = vrcp.f32 %v2663_v18 }
 0x623   : > { %v1942_v19 = vpop.permute.xlu0 %1941 }
 0x624   : > { %v1963_v21 = vcombine.low %v1930_v15, %v1942_v19  ;;  %v1964_v22 = vcombine.high %v1930_v15, %v1942_v19 }
 0x625   : > { %v2666_v20 = vpop.xlane.xlu1 %2665 }
 0x626   : > { %v1971_v25 = vrot.slane %v1963_v21, %v8935_v9  ;;  %v1978_v26 = vrot.slane %v1964_v22, %v8935_v9  ;;  %7732 = vrcp.f32 %v2666_v20 }
 0x628   : > { %v1979_v35 = vcombine.low %v1955_v23, %v1971_v25  ;;  %v1980_v36 = vcombine.high %v1955_v23, %v1971_v25  ;;  %v1995_v37 = vcombine.low %v1962_v24, %v1978_v26  ;;  %v1996_v39 = vcombine.high %v1962_v24, %v1978_v26 }
 0x629   : > { %v1944_v29 = vpop.permute.xlu1 %1943 }
 0x62a   : > { %v2031_v41 = vcombine.low %v9140_v38, %v1944_v29  ;;  %v2032_v43 = vcombine.high %v9140_v38, %v1944_v29  ;;  %v1987_v11 = vrot.slane %v1979_v35, %v8938_v16  ;;  %v1994_v55 = vrot.slane %v1980_v36, %v8938_v16  ;;  %v7731_v20 = vpop.eup %7730 }
 0x62b   : > { %v2003_v10 = vrot.slane %v1995_v37, %v8938_v16  ;;  %v2010_v57 = vrot.slane %v1996_v39, %v8938_v16  ;;  %v2693_v36 = vmul.f32 %v7731_v20, %v9132_v40 }
 0x62c   : > { %v2039_v58 = vrot.slane %v2031_v41, %v8935_v9  ;;  %v2046_v59 = vrot.slane %v2032_v43, %v8935_v9  ;;  %v2083_v62 = vcombine.low %v1987_v11, %v1994_v55  ;;  %v6757_v63 = vcombine.high %v1987_v11, %v1994_v55 }
 0x62d   : > { %v2099_v46 = vcombine.low %v2003_v10, %v2010_v57  ;;  %v6758_v38 = vcombine.high %v2003_v10, %v2010_v57 }
 0x62e   : > { %v2047_v47 = vcombine.low %v2023_v56, %v2039_v58  ;;  %v2048_v48 = vcombine.high %v2023_v56, %v2039_v58  ;;  %v2063_v30 = vcombine.low %v2030_v61, %v2046_v59  ;;  %v2064_v31 = vcombine.high %v2030_v61, %v2046_v59 }
 0x62f   : > { %v2090_v0 = vrot.slane %v2083_v62, %v8935_v9  ;;  %v2098_v1 = vrot.slane %v6757_v63, %v8935_v9  ;;  %v2106_v33 = vrot.slane %v2099_v46, %v8935_v9  ;;  %v2114_v34 = vrot.slane %v6758_v38, %v8935_v9 }
 0x630   : > { %v2055_v51 = vrot.slane %v2047_v47, %v8938_v16  ;;  %v2062_v3 = vrot.slane %v2048_v48, %v8938_v16  ;;  %v2071_v5 = vrot.slane %v2063_v30, %v8938_v16  ;;  %v2078_v45 = vrot.slane %v2064_v31, %v8938_v16  ;;  %v7733_v56 = vpop.eup %7732 }
 0x631   : > { %v2115_v52 = vcombine.low %v2090_v0, %v2098_v1  ;;  %v2131_v7 = vcombine.low %v2106_v33, %v2114_v34  ;;  %v2116_v14 = vcombine.high %v2090_v0, %v2098_v1  ;;  %v2132_v24 = vcombine.high %v2106_v33, %v2114_v34 }
 0x632   : > { %v2151_v8 = vcombine.low %v2055_v51, %v2062_v3  ;;  %v6759_v12 = vcombine.high %v2055_v51, %v2062_v3  ;;  %v2167_v15 = vcombine.low %v2071_v5, %v2078_v45  ;;  %v6760_v17 = vcombine.high %v2071_v5, %v2078_v45 }
 0x633   : > { %v2123_v18 = vrot.slane %v2115_v52, %v8938_v16  ;;  %v2139_v19 = vrot.slane %v2131_v7, %v8938_v16  ;;  %v2130_v23 = vrot.slane %v2116_v14, %v8938_v16  ;;  %v2146_v35 = vrot.slane %v2132_v24, %v8938_v16 }
 0x634   : > { %v2158_v21 = vrot.slane %v2151_v8, %v8935_v9  ;;  %v2166_v22 = vrot.slane %v6759_v12, %v8935_v9  ;;  %v2174_v25 = vrot.slane %v2167_v15, %v8935_v9  ;;  %v2182_v26 = vrot.slane %v6760_v17, %v8935_v9 }
 0x635   : > { %v2147_v27 = vcombine.low %v2123_v18, %v2139_v19  ;;  %v2148_v28 = vcombine.high %v2123_v18, %v2139_v19  ;;  %v2149_v43 = vcombine.low %v2130_v23, %v2146_v35  ;;  %v9208_v11 = vcombine.high %v2130_v23, %v2146_v35 }
 0x636   : > { %v2183_v29 = vcombine.low %v2158_v21, %v2166_v22  ;;  %v2199_v39 = vcombine.low %v2174_v25, %v2182_v26  ;;  %v2701_v61 = vpack.c.bf16 %v2693_v36, %v2693_v36  ;;  %v2694_v40 = vmul.f32 %v7733_v56, %v9136_v42 }
 0x637   : > { %v2709_v37 = vpack.c.bf16 %v2147_v27, %v2147_v27  ;;  %v2711_v10 = vpack.c.bf16 %v2148_v28, %v2148_v28  ;;  %v2184_v0 = vcombine.high %v2158_v21, %v2166_v22  ;;  %v2200_v1 = vcombine.high %v2174_v25, %v2182_v26 }
 0x638   : > { %v2191_v41 = vrot.slane %v2183_v29, %v8938_v16  ;;  %v2207_v57 = vrot.slane %v2199_v39, %v8938_v16  ;;  %v2702_v47 = vpack.c.bf16 %v2694_v40, %v2694_v40  ;;  %v2713_v52 = vpack.c.bf16 %v2149_v43, %v2149_v43  ;;  %v7582_v39 = vld [vmem:[%s8771_s13] sm:$0xff]   ;;  %v7584_v43 = vld [vmem:[%s8771_s13 + $0x10] sm:$0xff]  }
 0x639   : > { %v2722_v55 = vsel %vm2720_vm3, %v2709_v37, 0  ;;  %v2814_v62 = vsel %vm2720_vm3, %v2711_v10, 0  ;;  %v2198_v34 = vrot.slane %v2184_v0, %v8938_v16  ;;  %v2214_v51 = vrot.slane %v2200_v1, %v8938_v16 }
 0x63a   : > { %7156 = vmatpush3.bf16.msra.mxu0 %v2722_v55  ;;  %v2215_v58 = vcombine.low %v2191_v41, %v2207_v57  ;;  %v2216_v59 = vcombine.high %v2191_v41, %v2207_v57  ;;  %v2906_v15 = vsel %vm2720_vm3, %v2713_v52, 0  ;;  %v2715_v21 = vpack.c.bf16 %v9208_v11, %v9208_v11  ;;  %v7583_v41 = vld [vmem:[%s8771_s13 + $0x8] sm:$0xff]  }
 0x63b   : > { %7167 = vmatprep.subr.bf16.mxu0 %v8213_v6  ;;  %v2217_v7 = vcombine.low %v2198_v34, %v2214_v51  ;;  %v2218_v23 = vcombine.high %v2198_v34, %v2214_v51 }
 0x63c   : > { %v2710_v63 = vpack.c.bf16 %v2215_v58, %v2215_v58  ;;  %v2712_v38 = vpack.c.bf16 %v2216_v59, %v2216_v59  ;;  %v2998_v25 = vsel %vm2720_vm3, %v2715_v21, 0 }
 0x63d   : > { %7158 = vmatmul.mubr.msk.bf16.vlgmr.msra.gmra.mrb[20].mxu0 %vm2612_vm2, %v2701_v61  ;;  %v2714_v18 = vpack.c.bf16 %v2217_v7, %v2217_v7  ;;  %v2716_v27 = vpack.c.bf16 %v2218_v23, %v2218_v23  ;;  %v7586_v61 = vld [vmem:[%s8771_s13 + $0x20] sm:$0xff]  }
 0x63e   : > { %7168 = vmatpush3.bf16.msra.mxu0 %v2814_v62  ;;  %7169 = vmatprep.mubr.msk.bf16.mxu0 %vm8215_vm0, %v8213_v6  ;;  %v2768_v46 = vsel %vm2720_vm3, %v2710_v63, 0  ;;  %v2860_v42 = vsel %vm2720_vm3, %v2712_v38, 0  ;;  %v7587_v63 = vld [vmem:[%s8771_s13 + $0x28] sm:$0xff]  }
 0x63f   : > { %7179 = vmatprep.subr.bf16.mxu0 %v8213_v6  ;;  %7162 = vmatpush3.bf16.msra.mxu1 %v2768_v46  ;;  %v2952_v22 = vsel %vm2720_vm3, %v2714_v18, 0 }
 0x640   : > { %7173 = vmatprep.subr.bf16.mxu1 %v8213_v6 }
 0x642   : > { %7164 = vmatmul.mubr.msk.bf16.vlgmr.msra.gmra.mrb[20].mxu1 %vm2612_vm2, %v2702_v47 }
 0x643   : > { %7174 = vmatpush3.bf16.msra.mxu1 %v2860_v42  ;;  %7175 = vmatprep.mubr.msk.bf16.mxu1 %vm8215_vm0, %v8213_v6 }
 0x644   : > { %7185 = vmatprep.subr.bf16.mxu1 %v8213_v6 }
 0x654   : > { %v2669_v48 = vpop.xlane.xlu0 %2668 }
 0x655   : > { %7734 = vrcp.f32 %v2669_v48 }
 0x658   : > { %v2675_v30 = vpop.xlane.xlu0 %2674 }
 0x659   : > { %7736 = vrcp.f32 %v2675_v30  ;;  %v7588_v30 = vld [vmem:[%s8771_s13 + $0x30] sm:$0xff]  }
 0x65a   : > { %v2672_v31 = vpop.xlane.xlu1 %2671 }
 0x65b   : > { %7738 = vrcp.f32 %v2672_v31 }
 0x65c   : > { %v2678_v33 = vpop.xlane.xlu0 %2677 }
 0x65d   : > { %7740 = vrcp.f32 %v2678_v33 }
 0x65f   : > { %v7735_v3 = vpop.eup %7734 }
 0x660   : > { %v2695_v5 = vmul.f32 %v7735_v3, %v9150_v53  ;;  %v2681_v45 = vpop.xlane.xlu0 %2680  ;;  %v7589_v3 = vld [vmem:[%s8771_s13 + $0x38] sm:$0xff]  }
 0x661   : > { %7742 = vrcp.f32 %v2681_v45 }
 0x662   : > { %v2703_v8 = vpack.c.bf16 %v2695_v5, %v2695_v5 }
 0x663   : > { %v7737_v12 = vpop.eup %7736 }
 0x664   : > { %7170 = vmatmul.mubr.msk.bf16.vlgmr.msra.gmra.mrb[24].mxu0 %vm2612_vm2, %v2703_v8  ;;  %v2697_v53 = vmul.f32 %v7737_v12, %v9156_v2 }
 0x665   : > { %v7739_v14 = vpop.eup %7738  ;;  %7180 = vmatpush3.bf16.msra.mxu0 %v2906_v15  ;;  %7181 = vmatprep.mubr.msk.bf16.mxu0 %vm8215_vm0, %v8213_v6 }
 0x666   : > { %v2696_v17 = vmul.f32 %v7739_v14, %v9152_v60  ;;  %7191 = vmatprep.subr.bf16.mxu0 %v8213_v6  ;;  %v2705_v60 = vpack.c.bf16 %v2697_v53, %v2697_v53 }
 0x667   : > { %v7741_v20 = vpop.eup %7740 }
 0x668   : > { %v2704_v19 = vpack.c.bf16 %v2696_v17, %v2696_v17  ;;  %v2698_v2 = vmul.f32 %v7741_v20, %v9162_v44  ;;  %v3044_v44 = vsel %vm2720_vm3, %v2716_v27, 0 }
 0x66a   : > { %7176 = vmatmul.mubr.msk.bf16.vlgmr.msra.gmra.mrb[24].mxu1 %vm2612_vm2, %v2704_v19  ;;  %v2706_v29 = vpack.c.bf16 %v2698_v2, %v2698_v2 }
 0x66b   : > { %7186 = vmatpush3.bf16.msra.mxu1 %v2952_v22  ;;  %7187 = vmatprep.mubr.msk.bf16.mxu1 %vm8215_vm0, %v8213_v6  ;;  %v7743_v24 = vpop.eup %7742 }
 0x66c   : > { %7197 = vmatprep.subr.bf16.mxu1 %v8213_v6  ;;  %7182 = vmatmul.mubr.msk.bf16.vlgmr.msra.gmra.mrb[28].mxu0 %vm2612_vm2, %v2705_v60  ;;  %v2699_v28 = vmul.f32 %v7743_v24, %v9166_v54  ;;  %v7590_v60 = vld [vmem:[%s8786_s22] ss:$8 sps:$4 sm:$0xff]   ;;  %v7592_v24 = vld [vmem:[%s8786_s22 + $0x4] ss:$8 sps:$4 sm:$0xff]  }
 0x66d   : > { %7192 = vmatpush3.bf16.msra.mxu0 %v2998_v25  ;;  %7193 = vmatprep.mubr.msk.bf16.mxu0 %vm8215_vm0, %v8213_v6 }
 0x66e   : > { %v2684_v26 = vpop.xlane.xlu1 %2683  ;;  %7203 = vmatprep.subr.bf16.mxu0 %v8213_v6  ;;  %v2707_v35 = vpack.c.bf16 %v2699_v28, %v2699_v28 }
 0x66f   : > { %7744 = vrcp.f32 %v2684_v26 }
 0x672   : > { %7188 = vmatmul.mubr.msk.bf16.vlgmr.msra.gmra.mrb[28].mxu1 %vm2612_vm2, %v2706_v29 }
 0x673   : > { %7198 = vmatpush3.bf16.msra.mxu1 %v3044_v44  ;;  %7199 = vmatprep.mubr.msk.bf16.mxu1 %vm8215_vm0, %v8213_v6 }
 0x674   : > { %7211 = vmatprep.subr.bf16.mxu1 %v8213_v6  ;;  %7194 = vmatmul.mubr.msk.bf16.vlgmr.msra.gmra.mrb[32].mxu0 %vm2612_vm2, %v2707_v35 }
 0x675   : > { %7207 = vmatprep.mubr.msk.bf16.mxu0 %vm8215_vm0, %v8213_v6  ;;  %7204 = vmatpush3.bf16.msra.mxu0 %v7582_v39 }
 0x676   : > { %7205 = vmatprep.subr.bf16.mxu0 %v8213_v6 }
 0x679   : > { %v7745_v54 = vpop.eup %7744  ;;  %7206 = vmatpush3.bf16.msra.mxu0 %v7583_v41 }
 0x67a   : > { %v2700_v36 = vmul.f32 %v7745_v54, %v9170_v13  ;;  %7219 = vmatprep.subr.bf16.mxu0 %v8213_v6  ;;  %v7585_v13 = vld [vmem:[%s8771_s13 + $0x18] sm:$0xff]   ;;  %s9969_s13 = scalar_lea.vmem [#allocation11], %s8761_s19 }
 0x67c   : > { %v2708_v37 = vpack.c.bf16 %v2700_v36, %v2700_v36 }
 0x67e   : > { %7200 = vmatmul.mubr.msk.bf16.vlgmr.msra.gmra.mrb[32].mxu1 %vm2612_vm2, %v2708_v37 }
 0x67f   : > { %7215 = vmatprep.mubr.msk.bf16.mxu1 %vm8215_vm0, %v8213_v6  ;;  %7212 = vmatpush3.bf16.msra.mxu1 %v7584_v43 }
 0x680   : > { %7213 = vmatprep.subr.bf16.mxu1 %v8213_v6 }
 0x683   : > { %7214 = vmatpush3.bf16.msra.mxu1 %v7585_v13 }
 0x684   : > { %7227 = vmatprep.subr.bf16.mxu1 %v8213_v6 }
 0x710   : > { %v2758_v11 = vpop.f32.mrb[20].mxu0 }
 0x711   : > { %v7159_v55 = vpop.f32.mrb[21].mxu0 }
 0x712   : > { %v2761_v10 = vpop.f32.mrb[22].mxu0 }
 0x713   : > { %v7160_v57 = vpop.f32.mrb[23].mxu0  ;;  %v6789_v10 = vld [vmem:[%s9968_s21] ss:$0 sm:$0xff] }
 0x715   : > { %v2804_v56 = vpop.f32.mrb[20].mxu1 }
 0x716   : > { %v3086_v58 = vpack.c.bf16 %v2804_v56, %v2758_v11  ;;  %v7165_v59 = vpop.f32.mrb[21].mxu1 }
 0x717   : > { %v2807_v40 = vpop.f32.mrb[22].mxu1 }
 0x718   : > { %v7166_v62 = vpop.f32.mrb[23].mxu1  ;;  %7208 = vmatmul.mubr.msk.bf16.vlgmr.msra.gmra.mrb[36].mxu0 %vm2235_vm1, %v3086_v58 }
 0x719   : > { %7220 = vmatpush3.bf16.msra.mxu0 %v7586_v61  ;;  %7223 = vmatprep.mubr.msk.bf16.mxu0 %vm8215_vm0, %v8213_v6 }
 0x71a   : > { %7221 = vmatprep.subr.bf16.mxu0 %v8213_v6 }
 0x71d   : > { %7222 = vmatpush3.bf16.msra.mxu0 %v7587_v63 }
 0x71e   : > { %7235 = vmatprep.subr.bf16.mxu0 %v8213_v6 }
 0x737   : > { %v2850_v46 = vpop.f32.mrb[24].mxu0 }
 0x738   : > { %v7171_v38 = vpop.f32.mrb[25].mxu0 }
 0x739   : > { %v2853_v47 = vpop.f32.mrb[26].mxu0  ;;  %v7593_v38 = vld [vmem:[%s8786_s22 + $0x10] ss:$8 sps:$4 sm:$0xff]  }
 0x73a   : > { %v7172_v42 = vpop.f32.mrb[27].mxu0  ;;  %v7595_v47 = vld [vmem:[%s8786_s22 + $0x14] ss:$8 sps:$4 sm:$0xff]  }
 0x73b   : > { %v7598_v42 = vld [vmem:[%s8786_s22 + $0x24] ss:$8 sps:$4 sm:$0xff]  }
 0x73d   : > { %v2896_v48 = vpop.f32.mrb[24].mxu1 }
 0x73e   : > { %v3087_v31 = vpack.c.bf16 %v2896_v48, %v2850_v46  ;;  %v7177_v0 = vpop.f32.mrb[25].mxu1  ;;  %v7596_v48 = vld [vmem:[%s8786_s22 + $0x20] ss:$8 sps:$4 sm:$0xff]  }
 0x73f   : > { %v2899_v1 = vpop.f32.mrb[26].mxu1  ;;  %v2942_v33 = vpop.f32.mrb[28].mxu0  ;;  %v7602_v0 = vld [vmem:[%s8786_s22 + $0x40] ss:$8 sps:$4 sm:$0xff]  }
 0x740   : > { %v7178_v34 = vpop.f32.mrb[27].mxu1  ;;  %7216 = vmatmul.mubr.msk.bf16.vlgmr.msra.gmra.mrb[36].mxu1 %vm2235_vm1, %v3087_v31  ;;  %v7183_v51 = vpop.f32.mrb[29].mxu0  ;;  %v7604_v31 = vld [vmem:[%s8786_s22 + $0x44] ss:$8 sps:$4 sm:$0xff]  }
 0x741   : > { %7228 = vmatpush3.bf16.msra.mxu1 %v7588_v30  ;;  %7231 = vmatprep.mubr.msk.bf16.mxu1 %vm8215_vm0, %v8213_v6  ;;  %v2945_v5 = vpop.f32.mrb[30].mxu0  ;;  %v7601_v30 = vld [vmem:[%s8786_s22 + $0x34] ss:$8 sps:$4 sm:$0xff]   ;;  %v7615_v1 = vld [vmem:[%s8779_s25 + $0x8] sm:$0xff]   ;;  %v7605_v34 = vld [vmem:[%s8786_s22 + $0x50] ss:$8 sps:$4 sm:$0xff]  }
 0x742   : > { %7229 = vmatprep.subr.bf16.mxu1 %v8213_v6  ;;  %v7184_v45 = vpop.f32.mrb[31].mxu0  ;;  %v7610_v51 = vld [vmem:[%s8786_s22 + $0x64] ss:$8 sps:$4 sm:$0xff]   ;;  %v7613_v5 = vld [vmem:[%s8786_s22 + $0x74] ss:$8 sps:$4 sm:$0xff]  }
 0x743   : > { %v7611_v45 = vld [vmem:[%s8786_s22 + $0x70] ss:$8 sps:$4 sm:$0xff]  }
 0x745   : > { %v2988_v52 = vpop.f32.mrb[28].mxu1  ;;  %7230 = vmatpush3.bf16.msra.mxu1 %v7589_v3  ;;  %v7608_v3 = vld [vmem:[%s8786_s22 + $0x60] ss:$8 sps:$4 sm:$0xff]  }
 0x746   : > { %v3088_v7 = vpack.c.bf16 %v2988_v52, %v2942_v33  ;;  %v7189_v8 = vpop.f32.mrb[29].mxu1  ;;  %3569 = vmatprep.subr.bf16.mxu1 %v7592_v24  ;;  %v7607_v33 = vld [vmem:[%s8786_s22 + $0x54] ss:$8 sps:$4 sm:$0xff]   ;;  %v3470_v52 = vld [vmem:[%s8808_s20] sm:$0xff] }
 0x747   : > { %v2991_v12 = vpop.f32.mrb[30].mxu1  ;;  %v3034_v14 = vpop.f32.mrb[32].mxu0  ;;  %v7620_v24 = vld [vmem:[%s8779_s25 + $0x30] sm:$0xff]  }
 0x748   : > { %v7190_v15 = vpop.f32.mrb[31].mxu1  ;;  %7224 = vmatmul.mubr.msk.bf16.vlgmr.msra.gmra.mrb[40].mxu0 %vm2235_vm1, %v3088_v7  ;;  %v7195_v17 = vpop.f32.mrb[33].mxu0  ;;  %v3471_v7 = vld [vmem:[%s8808_s20 + $0x8] sm:$0xff] }
 0x749   : > { %7251 = vmatprep.mubr.msk.bf16.mxu0 %vm8215_vm0, %v8213_v6  ;;  %v3037_v18 = vpop.f32.mrb[34].mxu0  ;;  %v3488_v8 = vpack.c.bf16 %v3471_v7, %v3470_v52 }
 0x74a   : > { %v7196_v53 = vpop.f32.mrb[35].mxu0 }
 0x751   : > { %v3080_v19 = vpop.f32.mrb[32].mxu1 }
 0x752   : > { %v3089_v20 = vpack.c.bf16 %v3080_v19, %v3034_v14  ;;  %v7201_v21 = vpop.f32.mrb[33].mxu1 }
 0x753   : > { %v3083_v22 = vpop.f32.mrb[34].mxu1  ;;  %v7616_v21 = vld [vmem:[%s8779_s25 + $0x10] sm:$0xff]  }
 0x754   : > { %v7202_v23 = vpop.f32.mrb[35].mxu1  ;;  %7232 = vmatmul.mubr.msk.bf16.vlgmr.msra.gmra.mrb[40].mxu1 %vm2235_vm1, %v3089_v20  ;;  %v7617_v22 = vld [vmem:[%s8779_s25 + $0x18] sm:$0xff]  }
 0x755   : > { %3601 = vmatprep.mubr.bf16.mxu1 %v8214_v32  ;;  %3570 = vmatpush1.bf16.msra.mxu1 %v7590_v60  ;;  %v7618_v23 = vld [vmem:[%s8779_s25 + $0x20] sm:$0xff]   ;;  %v7619_v60 = vld [vmem:[%s8779_s25 + $0x28] sm:$0xff]  }
 0x756   : > { %3571 = vmatprep.subr.bf16.mxu1 %v7595_v47 }
 0x759   : > { %3572 = vmatpush1.bf16.msra.mxu1 %v7593_v38 }
 0x75a   : > { %3573 = vmatprep.subr.bf16.mxu1 %v7598_v42 }
 0x75d   : > { %3574 = vmatpush1.bf16.msra.mxu1 %v7596_v48 }
 0x75e   : > { %3575 = vmatprep.subr.bf16.mxu1 %v7601_v30 }
 0x7eb   : > { %v3139_v2 = vpop.f32.mrb[36].mxu0 }
 0x7ec   : > { %v7209_v25 = vpop.f32.mrb[37].mxu0 }
 0x7ed   : > { %v3142_v26 = vpop.f32.mrb[38].mxu0 }
 0x7ee   : > { %v7210_v27 = vpop.f32.mrb[39].mxu0 }
 0x813   : > { %v3195_v28 = vpop.f32.mrb[36].mxu1 }
 0x814   : > { %v3314_v29 = vadd.f32 %v3195_v28, %v3139_v2  ;;  %v7217_v44 = vpop.f32.mrb[37].mxu1  ;;  %v7621_v2 = vld [vmem:[%s8779_s25 + $0x38] sm:$0xff]  }
 0x815   : > { %v3198_v35 = vpop.f32.mrb[38].mxu1 }
 0x816   : > { %v3317_v54 = vadd.f32 %v3198_v35, %v3142_v26  ;;  %v7218_v36 = vpop.f32.mrb[39].mxu1 }
 0x81b   : > { %v3251_v37 = vpop.f32.mrb[40].mxu0 }
 0x81c   : > { %v3315_v39 = vadd.f32 %v3314_v29, %v3251_v37  ;;  %v7225_v41 = vpop.f32.mrb[41].mxu0 }
 0x81d   : > { %v3254_v43 = vpop.f32.mrb[42].mxu0 }
 0x81e   : > { %v3318_v13 = vadd.f32 %v3317_v54, %v3254_v43  ;;  %v7226_v11 = vpop.f32.mrb[43].mxu0 }
 0x827   : > { %v3307_v55 = vpop.f32.mrb[40].mxu1 }
 0x828   : > { %v3316_v57 = vadd.f32 %v3315_v39, %v3307_v55  ;;  %v7233_v56 = vpop.f32.mrb[41].mxu1 }
 0x829   : > { %v3310_v61 = vpop.f32.mrb[42].mxu1 }
 0x82a   : > { %v3327_v58 = vadd.f32 %v6789_v10, %v3316_v57  ;;  %v3319_v59 = vadd.f32 %v3318_v13, %v3310_v61  ;;  %v7234_v40 = vpop.f32.mrb[43].mxu1  ;;  %v6790_v13 = vld [vmem:[%s9969_s13] ss:$0 sm:$0xff] }
 0x82c   : > { %v3328_v62 = vadd.f32 %v6789_v10, %v3319_v59  ;;  %v3329_v63 = vadd.f32 %v3327_v58, %v8901_v49  ;;  %v7599_v49 = vld [vmem:[%s8786_s22 + $0x30] ss:$8 sps:$4 sm:$0xff]  }
 0x82d   : > { %3576 = vmatpush1.bf16.msra.mxu1 %v7599_v49 }
 0x82e   : > { %3332 = vadd.xlane.f32.xlu0 %v3329_v63  ;;  %v3330_v46 = vadd.f32 %v3328_v62, %v8903_v50  ;;  %v7614_v50 = vld [vmem:[%s8779_s25] sm:$0xff]   ;;  %3577 = vmatprep.subr.bf16.mxu1 %v7604_v31  ;;  %s9970_s25 = sld [smem:[#allocation41_spill]] }
 0x82f   : > { %7236 = vmatpush3.bf16.msra.mxu0 %v7614_v50 }
 0x830   : > { %3334 = vadd.xlane.f32.xlu1 %v3330_v46  ;;  %7237 = vmatprep.subr.bf16.mxu0 %v8213_v6 }
 0x831   : > { %3578 = vmatpush1.bf16.msra.mxu1 %v7602_v0 }
 0x832   : > { %3579 = vmatprep.subr.bf16.mxu1 %v7607_v33 }
 0x833   : > { %7238 = vmatpush3.bf16.msra.mxu0 %v7615_v1 }
 0x834   : > { %7239 = vmatprep.subr.bf16.mxu0 %v8213_v6 }
 0x835   : > { %3580 = vmatpush1.bf16.msra.mxu1 %v7605_v34 }
 0x836   : > { %3581 = vmatprep.subr.bf16.mxu1 %v7610_v51 }
 0x837   : > { %7240 = vmatpush3.bf16.msra.mxu0 %v7616_v21 }
 0x838   : > { %7241 = vmatprep.subr.bf16.mxu0 %v8213_v6 }
 0x839   : > { %3582 = vmatpush1.bf16.msra.mxu1 %v7608_v3 }
 0x83a   : > { %3583 = vmatprep.subr.bf16.mxu1 %v7613_v5 }
 0x83b   : > { %7242 = vmatpush3.bf16.msra.mxu0 %v7617_v22 }
 0x83c   : > { %7243 = vmatprep.subr.bf16.mxu0 %v8213_v6 }
 0x83d   : > { %3584 = vmatpush1.bf16.msra.mxu1 %v7611_v45 }
 0x83e   : > { %7261 = vmatprep.subr.bf16.mxu1 %v8213_v6 }
 0x83f   : > { %7244 = vmatpush3.bf16.msra.mxu0 %v7618_v23 }
 0x840   : > { %3602 = vmatmul.mubr.bf16.vlgmr.msra.gmra.mrb[44].mxu1 %v3488_v8  ;;  %7245 = vmatprep.subr.bf16.mxu0 %v8213_v6 }
 0x841   : > { %7263 = vmatprep.mubr.msk.bf16.mxu1 %vm8215_vm0, %v8213_v6 }
 0x843   : > { %7246 = vmatpush3.bf16.msra.mxu0 %v7619_v60 }
 0x844   : > { %7247 = vmatprep.subr.bf16.mxu0 %v8213_v6 }
 0x847   : > { %7248 = vmatpush3.bf16.msra.mxu0 %v7620_v24 }
 0x848   : > { %7249 = vmatprep.subr.bf16.mxu0 %v8213_v6 }
 0x84b   : > { %7250 = vmatpush3.bf16.msra.mxu0 %v7621_v2 }
 0x84c   : > { %7255 = vmatprep.subr.bf16.mxu0 %v8213_v6 }
 0x8bb   : > { %v3333_v12 = vpop.xlane.xlu0 %3332 }
 0x8bc   : > { %v3336_v14 = vmul.f32 0.0078125, %v3333_v12 }
 0x8bd   : > { %v3335_v15 = vpop.xlane.xlu1 %3334 }
 0x8be   : > { %v3338_v17 = vsub.f32 %v3329_v63, %v3336_v14  ;;  %v3337_v18 = vmul.f32 0.0078125, %v3335_v15 }
 0x8c0   : > { %v3339_v53 = vsub.f32 %v3330_v46, %v3337_v18  ;;  %v3340_v19 = vmul.f32 %v3338_v17, %v3338_v17 }
 0x8c2   : > { %3342 = vadd.xlane.f32.xlu0 %v3340_v19  ;;  %v3341_v20 = vmul.f32 %v3339_v53, %v3339_v53 }
 0x8c4   : > { %3344 = vadd.xlane.f32.xlu1 %v3341_v20 }
 0x913   : > { %v3603_v25 = vpop.f32.mrb[44].mxu1 }
 0x914   : > { %v9329_v26 = vpop.f32.mrb[45].mxu1  ;;  %3922 = vrot.lane.b32.xlu0 %v3603_v25, %s8217_s16 }
 0x915   : > { %v3607_v27 = vpop.f32.mrb[46].mxu1 }
 0x916   : > { %3924 = vrot.lane.b32.xlu1 %v3607_v27, %s8217_s16  ;;  %v9333_v28 = vpop.f32.mrb[47].mxu1 }
 0x918   : > { %3934 = vrot.lane.b32.xlu0 %v3603_v25, %s8218_s23 }
 0x91a   : > { %3928 = vrot.lane.b32.xlu1 %v3603_v25, %s8216_s29 }
 0x91e   : > { %3930 = vrot.lane.b32.xlu1 %v3607_v27, %s8216_s29 }
 0x922   : > { %3936 = vrot.lane.b32.xlu1 %v3607_v27, %s8218_s23 }
 0x94f   : > { %v3343_v29 = vpop.xlane.xlu0 %3342 }
 0x950   : > { %v3346_v44 = vmul.f32 0.0078125, %v3343_v29 }
 0x951   : > { %v3345_v35 = vpop.xlane.xlu1 %3344 }
 0x952   : > { %v3348_v54 = vadd.f32 1e-05, %v3346_v44  ;;  %v3347_v36 = vmul.f32 0.0078125, %v3345_v35 }
 0x954   : > { %7746 = vrsqrt.f32 %v3348_v54  ;;  %v3349_v37 = vadd.f32 1e-05, %v3347_v36 }
 0x956   : > { %7748 = vrsqrt.f32 %v3349_v37 }
 0x95e   : > { %v7747_v39 = vpop.eup %7746 }
 0x95f   : > { %v3352_v41 = vmul.f32 %v7747_v39, %v3338_v17 }
 0x960   : > { %v7749_v43 = vpop.eup %7748 }
 0x961   : > { %v3353_v11 = vmul.f32 %v7749_v43, %v3339_v53  ;;  %v9341_v55 = vmul.f32 %v6790_v13, %v3352_v41 }
 0x963   : > { %v9343_v10 = vmul.f32 %v6790_v13, %v3353_v11 }
 0x965   : > { %v3378_v57 = vpack.c.bf16 %v9343_v10, %v9341_v55 }
 0x967   : > { %7252 = vmatmul.mubr.bf16.vlgmr.msra.gmra.mrb[44].mxu0 %v3378_v57 }
 0x968   : > { %7257 = vmatprep.mubr.msk.bf16.mxu0 %vm8215_vm0, %v8213_v6 }
 0x986   : > { %v3923_v56 = vpop.permute.xlu0 %3922 }
 0x988   : > { %v3925_v61 = vpop.permute.xlu1 %3924 }
 0x98a   : > { %v3935_v58 = vpop.permute.xlu0 %3934 }
 0x98b   : > { %v3956_v40 = vcombine.low %v3923_v56, %v3935_v58  ;;  %v3957_v62 = vcombine.high %v3923_v56, %v3935_v58 }
 0x98c   : > { %v3929_v59 = vpop.permute.xlu1 %3928 }
 0x98d   : > { %v3940_v63 = vcombine.low %v3603_v25, %v3929_v59  ;;  %v3941_v46 = vcombine.high %v3603_v25, %v3929_v59  ;;  %v3964_v48 = vrot.slane %v3956_v40, %v8935_v9  ;;  %v3971_v30 = vrot.slane %v3957_v62, %v8935_v9 }
 0x98f   : > { %v3948_v38 = vrot.slane %v3940_v63, %v8935_v9  ;;  %v3955_v47 = vrot.slane %v3941_v46, %v8935_v9 }
 0x990   : > { %v3931_v42 = vpop.permute.xlu1 %3930 }
 0x991   : > { %v4008_v49 = vcombine.low %v3607_v27, %v3931_v42  ;;  %v4009_v31 = vcombine.high %v3607_v27, %v3931_v42  ;;  %v3972_v50 = vcombine.low %v3948_v38, %v3964_v48  ;;  %v3973_v0 = vcombine.high %v3948_v38, %v3964_v48 }
 0x992   : > { %v3988_v1 = vcombine.low %v3955_v47, %v3971_v30  ;;  %v3989_v33 = vcombine.high %v3955_v47, %v3971_v30 }
 0x993   : > { %v4016_v51 = vrot.slane %v4008_v49, %v8935_v9  ;;  %v4023_v3 = vrot.slane %v4009_v31, %v8935_v9  ;;  %v3980_v8 = vrot.slane %v3972_v50, %v8938_v16  ;;  %v3987_v12 = vrot.slane %v3973_v0, %v8938_v16 }
 0x994   : > { %v3937_v34 = vpop.permute.xlu1 %3936  ;;  %v3996_v14 = vrot.slane %v3988_v1, %v8938_v16  ;;  %v4003_v15 = vrot.slane %v3989_v33, %v8938_v16 }
 0x995   : > { %v4024_v5 = vcombine.low %v3925_v61, %v3937_v34  ;;  %v4025_v45 = vcombine.high %v3925_v61, %v3937_v34  ;;  %v4076_v60 = vcombine.low %v3980_v8, %v3987_v12  ;;  %v6819_v24 = vcombine.high %v3980_v8, %v3987_v12 }
 0x996   : > { %v4092_v2 = vcombine.low %v3996_v14, %v4003_v15  ;;  %v6820_v25 = vcombine.high %v3996_v14, %v4003_v15 }
 0x997   : > { %v4032_v52 = vrot.slane %v4024_v5, %v8935_v9  ;;  %v4039_v7 = vrot.slane %v4025_v45, %v8935_v9  ;;  %v4083_v54 = vrot.slane %v4076_v60, %v8935_v9  ;;  %v4091_v36 = vrot.slane %v6819_v24, %v8935_v9 }
 0x998   : > { %v4099_v37 = vrot.slane %v4092_v2, %v8935_v9  ;;  %v4107_v39 = vrot.slane %v6820_v25, %v8935_v9 }
 0x999   : > { %v4040_v17 = vcombine.low %v4016_v51, %v4032_v52  ;;  %v4041_v18 = vcombine.high %v4016_v51, %v4032_v52  ;;  %v4056_v53 = vcombine.low %v4023_v3, %v4039_v7  ;;  %v4057_v19 = vcombine.high %v4023_v3, %v4039_v7 }
 0x99a   : > { %v4108_v57 = vcombine.low %v4083_v54, %v4091_v36  ;;  %v4124_v56 = vcombine.low %v4099_v37, %v4107_v39  ;;  %v4109_v49 = vcombine.high %v4083_v54, %v4091_v36  ;;  %v4125_v31 = vcombine.high %v4099_v37, %v4107_v39 }
 0x99b   : > { %v4048_v20 = vrot.slane %v4040_v17, %v8938_v16  ;;  %v4055_v21 = vrot.slane %v4041_v18, %v8938_v16  ;;  %v4064_v22 = vrot.slane %v4056_v53, %v8938_v16  ;;  %v4071_v23 = vrot.slane %v4057_v19, %v8938_v16 }
 0x99c   : > { %v4116_v59 = vrot.slane %v4108_v57, %v8938_v16  ;;  %v4132_v40 = vrot.slane %v4124_v56, %v8938_v16  ;;  %v4123_v1 = vrot.slane %v4109_v49, %v8938_v16  ;;  %v4139_v33 = vrot.slane %v4125_v31, %v8938_v16 }
 0x99d   : > { %v4144_v27 = vcombine.low %v4048_v20, %v4055_v21  ;;  %v6821_v29 = vcombine.high %v4048_v20, %v4055_v21  ;;  %v4160_v44 = vcombine.low %v4064_v22, %v4071_v23  ;;  %v6822_v35 = vcombine.high %v4064_v22, %v4071_v23 }
 0x99e   : > { %v4140_v46 = vcombine.low %v4116_v59, %v4132_v40  ;;  %v9385_v3 = vcombine.high %v4116_v59, %v4132_v40  ;;  %v9389_v45 = vcombine.low %v4123_v1, %v4139_v33  ;;  %v9393_v7 = vcombine.high %v4123_v1, %v4139_v33 }
 0x99f   : > { %v4151_v41 = vrot.slane %v4144_v27, %v8935_v9  ;;  %v4159_v43 = vrot.slane %v6821_v29, %v8935_v9  ;;  %v4167_v13 = vrot.slane %v4160_v44, %v8935_v9  ;;  %v4175_v11 = vrot.slane %v6822_v35, %v8935_v9 }
 0x9a0   : > { %v4512_v47 = vpack.c.bf16 %v4140_v46, %v4140_v46 }
 0x9a1   : > { %v4176_v61 = vcombine.low %v4151_v41, %v4159_v43  ;;  %v4192_v58 = vcombine.low %v4167_v13, %v4175_v11  ;;  %v4177_v50 = vcombine.high %v4151_v41, %v4159_v43  ;;  %v4193_v0 = vcombine.high %v4167_v13, %v4175_v11 }
 0x9a2   : > { %v4524_v48 = vsel %vm2235_vm1, %v4512_v47, 0 }
 0x9a3   : > { %v4184_v62 = vrot.slane %v4176_v61, %v8938_v16  ;;  %v4200_v63 = vrot.slane %v4192_v58, %v8938_v16  ;;  %7256 = vmatpush3.bf16.xpose.msra.mxu0 %v4524_v48  ;;  %v4191_v34 = vrot.slane %v4177_v50, %v8938_v16  ;;  %v4207_v51 = vrot.slane %v4193_v0, %v8938_v16 }
 0x9a4   : > { %7267 = vmatprep.subr.bf16.mxu0 %v8213_v6 }
 0x9a5   : > { %v4208_v38 = vcombine.low %v4184_v62, %v4200_v63  ;;  %v9387_v5 = vcombine.high %v4184_v62, %v4200_v63  ;;  %v9391_v52 = vcombine.low %v4191_v34, %v4207_v51  ;;  %v9395_v8 = vcombine.high %v4191_v34, %v4207_v51 }
 0x9a7   : > { %v4513_v42 = vpack.c.bf16 %v4208_v38, %v4208_v38 }
 0x9a9   : > { %v4570_v30 = vsel %vm2235_vm1, %v4513_v42, 0 }
 0x9aa   : > { %7262 = vmatpush3.bf16.xpose.msra.mxu1 %v4570_v30 }
 0x9ab   : > { %7273 = vmatprep.subr.bf16.mxu1 %v8213_v6 }
 0xa3a   : > { %v3461_v12 = vpop.f32.mrb[44].mxu0 }
 0xa3b   : > { %v3468_v14 = vmul.f32 0.17677669, %v3461_v12  ;;  %v7253_v15 = vpop.f32.mrb[45].mxu0 }
 0xa3c   : > { %v3464_v17 = vpop.f32.mrb[46].mxu0 }
 0xa3d   : > { %v3469_v18 = vmul.f32 0.17677669, %v3464_v17  ;;  %3630 = vrot.lane.b32.xlu0 %v3468_v14, %s8217_s16  ;;  %v7254_v53 = vpop.f32.mrb[47].mxu0 }
 0xa3f   : > { %3632 = vrot.lane.b32.xlu1 %v3469_v18, %s8217_s16 }
 0xa41   : > { %3636 = vrot.lane.b32.xlu0 %v3468_v14, %s8216_s29 }
 0xa43   : > { %3638 = vrot.lane.b32.xlu1 %v3469_v18, %s8216_s29 }
 0xa45   : > { %3642 = vrot.lane.b32.xlu0 %v3468_v14, %s8218_s23 }
 0xa47   : > { %3644 = vrot.lane.b32.xlu1 %v3469_v18, %s8218_s23 }
 0xaaf   : > { %v3631_v19 = vpop.permute.xlu0 %3630 }
 0xab1   : > { %v3633_v20 = vpop.permute.xlu1 %3632 }
 0xab3   : > { %v3637_v21 = vpop.permute.xlu0 %3636 }
 0xab4   : > { %v3648_v22 = vcombine.low %v3468_v14, %v3637_v21  ;;  %v3649_v23 = vcombine.high %v3468_v14, %v3637_v21 }
 0xab5   : > { %v3639_v60 = vpop.permute.xlu1 %3638 }
 0xab6   : > { %v3656_v27 = vrot.slane %v3648_v22, %v8935_v9  ;;  %v3663_v29 = vrot.slane %v3649_v23, %v8935_v9  ;;  %v3716_v44 = vcombine.low %v3469_v18, %v3639_v60  ;;  %v3717_v35 = vcombine.high %v3469_v18, %v3639_v60 }
 0xab7   : > { %v3643_v24 = vpop.permute.xlu0 %3642 }
 0xab8   : > { %v3664_v2 = vcombine.low %v3631_v19, %v3643_v24  ;;  %v3665_v25 = vcombine.high %v3631_v19, %v3643_v24  ;;  %v3724_v56 = vrot.slane %v3716_v44, %v8935_v9  ;;  %v3731_v61 = vrot.slane %v3717_v35, %v8935_v9 }
 0xab9   : > { %v3645_v54 = vpop.permute.xlu1 %3644  ;;  %v4514_v35 = vpack.c.bf16 %v9385_v3, %v9385_v3 }
 0xaba   : > { %v3672_v36 = vrot.slane %v3664_v2, %v8935_v9  ;;  %v3679_v37 = vrot.slane %v3665_v25, %v8935_v9  ;;  %v3732_v39 = vcombine.low %v3633_v20, %v3645_v54  ;;  %v3733_v41 = vcombine.high %v3633_v20, %v3645_v54 }
 0xabc   : > { %v3680_v43 = vcombine.low %v3656_v27, %v3672_v36  ;;  %v3681_v13 = vcombine.high %v3656_v27, %v3672_v36  ;;  %v3696_v11 = vcombine.low %v3663_v29, %v3679_v37  ;;  %v3697_v57 = vcombine.high %v3663_v29, %v3679_v37 }
 0xabd   : > { %v3740_v58 = vrot.slane %v3732_v39, %v8935_v9  ;;  %v3747_v59 = vrot.slane %v3733_v41, %v8935_v9  ;;  %v4515_v41 = vpack.c.bf16 %v9387_v5, %v9387_v5  ;;  %v4516_v5 = vpack.c.bf16 %v9389_v45, %v9389_v45 }
 0xabe   : > { %v3688_v40 = vrot.slane %v3680_v43, %v8938_v16  ;;  %v3695_v62 = vrot.slane %v3681_v13, %v8938_v16  ;;  %v3704_v63 = vrot.slane %v3696_v11, %v8938_v16  ;;  %v3711_v46 = vrot.slane %v3697_v57, %v8938_v16 }
 0xabf   : > { %v3748_v38 = vcombine.low %v3724_v56, %v3740_v58  ;;  %v3749_v47 = vcombine.high %v3724_v56, %v3740_v58  ;;  %v3764_v42 = vcombine.low %v3731_v61, %v3747_v59  ;;  %v3765_v48 = vcombine.high %v3731_v61, %v3747_v59 }
 0xac0   : > { %v3784_v30 = vcombine.low %v3688_v40, %v3695_v62  ;;  %v6815_v49 = vcombine.high %v3688_v40, %v3695_v62  ;;  %v3800_v31 = vcombine.low %v3704_v63, %v3711_v46  ;;  %v6816_v50 = vcombine.high %v3704_v63, %v3711_v46 }
 0xac1   : > { %v3756_v0 = vrot.slane %v3748_v38, %v8938_v16  ;;  %v3763_v1 = vrot.slane %v3749_v47, %v8938_v16  ;;  %v3772_v33 = vrot.slane %v3764_v42, %v8938_v16  ;;  %v3779_v34 = vrot.slane %v3765_v48, %v8938_v16 }
 0xac2   : > { %v3791_v51 = vrot.slane %v3784_v30, %v8935_v9  ;;  %v3799_v12 = vrot.slane %v6815_v49, %v8935_v9  ;;  %v3807_v14 = vrot.slane %v3800_v31, %v8935_v9  ;;  %v3815_v15 = vrot.slane %v6816_v50, %v8935_v9 }
 0xac3   : > { %v3852_v17 = vcombine.low %v3756_v0, %v3763_v1  ;;  %v6817_v18 = vcombine.high %v3756_v0, %v3763_v1  ;;  %v3868_v53 = vcombine.low %v3772_v33, %v3779_v34  ;;  %v6818_v19 = vcombine.high %v3772_v33, %v3779_v34 }
 0xac4   : > { %v3816_v20 = vcombine.low %v3791_v51, %v3799_v12  ;;  %v3832_v21 = vcombine.low %v3807_v14, %v3815_v15  ;;  %v4616_v43 = vsel %vm2235_vm1, %v4514_v35, 0  ;;  %v3817_v11 = vcombine.high %v3791_v51, %v3799_v12 }
 0xac5   : > { %v3859_v22 = vrot.slane %v3852_v17, %v8935_v9  ;;  %v3867_v23 = vrot.slane %v6817_v18, %v8935_v9  ;;  %v3875_v60 = vrot.slane %v3868_v53, %v8935_v9  ;;  %v3883_v24 = vrot.slane %v6818_v19, %v8935_v9 }
 0xac6   : > { %v3824_v2 = vrot.slane %v3816_v20, %v8938_v16  ;;  %v3840_v25 = vrot.slane %v3832_v21, %v8938_v16  ;;  %v3833_v3 = vcombine.high %v3807_v14, %v3815_v15  ;;  %v4662_v56 = vsel %vm2235_vm1, %v4515_v41, 0 }
 0xac7   : > { %v3884_v27 = vcombine.low %v3859_v22, %v3867_v23  ;;  %v3900_v29 = vcombine.low %v3875_v60, %v3883_v24  ;;  %v3885_v61 = vcombine.high %v3859_v22, %v3867_v23  ;;  %v3901_v58 = vcombine.high %v3875_v60, %v3883_v24 }
 0xac8   : > { %v3848_v44 = vcombine.low %v3824_v2, %v3840_v25  ;;  %v3849_v57 = vcombine.high %v3824_v2, %v3840_v25  ;;  %v3831_v62 = vrot.slane %v3817_v11, %v8938_v16  ;;  %v3847_v63 = vrot.slane %v3833_v3, %v8938_v16 }
 0xac9   : > { %v3892_v54 = vrot.slane %v3884_v27, %v8938_v16  ;;  %v3908_v36 = vrot.slane %v3900_v29, %v8938_v16  ;;  %v4517_v46 = vpack.c.bf16 %v9391_v52, %v9391_v52  ;;  %v4708_v45 = vsel %vm2235_vm1, %v4516_v5, 0 }
 0xaca   : > { %v4504_v37 = vpack.c.bf16 %v3848_v44, %v3848_v44  ;;  %v4506_v40 = vpack.c.bf16 %v3849_v57, %v3849_v57  ;;  %v3899_v47 = vrot.slane %v3885_v61, %v8938_v16  ;;  %v3915_v42 = vrot.slane %v3901_v58, %v8938_v16 }
 0xacb   : > { %v3916_v39 = vcombine.low %v3892_v54, %v3908_v36  ;;  %v3917_v59 = vcombine.high %v3892_v54, %v3908_v36  ;;  %v3850_v48 = vcombine.low %v3831_v62, %v3847_v63  ;;  %v4754_v52 = vsel %vm2235_vm1, %v4517_v46, 0 }
 0xacc   : > { %7258 = vmatmul.mubr.msk.bf16.vlgmr.msra.gmra.mrb[48].mxu0 %vm2235_vm1, %v4504_v37  ;;  %v4518_v30 = vpack.c.bf16 %v9393_v7, %v9393_v7  ;;  %v3918_v49 = vcombine.low %v3899_v47, %v3915_v42  ;;  %v4519_v50 = vpack.c.bf16 %v9395_v8, %v9395_v8  ;;  %v3851_v7 = vcombine.high %v3831_v62, %v3847_v63 }
 0xacd   : > { %7268 = vmatpush3.bf16.xpose.msra.mxu0 %v4616_v43  ;;  %v4505_v13 = vpack.c.bf16 %v3916_v39, %v3916_v39  ;;  %7269 = vmatprep.mubr.msk.bf16.mxu0 %vm8215_vm0, %v8213_v6  ;;  %v4507_v38 = vpack.c.bf16 %v3917_v59, %v3917_v59  ;;  %v4508_v31 = vpack.c.bf16 %v3850_v48, %v3850_v48 }
 0xace   : > { %7279 = vmatprep.subr.bf16.mxu0 %v8213_v6  ;;  %v4800_v0 = vsel %vm2235_vm1, %v4518_v30, 0  ;;  %v4509_v1 = vpack.c.bf16 %v3918_v49, %v3918_v49  ;;  %v4846_v33 = vsel %vm2235_vm1, %v4519_v50, 0  ;;  %v3919_v8 = vcombine.high %v3899_v47, %v3915_v42 }
 0xacf   : > { %7264 = vmatmul.mubr.msk.bf16.vlgmr.msra.gmra.mrb[48].mxu1 %vm2235_vm1, %v4505_v13  ;;  %v4510_v34 = vpack.c.bf16 %v3851_v7, %v3851_v7 }
 0xad0   : > { %7274 = vmatpush3.bf16.xpose.msra.mxu1 %v4662_v56  ;;  %7275 = vmatprep.mubr.msk.bf16.mxu1 %vm8215_vm0, %v8213_v6  ;;  %v4511_v51 = vpack.c.bf16 %v3919_v8, %v3919_v8 }
 0xad1   : > { %7285 = vmatprep.subr.bf16.mxu1 %v8213_v6 }
 0xad4   : > { %7270 = vmatmul.mubr.msk.bf16.vlgmr.msra.gmra.mrb[52].mxu0 %vm2235_vm1, %v4506_v40 }
 0xad5   : > { %7280 = vmatpush3.bf16.xpose.msra.mxu0 %v4708_v45  ;;  %7281 = vmatprep.mubr.msk.bf16.mxu0 %vm8215_vm0, %v8213_v6 }
 0xad6   : > { %7291 = vmatprep.subr.bf16.mxu0 %v8213_v6 }
 0xad7   : > { %7276 = vmatmul.mubr.msk.bf16.vlgmr.msra.gmra.mrb[52].mxu1 %vm2235_vm1, %v4507_v38 }
 0xad8   : > { %7286 = vmatpush3.bf16.xpose.msra.mxu1 %v4754_v52  ;;  %7287 = vmatprep.mubr.msk.bf16.mxu1 %vm8215_vm0, %v8213_v6 }
 0xad9   : > { %7297 = vmatprep.subr.bf16.mxu1 %v8213_v6 }
 0xadc   : > { %7282 = vmatmul.mubr.msk.bf16.vlgmr.msra.gmra.mrb[56].mxu0 %vm2235_vm1, %v4508_v31 }
 0xadd   : > { %7292 = vmatpush3.bf16.xpose.msra.mxu0 %v4800_v0  ;;  %7293 = vmatprep.mubr.msk.bf16.mxu0 %vm8215_vm0, %v8213_v6 }
 0xade   : > { %7303 = vmatprep.subr.bf16.mxu0 %v8213_v6 }
 0xadf   : > { %7288 = vmatmul.mubr.msk.bf16.vlgmr.msra.gmra.mrb[56].mxu1 %vm2235_vm1, %v4509_v1 }
 0xae0   : > { %7298 = vmatpush3.bf16.xpose.msra.mxu1 %v4846_v33  ;;  %7299 = vmatprep.mubr.msk.bf16.mxu1 %vm8215_vm0, %v8213_v6 }
 0xae1   : > { %7309 = vmatprep.subr.bf16.mxu1 %v8213_v6 }
 0xae4   : > { %7294 = vmatmul.mubr.msk.bf16.vlgmr.msra.gmra.mrb[60].mxu0 %vm2235_vm1, %v4510_v34 }
 0xae5   : > { %7305 = vmatprep.mubr.msk.bf16.mxu0 %vm8215_vm0, %v8213_v6 }
 0xae7   : > { %7300 = vmatmul.mubr.msk.bf16.vlgmr.msra.gmra.mrb[60].mxu1 %vm2235_vm1, %v4511_v51 }
 0xae8   : > { %7311 = vmatprep.mubr.msk.bf16.mxu1 %vm8215_vm0, %v8213_v6 }
 0xb9f   : > { %v4560_v12 = vpop.f32.mrb[48].mxu0 }
 0xba0   : > { %v7259_v14 = vpop.f32.mrb[49].mxu0  ;;  %v4888_v15 = vsel %vm2612_vm2, %v4560_v12, -inf }
 0xba1   : > { %4889 = vmax.xlane.f32.xlu0 %v4888_v15  ;;  %v4563_v17 = vpop.f32.mrb[50].mxu0 }
 0xba2   : > { %v4606_v18 = vpop.f32.mrb[48].mxu1  ;;  %v7260_v53 = vpop.f32.mrb[51].mxu0 }
 0xba3   : > { %v7265_v19 = vpop.f32.mrb[49].mxu1  ;;  %v4891_v20 = vsel %vm2612_vm2, %v4606_v18, -inf }
 0xba4   : > { %4892 = vmax.xlane.f32.xlu1 %v4891_v20  ;;  %v4609_v21 = vpop.f32.mrb[50].mxu1 }
 0xba5   : > { %v7266_v22 = vpop.f32.mrb[51].mxu1 }
 0xba7   : > { %v9485_v23 = vpop.f32.mrb[52].mxu0 }
 0xba8   : > { %v7271_v60 = vpop.f32.mrb[53].mxu0  ;;  %v4894_v24 = vsel %vm2612_vm2, %v9485_v23, -inf }
 0xba9   : > { %4895 = vmax.xlane.f32.xlu0 %v4894_v24  ;;  %v4655_v2 = vpop.f32.mrb[54].mxu0 }
 0xbaa   : > { %v9489_v25 = vpop.f32.mrb[52].mxu1  ;;  %v7272_v27 = vpop.f32.mrb[55].mxu0 }
 0xbab   : > { %v7277_v29 = vpop.f32.mrb[53].mxu1  ;;  %v4897_v35 = vsel %vm2612_vm2, %v9489_v25, -inf }
 0xbac   : > { %v4701_v44 = vpop.f32.mrb[54].mxu1 }
 0xbad   : > { %v7278_v54 = vpop.f32.mrb[55].mxu1  ;;  %4898 = vmax.xlane.f32.xlu0 %v4897_v35 }
 0xbaf   : > { %v4744_v36 = vpop.f32.mrb[56].mxu0 }
 0xbb0   : > { %v7283_v37 = vpop.f32.mrb[57].mxu0  ;;  %v4900_v39 = vsel %vm2612_vm2, %v4744_v36, -inf }
 0xbb1   : > { %4901 = vmax.xlane.f32.xlu0 %v4900_v39  ;;  %v4747_v41 = vpop.f32.mrb[58].mxu0 }
 0xbb2   : > { %v4790_v43 = vpop.f32.mrb[56].mxu1  ;;  %v7284_v13 = vpop.f32.mrb[59].mxu0 }
 0xbb3   : > { %v7289_v11 = vpop.f32.mrb[57].mxu1  ;;  %v4903_v3 = vsel %vm2612_vm2, %v4790_v43, -inf }
 0xbb4   : > { %4904 = vmax.xlane.f32.xlu1 %v4903_v3  ;;  %v4793_v57 = vpop.f32.mrb[58].mxu1 }
 0xbb5   : > { %v7290_v56 = vpop.f32.mrb[59].mxu1 }
 0xbb7   : > { %v4836_v5 = vpop.f32.mrb[60].mxu0 }
 0xbb8   : > { %v7295_v61 = vpop.f32.mrb[61].mxu0  ;;  %v4906_v58 = vsel %vm2612_vm2, %v4836_v5, -inf }
 0xbb9   : > { %4907 = vmax.xlane.f32.xlu0 %v4906_v58  ;;  %v4839_v59 = vpop.f32.mrb[62].mxu0 }
 0xbba   : > { %v9496_v40 = vpop.f32.mrb[60].mxu1  ;;  %v7296_v62 = vpop.f32.mrb[63].mxu0 }
 0xbbb   : > { %v7301_v63 = vpop.f32.mrb[61].mxu1  ;;  %v4909_v38 = vsel %vm2612_vm2, %v9496_v40, -inf }
 0xbbc   : > { %v4885_v46 = vpop.f32.mrb[62].mxu1 }
 0xbbd   : > { %v7302_v45 = vpop.f32.mrb[63].mxu1 }
 0xbc5   : > { %4216 = vrot.lane.b32.xlu1 %v9333_v28, %s8217_s16 }
 0xbc9   : > { %4220 = vrot.lane.b32.xlu1 %v9329_v26, %s8216_s29 }
 0xbcf   : > { %4214 = vrot.lane.b32.xlu0 %v9329_v26, %s8217_s16 }
 0xbed   : > { %4910 = vmax.xlane.f32.xlu1 %v4909_v38 }
 0xbfe   : > { %4222 = vrot.lane.b32.xlu1 %v9333_v28, %s8216_s29 }
 0xc2e   : > { %v4890_v47 = vpop.xlane.xlu0 %4889 }
 0xc2f   : > { %v4912_v42 = vsub.f32 %v4560_v12, %v4890_v47 }
 0xc31   : > { %v4920_v48 = vmul.f32 1.442695, %v4912_v42  ;;  %v4893_v52 = vpop.xlane.xlu1 %4892 }
 0xc32   : > { %v4913_v30 = vsub.f32 %v4606_v18, %v4893_v52 }
 0xc33   : > { %7750 = vpow2.f32 %v4920_v48 }
 0xc34   : > { %v4922_v49 = vmul.f32 1.442695, %v4913_v30 }
 0xc36   : > { %7752 = vpow2.f32 %v4922_v49  ;;  %v4896_v12 = vpop.xlane.xlu0 %4895 }
 0xc37   : > { %v4914_v15 = vsub.f32 %v9485_v23, %v4896_v12 }
 0xc39   : > { %v4924_v53 = vmul.f32 1.442695, %v4914_v15 }
 0xc3a   : > { %v4899_v14 = vpop.xlane.xlu0 %4898 }
 0xc3b   : > { %v4915_v18 = vsub.f32 %v9489_v25, %v4899_v14  ;;  %7754 = vpow2.f32 %v4924_v53 }
 0xc3d   : > { %v9508_v31 = vpop.eup %7750  ;;  %v4926_v20 = vmul.f32 1.442695, %v4915_v18 }
 0xc3e   : > { %v4936_v50 = vsel %vm2612_vm2, %v9508_v31, 0.0  ;;  %v4902_v17 = vpop.xlane.xlu0 %4901 }
 0xc3f   : > { %4937 = vadd.xlane.f32.xlu0 %v4936_v50  ;;  %v4916_v19 = vsub.f32 %v4744_v36, %v4902_v17  ;;  %7756 = vpow2.f32 %v4926_v20 }
 0xc40   : > { %v9512_v0 = vpop.eup %7752 }
 0xc41   : > { %v4905_v1 = vpop.xlane.xlu1 %4904  ;;  %v4939_v7 = vsel %vm2612_vm2, %v9512_v0, 0.0  ;;  %v4928_v21 = vmul.f32 1.442695, %v4916_v19 }
 0xc42   : > { %4940 = vadd.xlane.f32.xlu1 %v4939_v7  ;;  %v4917_v22 = vsub.f32 %v4790_v43, %v4905_v1 }
 0xc43   : > { %7758 = vpow2.f32 %v4928_v21 }
 0xc44   : > { %v4930_v24 = vmul.f32 1.442695, %v4917_v22 }
 0xc45   : > { %v9516_v33 = vpop.permute.xlu1 %4216 }
 0xc46   : > { %v4908_v60 = vpop.xlane.xlu0 %4907  ;;  %7760 = vpow2.f32 %v4930_v24 }
 0xc47   : > { %v4918_v2 = vsub.f32 %v4836_v5, %v4908_v60 }
 0xc49   : > { %v4221_v8 = vpop.permute.xlu1 %4220  ;;  %v4932_v27 = vmul.f32 1.442695, %v4918_v2 }
 0xc4a   : > { %v4232_v34 = vcombine.low %v9329_v26, %v4221_v8  ;;  %v4233_v51 = vcombine.high %v9329_v26, %v4221_v8  ;;  %v4215_v57 = vpop.permute.xlu0 %4214 }
 0xc4b   : > { %7762 = vpow2.f32 %v4932_v27 }
 0xc4c   : > { %v4240_v46 = vrot.slane %v4232_v34, %v8935_v9  ;;  %v4247_v45 = vrot.slane %v4233_v51, %v8935_v9 }
 0xc53   : > { %4228 = vrot.lane.b32.xlu1 %v9333_v28, %s8218_s23 }
 0xc55   : > { %4226 = vrot.lane.b32.xlu0 %v9329_v26, %s8218_s23  ;;  %v9526_v26 = vpop.eup %7754 }
 0xc56   : > { %v9528_v23 = vpop.eup %7756  ;;  %v4942_v25 = vsel %vm2612_vm2, %v9526_v26, 0.0 }
 0xc57   : > { %v9532_v29 = vpop.eup %7758  ;;  %v4945_v44 = vsel %vm2612_vm2, %v9528_v23, 0.0 }
 0xc58   : > { %v4948_v35 = vsel %vm2612_vm2, %v9532_v29, 0.0  ;;  %v9538_v54 = vpop.eup %7760 }
 0xc59   : > { %v4951_v39 = vsel %vm2612_vm2, %v9538_v54, 0.0  ;;  %v9543_v41 = vpop.eup %7762 }
 0xc5a   : > { %v4954_v13 = vsel %vm2612_vm2, %v9543_v41, 0.0 }
 0xc74   : > { %4943 = vadd.xlane.f32.xlu0 %v4942_v25 }
 0xc77   : > { %4946 = vadd.xlane.f32.xlu1 %v4945_v44 }
 0xc78   : > { %4949 = vadd.xlane.f32.xlu0 %v4948_v35 }
 0xc7a   : > { %v4911_v36 = vpop.xlane.xlu1 %4910 }
 0xc7b   : > { %v4919_v37 = vsub.f32 %v9496_v40, %v4911_v36 }
 0xc7c   : > { %4952 = vadd.xlane.f32.xlu0 %v4951_v39 }
 0xc7d   : > { %v4934_v43 = vmul.f32 1.442695, %v4919_v37 }
 0xc7e   : > { %v4223_v56 = vpop.permute.xlu1 %4222 }
 0xc7f   : > { %7764 = vpow2.f32 %v4934_v43  ;;  %v4300_v62 = vcombine.low %v9333_v28, %v4223_v56  ;;  %v4301_v63 = vcombine.high %v9333_v28, %v4223_v56 }
 0xc80   : > { %4955 = vadd.xlane.f32.xlu0 %v4954_v13 }
 0xc81   : > { %v4308_v7 = vrot.slane %v4300_v62, %v8935_v9  ;;  %v4315_v28 = vrot.slane %v4301_v63, %v8935_v9 }
 0xc89   : > { %v9547_v11 = vpop.eup %7764 }
 0xc8a   : > { %v4957_v3 = vsel %vm2612_vm2, %v9547_v11, 0.0 }
 0xc8b   : > { %4958 = vadd.xlane.f32.xlu1 %v4957_v3 }
 0xccc   : > { %v4938_v5 = vpop.xlane.xlu0 %4937 }
 0xccd   : > { %7766 = vrcp.f32 %v4938_v5 }
 0xccf   : > { %v4941_v61 = vpop.xlane.xlu1 %4940 }
 0xcd0   : > { %v4227_v58 = vpop.permute.xlu0 %4226  ;;  %7768 = vrcp.f32 %v4941_v61 }
 0xcd1   : > { %v4248_v59 = vcombine.low %v4215_v57, %v4227_v58  ;;  %v4249_v40 = vcombine.high %v4215_v57, %v4227_v58 }
 0xcd3   : > { %v4256_v38 = vrot.slane %v4248_v59, %v8935_v9  ;;  %v4263_v47 = vrot.slane %v4249_v40, %v8935_v9  ;;  %v4229_v42 = vpop.permute.xlu1 %4228 }
 0xcd4   : > { %v4316_v48 = vcombine.low %v9516_v33, %v4229_v42  ;;  %v4317_v52 = vcombine.high %v9516_v33, %v4229_v42 }
 0xcd5   : > { %v4264_v30 = vcombine.low %v4240_v46, %v4256_v38  ;;  %v4265_v49 = vcombine.high %v4240_v46, %v4256_v38  ;;  %v4280_v50 = vcombine.low %v4247_v45, %v4263_v47  ;;  %v4281_v1 = vcombine.high %v4247_v45, %v4263_v47 }
 0xcd6   : > { %v4324_v8 = vrot.slane %v4316_v48, %v8935_v9  ;;  %v4331_v34 = vrot.slane %v4317_v52, %v8935_v9 }
 0xcd7   : > { %v4272_v51 = vrot.slane %v4264_v30, %v8938_v16  ;;  %v4279_v12 = vrot.slane %v4265_v49, %v8938_v16  ;;  %v4288_v14 = vrot.slane %v4280_v50, %v8938_v16  ;;  %v4295_v33 = vrot.slane %v4281_v1, %v8938_v16  ;;  %v7767_v47 = vpop.eup %7766 }
 0xcd8   : > { %v4332_v15 = vcombine.low %v4308_v7, %v4324_v8  ;;  %v4333_v17 = vcombine.high %v4308_v7, %v4324_v8  ;;  %v4348_v18 = vcombine.low %v4315_v28, %v4331_v34  ;;  %v4349_v24 = vcombine.high %v4315_v28, %v4331_v34 }
 0xcd9   : > { %v4368_v53 = vcombine.low %v4272_v51, %v4279_v12  ;;  %v6823_v19 = vcombine.high %v4272_v51, %v4279_v12  ;;  %v4384_v20 = vcombine.low %v4288_v14, %v4295_v33  ;;  %v6824_v21 = vcombine.high %v4288_v14, %v4295_v33 }
 0xcda   : > { %v4340_v22 = vrot.slane %v4332_v15, %v8938_v16  ;;  %v4347_v60 = vrot.slane %v4333_v17, %v8938_v16  ;;  %v4356_v2 = vrot.slane %v4348_v18, %v8938_v16  ;;  %v4363_v36 = vrot.slane %v4349_v24, %v8938_v16  ;;  %v7769_v7 = vpop.eup %7768 }
 0xcdb   : > { %v4375_v27 = vrot.slane %v4368_v53, %v8935_v9  ;;  %v4383_v25 = vrot.slane %v6823_v19, %v8935_v9  ;;  %v4391_v44 = vrot.slane %v4384_v20, %v8935_v9  ;;  %v4399_v35 = vrot.slane %v6824_v21, %v8935_v9 }
 0xcdc   : > { %v4436_v37 = vcombine.low %v4340_v22, %v4347_v60  ;;  %v6825_v39 = vcombine.high %v4340_v22, %v4347_v60  ;;  %v4452_v56 = vcombine.low %v4356_v2, %v4363_v36  ;;  %v6826_v5 = vcombine.high %v4356_v2, %v4363_v36 }
 0xcdd   : > { %v4400_v43 = vcombine.low %v4375_v27, %v4383_v25  ;;  %v4401_v13 = vcombine.high %v4375_v27, %v4383_v25  ;;  %v4416_v58 = vcombine.low %v4391_v44, %v4399_v35  ;;  %v4417_v40 = vcombine.high %v4391_v44, %v4399_v35 }
 0xcde   : > { %v4443_v3 = vrot.slane %v4436_v37, %v8935_v9  ;;  %v4451_v57 = vrot.slane %v6825_v39, %v8935_v9  ;;  %v4459_v62 = vrot.slane %v4452_v56, %v8935_v9  ;;  %v4467_v63 = vrot.slane %v6826_v5, %v8935_v9 }
 0xcdf   : > { %v4408_v61 = vrot.slane %v4400_v43, %v8938_v16  ;;  %v4415_v59 = vrot.slane %v4401_v13, %v8938_v16  ;;  %v4424_v45 = vrot.slane %v4416_v58, %v8938_v16  ;;  %v4431_v38 = vrot.slane %v4417_v40, %v8938_v16 }
 0xce0   : > { %v4468_v46 = vcombine.low %v4443_v3, %v4451_v57  ;;  %v4484_v48 = vcombine.low %v4459_v62, %v4467_v63  ;;  %v4968_v28 = vmul.f32 %v7767_v47, %v9508_v31  ;;  %v4969_v14 = vmul.f32 %v7769_v7, %v9512_v0  ;;  %v7622_v47 = vld [vmem:[%s9970_s25] sm:$0xff]  }
 0xce1   : > { %v4432_v52 = vcombine.low %v4408_v61, %v4424_v45  ;;  %v4433_v30 = vcombine.high %v4408_v61, %v4424_v45  ;;  %v4434_v49 = vcombine.low %v4415_v59, %v4431_v38  ;;  %v9584_v50 = vcombine.high %v4415_v59, %v4431_v38 }
 0xce2   : > { %v4476_v42 = vrot.slane %v4468_v46, %v8938_v16  ;;  %v4492_v1 = vrot.slane %v4484_v48, %v8938_v16  ;;  %v4976_v15 = vpack.c.bf16 %v4968_v28, %v4968_v28  ;;  %v4977_v53 = vpack.c.bf16 %v4969_v14, %v4969_v14 }
 0xce3   : > { %v4984_v9 = vpack.c.bf16 %v4432_v52, %v4432_v52  ;;  %v4986_v12 = vpack.c.bf16 %v4433_v30, %v4433_v30  ;;  %v4469_v21 = vcombine.high %v4443_v3, %v4451_v57  ;;  %v4485_v22 = vcombine.high %v4459_v62, %v4467_v63  ;;  %v7623_v30 = vld [vmem:[%s9970_s25 + $0x8] sm:$0xff]  }
 0xce4   : > { %v4500_v8 = vcombine.low %v4476_v42, %v4492_v1  ;;  %v4501_v34 = vcombine.high %v4476_v42, %v4492_v1  ;;  %v4988_v37 = vpack.c.bf16 %v4434_v49, %v4434_v49  ;;  %v4990_v58 = vpack.c.bf16 %v9584_v50, %v9584_v50  ;;  %v7624_v49 = vld [vmem:[%s9970_s25 + $0x10] sm:$0xff]   ;;  %v7625_v50 = vld [vmem:[%s9970_s25 + $0x18] sm:$0xff]  }
 0xce5   : > { %v4996_v51 = vsel %vm2720_vm3, %v4984_v9, 0  ;;  %v5088_v31 = vsel %vm2720_vm3, %v4986_v12, 0  ;;  %v4483_v24 = vrot.slane %v4469_v21, %v8938_v16  ;;  %v4499_v2 = vrot.slane %v4485_v22, %v8938_v16 }
 0xce6   : > { %7304 = vmatpush3.bf16.msra.mxu0 %v4996_v51  ;;  %v4985_v33 = vpack.c.bf16 %v4500_v8, %v4500_v8  ;;  %v4987_v18 = vpack.c.bf16 %v4501_v34, %v4501_v34  ;;  %v5180_v56 = vsel %vm2720_vm3, %v4988_v37, 0  ;;  %v5272_v46 = vsel %vm2720_vm3, %v4990_v58, 0  ;;  %v7626_v8 = vld [vmem:[%s9970_s25 + $0x20] sm:$0xff]  }
 0xce7   : > { %7315 = vmatprep.subr.bf16.mxu0 %v8213_v6  ;;  %v4502_v44 = vcombine.low %v4483_v24, %v4499_v2 }
 0xce8   : > { %v5042_v17 = vsel %vm2720_vm3, %v4985_v33, 0  ;;  %v5134_v0 = vsel %vm2720_vm3, %v4987_v18, 0  ;;  %v7627_v33 = vld [vmem:[%s9970_s25 + $0x28] sm:$0xff]  }
 0xce9   : > { %7310 = vmatpush3.bf16.msra.mxu1 %v5042_v17  ;;  %7306 = vmatmul.mubr.msk.bf16.vlgmr.msra.gmra.mrb[64].mxu0 %vm2612_vm2, %v4976_v15  ;;  %v4989_v57 = vpack.c.bf16 %v4502_v44, %v4502_v44 }
 0xcea   : > { %7316 = vmatpush3.bf16.msra.mxu0 %v5088_v31  ;;  %7321 = vmatprep.subr.bf16.mxu1 %v8213_v6 }
 0xceb   : > { %7317 = vmatprep.mubr.msk.bf16.mxu0 %vm8215_vm0, %v8213_v6  ;;  %7327 = vmatprep.subr.bf16.mxu0 %v8213_v6  ;;  %v5226_v61 = vsel %vm2720_vm3, %v4989_v57, 0 }
 0xcec   : > { %7312 = vmatmul.mubr.msk.bf16.vlgmr.msra.gmra.mrb[64].mxu1 %vm2612_vm2, %v4977_v53 }
 0xced   : > { %7322 = vmatpush3.bf16.msra.mxu1 %v5134_v0  ;;  %7323 = vmatprep.mubr.msk.bf16.mxu1 %vm8215_vm0, %v8213_v6  ;;  %v7628_v0 = vld [vmem:[%s9970_s25 + $0x30] sm:$0xff]  }
 0xcee   : > { %7333 = vmatprep.subr.bf16.mxu1 %v8213_v6 }
 0xd01   : > { %v4944_v19 = vpop.xlane.xlu0 %4943 }
 0xd02   : > { %7770 = vrcp.f32 %v4944_v19 }
 0xd04   : > { %v4947_v20 = vpop.xlane.xlu1 %4946 }
 0xd05   : > { %7772 = vrcp.f32 %v4947_v20  ;;  %v4950_v60 = vpop.xlane.xlu0 %4949 }
 0xd06   : > { %7774 = vrcp.f32 %v4950_v60  ;;  %v7629_v60 = vld [vmem:[%s9970_s25 + $0x38] sm:$0xff]  }
 0xd09   : > { %v4953_v27 = vpop.xlane.xlu0 %4952 }
 0xd0a   : > { %7776 = vrcp.f32 %v4953_v27 }
 0xd0c   : > { %v7771_v25 = vpop.eup %7770 }
 0xd0d   : > { %v4970_v35 = vmul.f32 %v7771_v25, %v9526_v26  ;;  %v4956_v36 = vpop.xlane.xlu0 %4955 }
 0xd0e   : > { %7778 = vrcp.f32 %v4956_v36 }
 0xd0f   : > { %v7773_v39 = vpop.eup %7772  ;;  %v4978_v43 = vpack.c.bf16 %v4970_v35, %v4970_v35 }
 0xd10   : > { %v7775_v13 = vpop.eup %7774  ;;  %v4971_v3 = vmul.f32 %v7773_v39, %v9528_v23  ;;  %v4503_v23 = vcombine.high %v4483_v24, %v4499_v2 }
 0xd11   : > { %7318 = vmatmul.mubr.msk.bf16.vlgmr.msra.gmra.mrb[68].mxu0 %vm2612_vm2, %v4978_v43  ;;  %v4972_v26 = vmul.f32 %v7775_v13, %v9532_v29 }
 0xd12   : > { %7328 = vmatpush3.bf16.msra.mxu0 %v5180_v56  ;;  %v4979_v16 = vpack.c.bf16 %v4971_v3, %v4971_v3  ;;  %7329 = vmatprep.mubr.msk.bf16.mxu0 %vm8215_vm0, %v8213_v6  ;;  %v4991_v63 = vpack.c.bf16 %v4503_v23, %v4503_v23 }
 0xd13   : > { %7339 = vmatprep.subr.bf16.mxu0 %v8213_v6  ;;  %v4980_v29 = vpack.c.bf16 %v4972_v26, %v4972_v26 }
 0xd14   : > { %v7777_v5 = vpop.eup %7776  ;;  %7324 = vmatmul.mubr.msk.bf16.vlgmr.msra.gmra.mrb[68].mxu1 %vm2612_vm2, %v4979_v16 }
 0xd15   : > { %7334 = vmatpush3.bf16.msra.mxu1 %v5226_v61  ;;  %7335 = vmatprep.mubr.msk.bf16.mxu1 %vm8215_vm0, %v8213_v6  ;;  %v4973_v59 = vmul.f32 %v7777_v5, %v9538_v54  ;;  %v5318_v54 = vsel %vm2720_vm3, %v4991_v63, 0 }
 0xd16   : > { %7345 = vmatprep.subr.bf16.mxu1 %v8213_v6 }
 0xd17   : > { %v4981_v45 = vpack.c.bf16 %v4973_v59, %v4973_v59 }
 0xd18   : > { %v7779_v40 = vpop.eup %7778  ;;  %v4959_v62 = vpop.xlane.xlu1 %4958 }
 0xd19   : > { %7780 = vrcp.f32 %v4959_v62  ;;  %7330 = vmatmul.mubr.msk.bf16.vlgmr.msra.gmra.mrb[72].mxu0 %vm2612_vm2, %v4980_v29  ;;  %v4974_v38 = vmul.f32 %v7779_v40, %v9543_v41 }
 0xd1a   : > { %7340 = vmatpush3.bf16.msra.mxu0 %v5272_v46  ;;  %7341 = vmatprep.mubr.msk.bf16.mxu0 %vm8215_vm0, %v8213_v6 }
 0xd1b   : > { %7351 = vmatprep.subr.bf16.mxu0 %v8213_v6  ;;  %v4982_v42 = vpack.c.bf16 %v4974_v38, %v4974_v38 }
 0xd1c   : > { %7336 = vmatmul.mubr.msk.bf16.vlgmr.msra.gmra.mrb[72].mxu1 %vm2612_vm2, %v4981_v45 }
 0xd1d   : > { %7346 = vmatpush3.bf16.msra.mxu1 %v5318_v54  ;;  %7347 = vmatprep.mubr.msk.bf16.mxu1 %vm8215_vm0, %v8213_v6 }
 0xd1e   : > { %7359 = vmatprep.subr.bf16.mxu1 %v8213_v6 }
 0xd21   : > { %7342 = vmatmul.mubr.msk.bf16.vlgmr.msra.gmra.mrb[76].mxu0 %vm2612_vm2, %v4982_v42 }
 0xd22   : > { %7352 = vmatpush3.bf16.msra.mxu0 %v7622_v47  ;;  %7355 = vmatprep.mubr.msk.bf16.mxu0 %vm8215_vm0, %v8213_v6 }
 0xd23   : > { %v7781_v41 = vpop.eup %7780  ;;  %7353 = vmatprep.subr.bf16.mxu0 %v8213_v6 }
 0xd24   : > { %v4975_v48 = vmul.f32 %v7781_v41, %v9547_v11 }
 0xd26   : > { %v4983_v52 = vpack.c.bf16 %v4975_v48, %v4975_v48  ;;  %7354 = vmatpush3.bf16.msra.mxu0 %v7623_v30 }
 0xd27   : > { %7367 = vmatprep.subr.bf16.mxu0 %v8213_v6 }
 0xd28   : > { %7348 = vmatmul.mubr.msk.bf16.vlgmr.msra.gmra.mrb[76].mxu1 %vm2612_vm2, %v4983_v52  ;;  %v6855_v52 = vld [vmem:[%s9972_s5] ss:$0 sm:$0xff] }
 0xd29   : > { %7363 = vmatprep.mubr.msk.bf16.mxu1 %vm8215_vm0, %v8213_v6  ;;  %7360 = vmatpush3.bf16.msra.mxu1 %v7624_v49 }
 0xd2a   : > { %7361 = vmatprep.subr.bf16.mxu1 %v8213_v6 }
 0xd2d   : > { %7362 = vmatpush3.bf16.msra.mxu1 %v7625_v50 }
 0xd2e   : > { %7375 = vmatprep.subr.bf16.mxu1 %v8213_v6 }
 0xdbc   : > { %v5032_v11 = vpop.f32.mrb[64].mxu0 }
 0xdbd   : > { %v7307_v1 = vpop.f32.mrb[65].mxu0 }
 0xdbe   : > { %v5035_v7 = vpop.f32.mrb[66].mxu0 }
 0xdbf   : > { %v5078_v28 = vpop.f32.mrb[64].mxu1  ;;  %v7308_v9 = vpop.f32.mrb[67].mxu0 }
 0xdc0   : > { %v5360_v34 = vpack.c.bf16 %v5078_v28, %v5032_v11  ;;  %v7313_v51 = vpop.f32.mrb[65].mxu1 }
 0xdc1   : > { %v5081_v12 = vpop.f32.mrb[66].mxu1  ;;  %v7632_v51 = vld [vmem:[%s8829_s14 + $0x4] ss:$16 sps:$4 sm:$0xff]  }
 0xdc2   : > { %v7314_v14 = vpop.f32.mrb[67].mxu1  ;;  %7356 = vmatmul.mubr.msk.bf16.vlgmr.msra.gmra.mrb[80].mxu0 %vm2235_vm1, %v5360_v34  ;;  %v7630_v34 = vld [vmem:[%s8829_s14] ss:$16 sps:$4 sm:$0xff]   ;;  %v7633_v12 = vld [vmem:[%s8829_s14 + $0x8] ss:$16 sps:$4 sm:$0xff]  }
 0xdc3   : > { %7368 = vmatpush3.bf16.msra.mxu0 %v7626_v8  ;;  %7371 = vmatprep.mubr.msk.bf16.mxu0 %vm8215_vm0, %v8213_v6  ;;  %v7635_v14 = vld [vmem:[%s8829_s14 + $0xc] ss:$16 sps:$4 sm:$0xff]  }
 0xdc4   : > { %7369 = vmatprep.subr.bf16.mxu0 %v8213_v6 }
 0xdc7   : > { %7370 = vmatpush3.bf16.msra.mxu0 %v7627_v33  ;;  %v7638_v33 = vld [vmem:[%s8829_s14 + $0x24] ss:$16 sps:$4 sm:$0xff]  }
 0xdc8   : > { %5851 = vmatprep.subr.bf16.mxu0 %v7632_v51  ;;  %v7688_v51 = vld [vmem:[%s8839_s10 + $0x10] sm:$0xff]  }
 0xde4   : > { %v5124_v15 = vpop.f32.mrb[68].mxu0 }
 0xde5   : > { %v7319_v17 = vpop.f32.mrb[69].mxu0 }
 0xde6   : > { %v5127_v18 = vpop.f32.mrb[70].mxu0  ;;  %v7636_v17 = vld [vmem:[%s8829_s14 + $0x20] ss:$16 sps:$4 sm:$0xff]  }
 0xde7   : > { %v5170_v31 = vpop.f32.mrb[68].mxu1  ;;  %v7320_v53 = vpop.f32.mrb[71].mxu0  ;;  %v7644_v18 = vld [vmem:[%s8829_s14 + $0x44] ss:$16 sps:$4 sm:$0xff]  }
 0xde8   : > { %v5361_v19 = vpack.c.bf16 %v5170_v31, %v5124_v15  ;;  %v7325_v20 = vpop.f32.mrb[69].mxu1  ;;  %v7641_v15 = vld [vmem:[%s8829_s14 + $0x2c] ss:$16 sps:$4 sm:$0xff]   ;;  %v7642_v31 = vld [vmem:[%s8829_s14 + $0x40] ss:$16 sps:$4 sm:$0xff]  }
 0xde9   : > { %v5173_v21 = vpop.f32.mrb[70].mxu1  ;;  %v7645_v53 = vld [vmem:[%s8829_s14 + $0x48] ss:$16 sps:$4 sm:$0xff]  }
 0xdea   : > { %v7326_v22 = vpop.f32.mrb[71].mxu1  ;;  %7364 = vmatmul.mubr.msk.bf16.vlgmr.msra.gmra.mrb[80].mxu1 %vm2235_vm1, %v5361_v19 }
 0xdeb   : > { %7376 = vmatpush3.bf16.msra.mxu1 %v7628_v0  ;;  %7379 = vmatprep.mubr.msk.bf16.mxu1 %vm8215_vm0, %v8213_v6 }
 0xdec   : > { %v5216_v24 = vpop.f32.mrb[72].mxu0  ;;  %7377 = vmatprep.subr.bf16.mxu1 %v8213_v6 }
 0xded   : > { %v7331_v2 = vpop.f32.mrb[73].mxu0 }
 0xdee   : > { %v5219_v27 = vpop.f32.mrb[74].mxu0 }
 0xdef   : > { %v5262_v25 = vpop.f32.mrb[72].mxu1  ;;  %v7332_v44 = vpop.f32.mrb[75].mxu0  ;;  %7378 = vmatpush3.bf16.msra.mxu1 %v7629_v60  ;;  %v7648_v27 = vld [vmem:[%s8829_s14 + $0x60] ss:$16 sps:$4 sm:$0xff]  }
 0xdf0   : > { %v5362_v35 = vpack.c.bf16 %v5262_v25, %v5216_v24  ;;  %v7337_v36 = vpop.f32.mrb[73].mxu1  ;;  %5894 = vmatprep.subr.bf16.mxu1 %v7635_v14  ;;  %v7650_v25 = vld [vmem:[%s8829_s14 + $0x64] ss:$16 sps:$4 sm:$0xff]   ;;  %v7651_v44 = vld [vmem:[%s8829_s14 + $0x68] ss:$16 sps:$4 sm:$0xff]  }
 0xdf1   : > { %v5265_v37 = vpop.f32.mrb[74].mxu1  ;;  %v7656_v36 = vld [vmem:[%s8829_s14 + $0x84] ss:$16 sps:$4 sm:$0xff]   ;;  %v7690_v14 = vld [vmem:[%s8839_s10 + $0x58] sm:$0xff]  }
 0xdf2   : > { %v7338_v39 = vpop.f32.mrb[75].mxu1  ;;  %7372 = vmatmul.mubr.msk.bf16.vlgmr.msra.gmra.mrb[84].mxu0 %vm2235_vm1, %v5362_v35  ;;  %v7653_v35 = vld [vmem:[%s8829_s14 + $0x6c] ss:$16 sps:$4 sm:$0xff]  }
 0xdf3   : > { %5883 = vmatprep.mubr.bf16.mxu0 %v8214_v32  ;;  %5852 = vmatpush1.bf16.msra.mxu0 %v7630_v34  ;;  %v7659_v37 = vld [vmem:[%s8829_s14 + $0x8c] ss:$16 sps:$4 sm:$0xff]   ;;  %v7654_v39 = vld [vmem:[%s8829_s14 + $0x80] ss:$16 sps:$4 sm:$0xff]  }
 0xdf4   : > { %v5308_v43 = vpop.f32.mrb[76].mxu0  ;;  %5853 = vmatprep.subr.bf16.mxu0 %v7638_v33  ;;  %v7687_v34 = vld [vmem:[%s8839_s10 + $0xd0] sm:$0xff]   ;;  %v7691_v33 = vld [vmem:[%s8839_s10 + $0xd8] sm:$0xff]  }
 0xdf5   : > { %v7343_v13 = vpop.f32.mrb[77].mxu0 }
 0xdf6   : > { %v5311_v3 = vpop.f32.mrb[78].mxu0  ;;  %v7662_v13 = vld [vmem:[%s8829_s14 + $0xa4] ss:$16 sps:$4 sm:$0xff]  }
 0xdf7   : > { %v7344_v57 = vpop.f32.mrb[79].mxu0  ;;  %5854 = vmatpush1.bf16.msra.mxu0 %v7636_v17  ;;  %v7665_v3 = vld [vmem:[%s8829_s14 + $0xac] ss:$16 sps:$4 sm:$0xff]  }
 0xdf8   : > { %5855 = vmatprep.subr.bf16.mxu0 %v7644_v18  ;;  %v7660_v57 = vld [vmem:[%s8829_s14 + $0xa0] ss:$16 sps:$4 sm:$0xff]   ;;  %v7693_v17 = vld [vmem:[%s8839_s10 + $0x98] sm:$0xff]  }
 0xdf9   : > { %v7695_v18 = vld [vmem:[%s8839_s10 + $0xe0] sm:$0xff]  }
 0xdfb   : > { %v5354_v56 = vpop.f32.mrb[76].mxu1  ;;  %5856 = vmatpush1.bf16.msra.mxu0 %v7642_v31  ;;  %v7697_v31 = vld [vmem:[%s8839_s10 + $0xa0] sm:$0xff]  }
 0xdfc   : > { %v5363_v16 = vpack.c.bf16 %v5354_v56, %v5308_v43  ;;  %v7349_v6 = vpop.f32.mrb[77].mxu1  ;;  %5857 = vmatprep.subr.bf16.mxu0 %v7650_v25  ;;  %v7657_v43 = vld [vmem:[%s8829_s14 + $0x88] ss:$16 sps:$4 sm:$0xff]  }
 0xdfd   : > { %v5357_v26 = vpop.f32.mrb[78].mxu1  ;;  %v7663_v56 = vld [vmem:[%s8829_s14 + $0xa8] ss:$16 sps:$4 sm:$0xff]   ;;  %v7671_v6 = vld [vmem:[%s8829_s14 + $0xcc] ss:$16 sps:$4 sm:$0xff]  }
 0xdfe   : > { %v7350_v5 = vpop.f32.mrb[79].mxu1  ;;  %7380 = vmatmul.mubr.msk.bf16.vlgmr.msra.gmra.mrb[84].mxu1 %vm2235_vm1, %v5363_v16  ;;  %v7668_v16 = vld [vmem:[%s8829_s14 + $0xc4] ss:$16 sps:$4 sm:$0xff]   ;;  %v7666_v26 = vld [vmem:[%s8829_s14 + $0xc0] ss:$16 sps:$4 sm:$0xff]   ;;  %v7708_v25 = vld [vmem:[%s8839_s10 + $0x38] sm:$0xff]  }
 0xdff   : > { %5926 = vmatprep.mubr.bf16.mxu1 %v8214_v32  ;;  %5895 = vmatpush1.bf16.msra.mxu1 %v7633_v12  ;;  %v7669_v5 = vld [vmem:[%s8829_s14 + $0xc8] ss:$16 sps:$4 sm:$0xff]   ;;  %v7689_v12 = vld [vmem:[%s8839_s10 + $0x90] sm:$0xff]  }
 0xe00   : > { %5896 = vmatprep.subr.bf16.mxu1 %v7641_v15  ;;  %5858 = vmatpush1.bf16.msra.mxu0 %v7648_v27  ;;  %v7692_v15 = vld [vmem:[%s8839_s10 + $0x18] sm:$0xff]  }
 0xe01   : > { %5859 = vmatprep.subr.bf16.mxu0 %v7656_v36  ;;  %v7707_v27 = vld [vmem:[%s8839_s10 + $0xf8] sm:$0xff]   ;;  %v5681_v36 = vsub.s32 2, %v8932_v4 }
 0xe04   : > { %5860 = vmatpush1.bf16.msra.mxu0 %v7654_v39  ;;  %v5677_v39 = vsub.s32 1, %v8932_v4 }
 0xe05   : > { %5861 = vmatprep.subr.bf16.mxu0 %v7662_v13 }
 0xe08   : > { %5862 = vmatpush1.bf16.msra.mxu0 %v7660_v57 }
 0xe09   : > { %5863 = vmatprep.subr.bf16.mxu0 %v7668_v16 }
 0xe0c   : > { %5864 = vmatpush1.bf16.msra.mxu0 %v7666_v26 }
 0xe95   : > { %v5413_v61 = vpop.f32.mrb[80].mxu0 }
 0xe96   : > { %v7357_v23 = vpop.f32.mrb[81].mxu0 }
 0xe97   : > { %v5416_v58 = vpop.f32.mrb[82].mxu0  ;;  %v7677_v23 = vld [vmem:[%s8829_s14 + $0xec] ss:$16 sps:$4 sm:$0xff]  }
 0xe98   : > { %v7358_v59 = vpop.f32.mrb[83].mxu0 }
 0xe99   : > { %v7675_v59 = vld [vmem:[%s8829_s14 + $0xe8] ss:$16 sps:$4 sm:$0xff]  }
 0xebd   : > { %v5469_v29 = vpop.f32.mrb[80].mxu1 }
 0xebe   : > { %v5588_v40 = vadd.f32 %v5469_v29, %v5413_v61  ;;  %v7365_v62 = vpop.f32.mrb[81].mxu1  ;;  %v7674_v61 = vld [vmem:[%s8829_s14 + $0xe4] ss:$16 sps:$4 sm:$0xff]  }
 0xebf   : > { %v5472_v63 = vpop.f32.mrb[82].mxu1  ;;  %5865 = vmatprep.subr.bf16.mxu0 %v7674_v61  ;;  %v7678_v29 = vld [vmem:[%s8839_s10 + $0x40] sm:$0xff]  }
 0xec0   : > { %v5591_v46 = vadd.f32 %v5472_v63, %v5416_v58  ;;  %v7366_v45 = vpop.f32.mrb[83].mxu1  ;;  %v7672_v58 = vld [vmem:[%s8829_s14 + $0xe0] ss:$16 sps:$4 sm:$0xff]  }
 0xec1   : > { %5866 = vmatpush1.bf16.msra.mxu0 %v7672_v58 }
 0xec2   : > { %7043 = vmatprep.subr.bf16.mxu0 %v7678_v29 }
 0xec5   : > { %v5525_v38 = vpop.f32.mrb[84].mxu0 }
 0xec6   : > { %v5589_v54 = vadd.f32 %v5588_v40, %v5525_v38  ;;  %v7373_v47 = vpop.f32.mrb[85].mxu0  ;;  %v7679_v40 = vld [vmem:[%s8839_s10 + $0xc0] sm:$0xff]  }
 0xec7   : > { %v5528_v42 = vpop.f32.mrb[86].mxu0 }
 0xec8   : > { %v5592_v41 = vadd.f32 %v5591_v46, %v5528_v42  ;;  %v7374_v48 = vpop.f32.mrb[87].mxu0 }
 0xec9   : > { %v6856_v48 = vld [vmem:[%s869_s3] ss:$0 sm:$0xff] }
 0xed1   : > { %v5581_v32 = vpop.f32.mrb[84].mxu1 }
 0xed2   : > { %v5590_v30 = vadd.f32 %v5589_v54, %v5581_v32  ;;  %v7381_v49 = vpop.f32.mrb[85].mxu1 }
 0xed3   : > { %v5584_v50 = vpop.f32.mrb[86].mxu1  ;;  %v7680_v49 = vld [vmem:[%s8839_s10] sm:$0xff]  }
 0xed4   : > { %v5601_v11 = vadd.f32 %v6855_v52, %v5590_v30  ;;  %v5593_v1 = vadd.f32 %v5592_v41, %v5584_v50  ;;  %v7382_v7 = vpop.f32.mrb[87].mxu1  ;;  %v7681_v50 = vld [vmem:[%s8839_s10 + $0x80] sm:$0xff]  }
 0xed5   : > { %v7683_v7 = vld [vmem:[%s8839_s10 + $0xc8] sm:$0xff]  }
 0xed6   : > { %v5602_v28 = vadd.f32 %v6855_v52, %v5593_v1  ;;  %v5603_v9 = vadd.f32 %v5601_v11, %v9341_v55  ;;  %v7639_v55 = vld [vmem:[%s8829_s14 + $0x28] ss:$16 sps:$4 sm:$0xff]  }
 0xed7   : > { %5897 = vmatpush1.bf16.msra.mxu1 %v7639_v55  ;;  %v7682_v1 = vld [vmem:[%s8839_s10 + $0x48] sm:$0xff]   ;;  %v7694_v55 = vld [vmem:[%s8839_s10 + $0x60] sm:$0xff]  }
 0xed8   : > { %5606 = vadd.xlane.f32.xlu0 %v5603_v9  ;;  %v5604_v8 = vadd.f32 %v5602_v28, %v9343_v10  ;;  %v7647_v10 = vld [vmem:[%s8829_s14 + $0x4c] ss:$16 sps:$4 sm:$0xff]  }
 0xed9   : > { %5898 = vmatprep.subr.bf16.mxu1 %v7647_v10  ;;  %v7684_v28 = vld [vmem:[%s8839_s10 + $0x8] sm:$0xff]   ;;  %v7696_v10 = vld [vmem:[%s8839_s10 + $0x20] sm:$0xff]  }
 0xeda   : > { %5608 = vadd.xlane.f32.xlu1 %v5604_v8 }
 0xedb   : > { %5899 = vmatpush1.bf16.msra.mxu1 %v7645_v53  ;;  %v7698_v53 = vld [vmem:[%s8839_s10 + $0x68] sm:$0xff]  }
 0xedc   : > { %5900 = vmatprep.subr.bf16.mxu1 %v7653_v35  ;;  %v5673_v35 = vsub.s32 0, %v8932_v4 }
 0xedf   : > { %5901 = vmatpush1.bf16.msra.mxu1 %v7651_v44  ;;  %v7709_v44 = vld [vmem:[%s8839_s10 + $0xb8] sm:$0xff]  }
 0xee0   : > { %5902 = vmatprep.subr.bf16.mxu1 %v7659_v37  ;;  %v5669_v37 = vld [vmem:[%s8834_s9] sm:$0xf] }
 0xee1   : > { %v5674_v13 = vrot.slane %v5669_v37, %v5673_v35  ;;  %v5678_v57 = vrot.slane %v5669_v37, %v5677_v39 }
 0xee3   : > { %5903 = vmatpush1.bf16.msra.mxu1 %v7657_v43  ;;  %v5685_v43 = vsub.s32 3, %v8932_v4 }
 0xee4   : > { %5904 = vmatprep.subr.bf16.mxu1 %v7665_v3  ;;  %v5682_v3 = vrot.slane %v5669_v37, %v5681_v36 }
 0xee7   : > { %5905 = vmatpush1.bf16.msra.mxu1 %v7663_v56  ;;  %v5686_v56 = vrot.slane %v5669_v37, %v5685_v43 }
 0xee8   : > { %5906 = vmatprep.subr.bf16.mxu1 %v7671_v6 }
 0xeeb   : > { %5907 = vmatpush1.bf16.msra.mxu1 %v7669_v5 }
 0xeec   : > { %5908 = vmatprep.subr.bf16.mxu1 %v7677_v23 }
 0xeef   : > { %5909 = vmatpush1.bf16.msra.mxu1 %v7675_v59 }
 0xef0   : > { %7065 = vmatprep.subr.bf16.mxu1 %v7679_v40 }
 0xf65   : > { %v5607_v0 = vpop.xlane.xlu0 %5606 }
 0xf66   : > { %v5610_v19 = vmul.f32 0.0078125, %v5607_v0  ;;  %v7699_v0 = vld [vmem:[%s8839_s10 + $0xe8] sm:$0xff]  }
 0xf67   : > { %v5609_v20 = vpop.xlane.xlu1 %5608 }
 0xf68   : > { %v5612_v21 = vsub.f32 %v5603_v9, %v5610_v19  ;;  %v5611_v22 = vmul.f32 0.0078125, %v5609_v20  ;;  %v7685_v9 = vld [vmem:[%s8839_s10 + $0x88] sm:$0xff]  }
 0xf69   : > { %v7700_v19 = vld [vmem:[%s8839_s10 + $0x28] sm:$0xff]  }
 0xf6a   : > { %v5613_v60 = vsub.f32 %v5604_v8, %v5611_v22  ;;  %v5614_v24 = vmul.f32 %v5612_v21, %v5612_v21  ;;  %v7686_v8 = vld [vmem:[%s8839_s10 + $0x50] sm:$0xff]   ;;  %v7701_v20 = vld [vmem:[%s8839_s10 + $0xa8] sm:$0xff]  }
 0xf6b   : > { %v7703_v22 = vld [vmem:[%s8839_s10 + $0xf0] sm:$0xff]  }
 0xf6c   : > { %5616 = vadd.xlane.f32.xlu0 %v5614_v24  ;;  %v5615_v2 = vmul.f32 %v5613_v60, %v5613_v60  ;;  %v7705_v24 = vld [vmem:[%s8839_s10 + $0xb0] sm:$0xff]  }
 0xf6e   : > { %5618 = vadd.xlane.f32.xlu1 %v5615_v2  ;;  %v7706_v2 = vld [vmem:[%s8839_s10 + $0x78] sm:$0xff]  }
 0xff9   : > { %v5617_v62 = vpop.xlane.xlu0 %5616 }
 0xffa   : > { %v5620_v63 = vmul.f32 0.0078125, %v5617_v62 }
 0xffb   : > { %v5619_v46 = vpop.xlane.xlu1 %5618 }
 0xffc   : > { %v5622_v45 = vadd.f32 1e-05, %v5620_v63  ;;  %v5621_v38 = vmul.f32 0.0078125, %v5619_v46 }
 0xffe   : > { %7782 = vrsqrt.f32 %v5622_v45  ;;  %v5623_v54 = vadd.f32 1e-05, %v5621_v38 }
0x1000   : > { %7784 = vrsqrt.f32 %v5623_v54 }
0x1008   : > { %v7783_v47 = vpop.eup %7782 }
0x1009   : > { %v5626_v42 = vmul.f32 %v7783_v47, %v5612_v21  ;;  %v7702_v21 = vld [vmem:[%s8839_s10 + $0x70] sm:$0xff]  }
0x100a   : > { %v7785_v41 = vpop.eup %7784 }
0x100b   : > { %v5627_v32 = vmul.f32 %v7785_v41, %v5613_v60  ;;  %v9706_v52 = vmul.f32 %v6856_v48, %v5626_v42  ;;  %v7704_v60 = vld [vmem:[%s8839_s10 + $0x30] sm:$0xff]  }
0x100d   : > { %v9708_v30 = vmul.f32 %v6856_v48, %v5627_v32 }
0x100f   : > { %v5668_v11 = vpack.c.bf16 %v9708_v30, %v9706_v52 }
0x1011   : > { %5884 = vmatmul.mubr.bf16.vlgmr.msra.gmra.mrb[88].mxu0 %v5668_v11  ;;  %5927 = vmatmul.mubr.bf16.vlgmr.msra.gmra.mrb[88].mxu1 %v5668_v11 }
0x1012   : > { %7044 = vmatpush3.bf16.msra.mxu0 %v7680_v49  ;;  %7066 = vmatpush3.bf16.msra.mxu1 %v7681_v50 }
0x1013   : > { %7045 = vmatprep.subr.bf16.mxu0 %v7682_v1  ;;  %7067 = vmatprep.subr.bf16.mxu1 %v7683_v7 }
0x1016   : > { %7046 = vmatpush3.bf16.msra.mxu0 %v7684_v28  ;;  %7068 = vmatpush3.bf16.msra.mxu1 %v7685_v9 }
0x1017   : > { %7047 = vmatprep.subr.bf16.mxu0 %v7686_v8  ;;  %7069 = vmatprep.subr.bf16.mxu1 %v7687_v34  ;;  %v6889_v34 = vld [vmem:[%s1031_s27] ss:$0 sm:$0xff] }
0x101a   : > { %7048 = vmatpush3.bf16.msra.mxu0 %v7688_v51  ;;  %7070 = vmatpush3.bf16.msra.mxu1 %v7689_v12 }
0x101b   : > { %7049 = vmatprep.subr.bf16.mxu0 %v7690_v14  ;;  %7071 = vmatprep.subr.bf16.mxu1 %v7691_v33 }
0x101e   : > { %7050 = vmatpush3.bf16.msra.mxu0 %v7692_v15  ;;  %7072 = vmatpush3.bf16.msra.mxu1 %v7693_v17 }
0x101f   : > { %7051 = vmatprep.subr.bf16.mxu0 %v7694_v55  ;;  %7073 = vmatprep.subr.bf16.mxu1 %v7695_v18 }
0x1022   : > { %7052 = vmatpush3.bf16.msra.mxu0 %v7696_v10  ;;  %7074 = vmatpush3.bf16.msra.mxu1 %v7697_v31 }
0x1023   : > { %7053 = vmatprep.subr.bf16.mxu0 %v7698_v53  ;;  %7075 = vmatprep.subr.bf16.mxu1 %v7699_v0 }
0x1026   : > { %7054 = vmatpush3.bf16.msra.mxu0 %v7700_v19  ;;  %7076 = vmatpush3.bf16.msra.mxu1 %v7701_v20 }
0x1027   : > { %7055 = vmatprep.subr.bf16.mxu0 %v7702_v21  ;;  %7077 = vmatprep.subr.bf16.mxu1 %v7703_v22 }
0x102a   : > { %7056 = vmatpush3.bf16.msra.mxu0 %v7704_v60  ;;  %7078 = vmatpush3.bf16.msra.mxu1 %v7705_v24 }
0x102b   : > { %7057 = vmatprep.subr.bf16.mxu0 %v7706_v2  ;;  %7079 = vmatprep.subr.bf16.mxu1 %v7707_v27 }
0x102e   : > { %7058 = vmatpush3.bf16.msra.mxu0 %v7708_v25  ;;  %7080 = vmatpush3.bf16.msra.mxu1 %v7709_v44 }
0x10e4   : > { %v5885_v16 = vpop.f32.mrb[88].mxu0  ;;  %v5928_v6 = vpop.f32.mrb[88].mxu1 }
0x10e5   : > { %v5886_v26 = vadd.f32 %v5885_v16, %v5674_v13  ;;  %v5929_v5 = vadd.f32 %v5928_v6, %v5682_v3  ;;  %v5887_v61 = vpop.f32.mrb[89].mxu0  ;;  %v5930_v23 = vpop.f32.mrb[89].mxu1 }
0x10e6   : > { %v5888_v58 = vadd.f32 %v5887_v61, %v5678_v57  ;;  %v5931_v59 = vadd.f32 %v5930_v23, %v5686_v56  ;;  %v5889_v29 = vpop.f32.mrb[90].mxu0  ;;  %v5932_v40 = vpop.f32.mrb[90].mxu1 }
0x10e7   : > { %v5890_v62 = vadd.f32 %v5889_v29, %v5674_v13  ;;  %v5933_v63 = vadd.f32 %v5932_v40, %v5682_v3  ;;  %v5891_v46 = vpop.f32.mrb[91].mxu0  ;;  %v5934_v45 = vpop.f32.mrb[91].mxu1  ;;  %v5937_v54 = vmax.f32 %v5886_v26, 0.0  ;;  %v5939_v47 = vmax.f32 %v5929_v5, 0.0 }
0x10e8   : > { %v5892_v38 = vadd.f32 %v5891_v46, %v5678_v57  ;;  %v5935_v4 = vadd.f32 %v5934_v45, %v5686_v56  ;;  %v5938_v48 = vmax.f32 %v5888_v58, 0.0  ;;  %v5940_v32 = vmax.f32 %v5931_v59, 0.0  ;;  %v6923_v57 = vld [vmem:[#allocation3] ss:$0 sm:$0xff] (!%p6922_p5) }
0x10e9   : > { %v5941_v42 = vmax.f32 %v5890_v62, 0.0  ;;  %v5943_v41 = vmax.f32 %v5933_v63, 0.0 }
0x10ea   : > { %v5942_v49 = vmax.f32 %v5892_v38, 0.0  ;;  %v5944_v50 = vmax.f32 %v5935_v4, 0.0 }
0x10eb   : > { %v6009_v11 = vpack.c.bf16 %v5941_v42, %v5937_v54  ;;  %v6011_v1 = vpack.c.bf16 %v5943_v41, %v5939_v47 }
0x10ec   : > { %v6010_v7 = vpack.c.bf16 %v5942_v49, %v5938_v48  ;;  %v6012_v28 = vpack.c.bf16 %v5944_v50, %v5940_v32 }
0x10ee   : > { %6244 = vmatprep.mubr.bf16.mxu0 %v6010_v7  ;;  %6285 = vmatprep.mubr.bf16.mxu1 %v6012_v28 }
0x10ef   : > { %6245 = vmatmul.mubr.bf16.vlgmr.msra.gmra.mrb[92].mxu0 %v6009_v11  ;;  %6286 = vmatmul.mubr.bf16.vlgmr.msra.gmra.mrb[92].mxu1 %v6011_v1 }
0x11c2   : > { %v7059_v9 = vpop.f32.mrb[92].mxu0  ;;  %v7081_v8 = vpop.f32.mrb[92].mxu1 }
0x11c3   : > { %v7060_v51 = vpop.f32.mrb[93].mxu0  ;;  %v7082_v12 = vpop.f32.mrb[93].mxu1 }
0x11c4   : > { %v7061_v14 = vadd.f32 %v7060_v51, %v7059_v9  ;;  %v7083_v33 = vadd.f32 %v7082_v12, %v7081_v8  ;;  %v7062_v15 = vpop.f32.mrb[94].mxu0  ;;  %v7084_v17 = vpop.f32.mrb[94].mxu1 }
0x11c5   : > { %v7063_v55 = vpop.f32.mrb[95].mxu0  ;;  %v7085_v18 = vpop.f32.mrb[95].mxu1 }
0x11c6   : > { %v6247_v10 = vadd.f32 %v7061_v14, %v6889_v34  ;;  %v7064_v31 = vadd.f32 %v7063_v55, %v7062_v15  ;;  %v7086_v53 = vadd.f32 %v7085_v18, %v7084_v17 }
0x11c8   : > { %v6288_v0 = vadd.f32 %v7083_v33, %v6247_v10  ;;  %v6250_v19 = vadd.f32 %v7064_v31, %v6889_v34  ;;  %6301 = sbr.rel (%p6922_p5) target bundleno = 4870 (0x1306), region = 136 }
0x11ca   : > { %v6294_v20 = vadd.f32 %v6288_v0, %v9706_v52  ;;  %v6291_v21 = vadd.f32 %v7086_v53, %v6250_v19 }
0x11cc   : > { %6296 = vst [vmem:[#allocation2] sm:$0xff] %v6294_v20  ;;  %v6295_v22 = vadd.f32 %v6291_v21, %v9708_v30  ;;  %6303 = vadd.xlane.f32.xlu0 (!%p6922_p5), %v6294_v20 }
0x11ce   : > { %6297 = vst [vmem:[#allocation2 + $0x8] sm:$0xff] %v6295_v22 }
0x11d0   : > { %6305 = vadd.xlane.f32.xlu0 %v6295_v22 }
0x1259   : > { %v6304_v60 = vpop.xlane.xlu0 %6303 }
0x125a   : > { %v6307_v24 = vmul.f32 0.0078125, %v6304_v60 }
0x125c   : > { %v6309_v2 = vsub.f32 %v6294_v20, %v6307_v24 }
0x125d   : > { %v6306_v27 = vpop.xlane.xlu0 %6305 }
0x125e   : > { %v6308_v25 = vmul.f32 0.0078125, %v6306_v27  ;;  %v6311_v44 = vmul.f32 %v6309_v2, %v6309_v2 }
0x1260   : > { %v6310_v35 = vsub.f32 %v6295_v22, %v6308_v25  ;;  %6313 = vadd.xlane.f32.xlu1 %v6311_v44 }
0x1262   : > { %v6312_v52 = vmul.f32 %v6310_v35, %v6310_v35 }
0x1264   : > { %6315 = vadd.xlane.f32.xlu1 %v6312_v52 }
0x12ed   : > { %v6314_v36 = vpop.xlane.xlu1 %6313 }
0x12ee   : > { %v6317_v30 = vmul.f32 0.0078125, %v6314_v36 }
0x12f0   : > { %v6319_v37 = vadd.f32 1e-05, %v6317_v30 }
0x12f1   : > { %v6316_v39 = vpop.xlane.xlu1 %6315 }
0x12f2   : > { %7786 = vrsqrt.f32 %v6319_v37  ;;  %v6318_v43 = vmul.f32 0.0078125, %v6316_v39 }
0x12f4   : > { %v6320_v13 = vadd.f32 1e-05, %v6318_v43 }
0x12f6   : > { %7788 = vrsqrt.f32 %v6320_v13 }
0x12fc   : > { %v7787_v3 = vpop.eup %7786 }
0x12fd   : > { %v6323_v56 = vmul.f32 %v7787_v3, %v6309_v2 }
0x12ff   : > { %v6331_v16 = vmul.f32 %v6923_v57, %v6323_v56 }
0x1300   : > { %v7789_v6 = vpop.eup %7788 }
0x1301   : > { %6333 = vst [vmem:[%s8846_s7] sm:$0xff] %v6331_v16  ;;  %v6324_v26 = vmul.f32 %v7789_v6, %v6310_v35 }
0x1303   : > { %v6332_v5 = vmul.f32 %v6923_v57, %v6324_v26 }
0x1305   : > { %6334 = vst [vmem:[%s8846_s7 + $0x8] sm:$0xff] %v6332_v5 }
0x1306 PF: > { %s9975_s14 = sld [smem:[#allocation31_spill]]  ;;  %s9976_s15 = sld [smem:[#allocation26_spill]] }
0x1307   : > { %s9977_s26 = sld [smem:[#allocation38_spill]]  ;;  %s9978_s11 = sld [smem:[#allocation60_spill]] }
0x1308   : > { %s6349_s6 = sshll.u32 %s8846_s7, 4  ;;  %s8221_s28 = smov [#allocation18]   ;;  %s9764_s6 = int_to_ptr.vmem [resolvable:$true] %s6349_s6 }
0x1309   : > { %s8058_s27 = scalar_lea.vmem %s9764_s6, 256  ;;  %s8062_s1 = sshll.u32 %s8221_s28, 4  ;;  %s8063_s1 = int_to_ptr.vmem [resolvable:$false] %s8062_s1 }
0x130a   : > { %p8059_p4 = scmp.ne.s32.totalorder %s9764_s6, %s8058_s27  ;;  %s8064_s4 = scalar_lea.vmem %s8063_s1, 512 }
0x130b   : > { %p8065_p0 = scmp.lt.s32.totalorder %s9764_s6, %s8063_s1  ;;  %p8066_p1 = scmp.lt.s32.totalorder %s8064_s4, %s8058_s27 }
0x130c   : > { %s6936_s9 = sshll.u32 %s9975_s14, 8  ;;  %s9979_s0 = sand.u32 1, %s9976_s15  }
0x130d   : > { %s9761_s10 = scalar_lea.hbm %s9978_s11, %s6936_s9  ;;  %s9768_s30 = scalar_lea.sflag [#allocation5], %s9979_s0 }
0x130e   : > { %p9980_p11 = scmp.ne.s32.totalorder %s9977_s26, 0  ;;  %p8067_p10 = por %p8066_p1, %p8065_p0 }
0x1310   : > { %p8060_p7 = pnand %p8059_p4, %p9980_p11 }
0x1312   : > { %p8061_p13 = pneg %p8060_p7 }
0x1314   : > { %p8068_p8 = pnand %p8067_p10, %p8061_p13 }
0x1316   : > { %8071 = shalt.err (!%p8068_p8)
}
0x1317   : > { %s8072_s7 = scalar_lea.hbm %s9761_s10, 256  ;;  %s8076_s16 = scalar_lea.hbm %s9978_s11, 512 }
0x1318   : > { %p8073_p12 = scmp.ne.s32.totalorder %s9761_s10, %s8072_s7  ;;  %p8077_p3 = scmp.lt.u32.totalorder %s9761_s10, %s9978_s11 }
0x1319   : > { %p8078_p6 = scmp.lt.u32.totalorder %s8076_s16, %s8072_s7  ;;  %p8080_p4 = scmp.lt.u32.totalorder %s8072_s7, %s9761_s10 }
0x131a   : > { %p8074_p9 = pnand %p8073_p12, %p9980_p11 }
0x131b   : > { %p8079_p5 = por %p8078_p6, %p8077_p3 }
0x131c   : > { %p8075_p2 = pneg %p8074_p9 }
0x131d   : > { %p8081_p7 = por %p8080_p4, %p8079_p5 }
0x131f   : > { %p8082_p13 = pnand %p8081_p7, %p8075_p2 }
0x1321   : > { %8085 = shalt.err (!%p8082_p13)
}
0x1322   : > { %s8222_s13 = smov 128   ;;  %s8223_s25 = smov 8  }
0x1323   : > { %7406 = dma.vmem_to_hbm [thread:$0]  (%p9980_p11), %s9764_s6, 256, %s9761_s10, %s9768_s30, %s8222_s13, %s8222_s13, %s8223_s25  }
0x1324 PF: > { %s9981_s22 = sld [smem:[#allocation34_spill]]  ;;  %s9982_s20 = sld [smem:[#allocation25_spill]] }
0x1325   : > { %s9983_s18 = sld [smem:[#allocation39_spill]] }
0x132a   : > { %p7444_p0 = scmp.ge.s32.totalorder %s9981_s22, 2  ;;  %s6364_s5 = sand.u32 1, %s9982_s20  }
0x132b   : > { %p9984_p1 = scmp.ne.s32.totalorder %s9983_s18, 0  ;;  %s6365_s19 = scalar_lea.sflag [#allocation5], %s6364_s5 }
0x132d   : > { %p7438_p10 = pnand %p7444_p0, %p9984_p1 }
0x132f   : > { %8151 = dma.done.wait (!%p7438_p10), %s6365_s19, 256  }
0x1330   : > { %8153 = vsyncadd (!%p7438_p10), %s6365_s19, 4294967040  ;;  %s44_s2 = sadd.s32 1, %s9981_s22   ;;  %s9985_s27 = sld [smem:[#allocation26_spill]] }
0x1331   : > { %p41_p8 = scmp.ge.s32.totalorder %s44_s2, 6   ;;  %s9986_s28 = sld [smem:[#allocation27_spill]] }
0x1332   : > { %s9987_s29 = sld [smem:[#allocation40_spill]]  ;;  %s9988_s30 = sld [smem:[#allocation28_spill]] }
0x1333   : > { %s9989_s0 = sld [smem:[#allocation29_spill]]  ;;  %s9990_s19 = sld [smem:[#allocation36_spill]] }
0x1334   : > { %s9991_s1 = sld [smem:[#allocation32_spill]]  ;;  %s9992_s20 = sld [smem:[#allocation33_spill]] }
0x1335   : > { %s9993_s21 = sld [smem:[#allocation35_spill]]  ;;  %s9994_s22 = sld [smem:[#allocation37_spill]] }
0x1336   :  { %43 = sbr.rel (!%p41_p8) target bundleno = 36 (0x24), region = 260 }
0x133d   :  { %6370 = vsyncpa [#allocation4], 1 }
0x133e   :  { %6372 = vsyncpa [#allocation4 + $0x1], 1 }
0x133f   :  { %6373 = vsyncpa [#allocation7], 1 }
0x1340   :  { %6375 = vsyncpa [#allocation7 + $0x1], 1 }
0x1341   :  { %6376 = vsyncpa [#allocation10], 1 }
0x1342   :  { %6378 = vsyncpa [#allocation10 + $0x1], 1 }
0x1343   :  { %6379 = vsyncpa [#allocation13], 1 }
0x1344   :  { %6381 = vsyncpa [#allocation13 + $0x1], 1 }
0x1345   :  { %6382 = vsyncpa [#allocation16], 1 }
0x1346   :  { %6384 = vsyncpa [#allocation16 + $0x1], 1 }
0x1347   :  { %6385 = vsyncpa [#allocation5], 1 }
0x1348   :  { %6387 = vsyncpa [#allocation5 + $0x1], 1 }

</bundles_post_ra>
